<compile_context>
chip_gen: v7x
topology: tpu7x:2x2x1
jax: 0.10.0
libtpu: 0.0.40
codegen_flags: <defaults>
</compile_context>

<pallas_src>
import numpy as np
import jax
import jax.numpy as jnp
from jax import lax
from jax.experimental import pallas as pl
from jax.experimental.pallas import tpu as pltpu


# ----------------------------------------------------------------- helpers
def _pad128(n: int) -> int:
    return ((n + 127) // 128) * 128


def _recip(x):
    # EUP approximate reciprocal + one Newton step (inputs are >= 1 here).
    r = pl.reciprocal(x, approx=True)
    return r * (2.0 - x * r)


def _silu(x):
    # numerically stable SiLU: sigmoid(x) = 0.5*(1 + tanh(x/2)); tanh is EUP.
    return x * (0.5 * jnp.tanh(0.5 * x) + 0.5)


# ------------------------------------------------------------------ kernel
def _make_kernel(N, F, E, H1, H2, offsets):
    (o_wc1, o_wc2, o_w2, o_wo, o_b1, o_b2, o_bo, bias_row) = offsets
    F10 = 10 * F
    # plane -> which F-column block of the [F, 3F] fused weight (I=0, A=1, S=2)
    SEL = (0, 1, 1, 1, 2, 2, 2, 2, 2, 2)

    def planes_from_slab(S):
        # slab layout: [I | A01 A02 A12 | S00 S11 S22 S01 S02 S12]
        def blk(p):
            return S[:, p * F:(p + 1) * F]
        i_ = blk(0)
        a01, a02, a12 = blk(1), blk(2), blk(3)
        s00, s11, s22 = blk(4), blk(5), blk(6)
        s01, s02, s12 = blk(7), blk(8), blk(9)
        P = [None] * 9
        P[0] = i_ + s00
        P[4] = i_ + s11
        P[8] = i_ + s22
        P[1] = a01 + s01
        P[3] = s01 - a01
        P[2] = a02 + s02
        P[6] = s02 - a02
        P[5] = a12 + s12
        P[7] = s12 - a12
        return P

    def kernel(x_ref, edge_ref, recv_ref, w_ref, out_ref):
        f32 = jnp.float32

        # ---- packed weight/bias slab: static, lane-aligned ref slices -------
        wc1 = w_ref[0:F, o_wc1:o_wc1 + 3 * F]          # [F, 3F] stage-1 (I|A|S)
        wc2 = w_ref[0:F, o_wc2:o_wc2 + 3 * F]          # [F, 3F] stage-4
        w2t = w_ref[0:H1, o_w2:o_w2 + H2]              # [H1, H2]
        wo = w_ref[0:H2, o_wo:o_wo + F10]              # [H2, 10F] fused MLP heads
        b1 = w_ref[bias_row:bias_row + 1, o_b1:o_b1 + H1]
        b2 = w_ref[bias_row:bias_row + 1, o_b2:o_b2 + H2]
        bo = w_ref[bias_row:bias_row + 1, o_bo:o_bo + F10]

        # ---- stage 1: normalize X, park X_norm in out_ref -------------------
        xp = [x_ref[c] for c in range(9)]              # 9 x [N, F]
        norm = xp[0] * xp[0]
        for c in range(1, 9):
            norm = norm + xp[c] * xp[c]
        inv_n = _recip(norm + 1.0)
        xn = [p * inv_n for p in xp]
        for c in range(9):                              # parked; re-read at end
            out_ref[:, c * F:(c + 1) * F] = xn[c]

        # irrep decomposition -> 10 unique planes, sublane-stacked
        tr3 = (xn[0] + xn[4] + xn[8]) * (1.0 / 3.0)
        p1 = [tr3,
              0.5 * (xn[1] - xn[3]), 0.5 * (xn[2] - xn[6]), 0.5 * (xn[5] - xn[7]),
              xn[0] - tr3, xn[4] - tr3, xn[8] - tr3,
              0.5 * (xn[1] + xn[3]), 0.5 * (xn[2] + xn[6]), 0.5 * (xn[5] + xn[7])]
        pst = jnp.concatenate(p1, axis=0)               # [10N, F]
        # ONE matmul for linear_I / linear_A / linear_S
        all1 = jnp.dot(pst, wc1, preferred_element_type=f32)       # [10N, 3F]
        U = jnp.concatenate(
            [all1[p * N:(p + 1) * N, SEL[p] * F:(SEL[p] + 1) * F]
             for p in range(10)], axis=1)               # [N, 10F]

        # ---- stage 2: edge MLP (first layer folded into the wrapper) --------
        rad1 = edge_ref[:, 0:H1]                        # radial @ W1^T
        phi = edge_ref[:, H1:H1 + 1]                    # [E, 1]
        send = edge_ref[:, H1 + 1:H1 + 2].astype(jnp.int32)        # [E, 1]
        h = _silu(phi * rad1 + b1)
        h = _silu(jnp.dot(h, w2t, preferred_element_type=f32) + b2)
        # columns: [f_I | f_A x3 | f_S x6] -- matches U's plane layout
        mult = phi * _silu(jnp.dot(h, wo, preferred_element_type=f32) + bo)  # [E,10F]

        # ---- stage 3: gather / scatter via in-kernel one-hot matmuls --------
        recv = recv_ref[...].astype(jnp.int32)          # [1, E]
        send_oh = (lax.broadcasted_iota(jnp.int32, (E, N), 1) == send).astype(f32)
        recv_ohT = (lax.broadcasted_iota(jnp.int32, (N, E), 0) == recv).astype(f32)
        gat = jnp.dot(send_oh, U, preferred_element_type=f32)              # [E, 10F]
        SC = jnp.dot(recv_ohT, gat * mult, preferred_element_type=f32)     # [N, 10F]

        # ---- stage 4: T = M@Y + Y@M, decompose, normalize, second linears ---
        Y = planes_from_slab(U)
        M = planes_from_slab(SC)
        T = [None] * 9
        for r in range(3):
            for c in range(3):
                t = None
                for k in range(3):
                    term = (M[3 * r + k] * Y[3 * k + c]
                            + Y[3 * r + k] * M[3 * k + c])
                    t = term if t is None else t + term
                T[3 * r + c] = t

        norm2 = T[0] * T[0]
        for c in range(1, 9):
            norm2 = norm2 + T[c] * T[c]
        inv2 = _recip(norm2 + 1.0)
        tr3t = (T[0] + T[4] + T[8]) * (1.0 / 3.0)
        p2 = [tr3t * inv2,
              0.5 * (T[1] - T[3]) * inv2, 0.5 * (T[2] - T[6]) * inv2,
              0.5 * (T[5] - T[7]) * inv2,
              (T[0] - tr3t) * inv2, (T[4] - tr3t) * inv2, (T[8] - tr3t) * inv2,
              0.5 * (T[1] + T[3]) * inv2, 0.5 * (T[2] + T[6]) * inv2,
              0.5 * (T[5] + T[7]) * inv2]
        pst2 = jnp.concatenate(p2, axis=0)              # [10N, F]
        all2 = jnp.dot(pst2, wc2, preferred_element_type=f32)      # [10N, 3F]

        def a2(p):
            return all2[p * N:(p + 1) * N, SEL[p] * F:(SEL[p] + 1) * F]

        il2 = a2(0)
        a01w, a02w, a12w = a2(1), a2(2), a2(3)
        s00w, s11w, s22w = a2(4), a2(5), a2(6)
        s01w, s02w, s12w = a2(7), a2(8), a2(9)
        Yn = [None] * 9
        Yn[0] = il2 + s00w
        Yn[4] = il2 + s11w
        Yn[8] = il2 + s22w
        Yn[1] = a01w + s01w
        Yn[3] = s01w - a01w
        Yn[2] = a02w + s02w
        Yn[6] = s02w - a02w
        Yn[5] = a12w + s12w
        Yn[7] = s12w - a12w

        # ---- output: X_norm (parked in out_ref) + Yn + Yn@Yn, per plane -----
        for r in range(3):
            for c in range(3):
                idx = 3 * r + c
                yy = (Yn[3 * r + 0] * Yn[0 + c]
                      + Yn[3 * r + 1] * Yn[3 + c]
                      + Yn[3 * r + 2] * Yn[6 + c])
                out_ref[:, idx * F:(idx + 1) * F] = (
                    out_ref[:, idx * F:(idx + 1) * F] + Yn[idx] + yy)

    return kernel


# ------------------------------------------------------------------- params
def init_raw_params(key, num_features, num_radial, mlp_hidden_dims):
    F, R = num_features, num_radial
    H1, H2 = mlp_hidden_dims
    ks = jax.random.split(key, 12)

    def lin_w(k, out_d, in_d):
        return jax.random.normal(k, (out_d, in_d), jnp.float32) / jnp.sqrt(in_d)

    return dict(
        W_I=lin_w(ks[0], F, F), W_A=lin_w(ks[1], F, F), W_S=lin_w(ks[2], F, F),
        W_In=lin_w(ks[3], F, F), W_An=lin_w(ks[4], F, F), W_Sn=lin_w(ks[5], F, F),
        W1=lin_w(ks[6], H1, R), b1=0.1 * jax.random.normal(ks[7], (H1,), jnp.float32),
        W2=lin_w(ks[8], H2, H1), b2=0.1 * jax.random.normal(ks[9], (H2,), jnp.float32),
        Wout=lin_w(ks[10], 3 * F, H2),
        bout=0.1 * jax.random.normal(ks[11], (3 * F,), jnp.float32),
    )


def prepare_kernel_params(raw, num_features, mlp_hidden_dims):
    """Pack all weights + biases into ONE lane-aligned [max(F,H)+1, W] slab."""
    F = num_features
    H1, H2 = mlp_hidden_dims
    F10 = 10 * F

    o_wc1 = 0
    o_wc2 = o_wc1 + _pad128(3 * F)
    o_w2 = o_wc2 + _pad128(3 * F)
    o_wo = o_w2 + _pad128(H2)
    width = o_wo + _pad128(F10)
    o_b1, o_b2, o_bo = 0, _pad128(H1), _pad128(H1) + _pad128(H2)
    assert o_bo + F10 <= width

    rows = max(F, H1, H2)
    bias_row = rows
    w = np.zeros((rows + 1, width), np.float32)

    wc1 = np.concatenate([np.asarray(raw["W_I"]).T, np.asarray(raw["W_A"]).T,
                          np.asarray(raw["W_S"]).T], axis=1)          # [F, 3F]
    wc2 = np.concatenate([np.asarray(raw["W_In"]).T, np.asarray(raw["W_An"]).T,
                          np.asarray(raw["W_Sn"]).T], axis=1)         # [F, 3F]
    Wout = np.asarray(raw["Wout"])                                    # [3F, H2]
    bout = np.asarray(raw["bout"])                                    # [3F]
    WoI, WoA, WoS = Wout[0::3].T, Wout[1::3].T, Wout[2::3].T          # [H2, F] each
    wo10 = np.concatenate([WoI] + [WoA] * 3 + [WoS] * 6, axis=1)      # [H2, 10F]
    bo10 = np.concatenate([bout[0::3]] + [bout[1::3]] * 3 + [bout[2::3]] * 6)

    w[0:F, o_wc1:o_wc1 + 3 * F] = wc1
    w[0:F, o_wc2:o_wc2 + 3 * F] = wc2
    w[0:H1, o_w2:o_w2 + H2] = np.asarray(raw["W2"]).T
    w[0:H2, o_wo:o_wo + F10] = wo10
    w[bias_row, o_b1:o_b1 + H1] = np.asarray(raw["b1"])
    w[bias_row, o_b2:o_b2 + H2] = np.asarray(raw["b2"])
    w[bias_row, o_bo:o_bo + F10] = bo10

    return dict(
        w_slab=jnp.asarray(w),
        W1=jnp.asarray(raw["W1"]),      # first MLP layer, folded into the wrapper
        offsets=(o_wc1, o_wc2, o_w2, o_wo, o_b1, o_b2, o_bo, bias_row),
        dims=(F, H1, H2),
    )


# ------------------------------------------------------------------ wrapper
def interaction_forward(X, radial, phi, sender, receiver, kp):
    """Batched over graphs.  X: [G,N,F,3,3], radial: [G,E,R], phi: [G,E,1],
    sender/receiver: [G,E] int.  Returns [G,N,F,3,3]."""
    f32 = jnp.float32
    G, N, F = X.shape[0], X.shape[1], X.shape[2]
    E = radial.shape[1]
    Fk, H1, H2 = kp["dims"]
    assert F == Fk

    # component-major node tensor: [G, 9, N, F]
    x_comp = jnp.transpose(X.reshape(G, N, F, 9), (0, 3, 1, 2)).astype(f32)
    # (phi*radial)@W1^T == phi*(radial@W1^T): fold the K=num_radial matmul out.
    rad1 = jnp.einsum('ger,hr->geh', radial, kp["W1"])                  # [G, E, H1]
    edge_slab = jnp.concatenate(
        [rad1, phi.astype(f32), sender.astype(f32)[..., None]], axis=-1)  # [G,E,H1+2]
    recv_row = receiver.astype(f32)[:, None, :]                          # [G, 1, E]
    w_slab = kp["w_slab"]

    kernel = _make_kernel(N, F, E, H1, H2, kp["offsets"])
    out = pl.pallas_call(
        kernel,
        grid=(G,),
        in_specs=[
            pl.BlockSpec((None, 9, N, F), lambda g: (g, 0, 0, 0)),
            pl.BlockSpec((None, E, H1 + 2), lambda g: (g, 0, 0)),
            pl.BlockSpec((None, 1, E), lambda g: (g, 0, 0)),
            # constant index_map -> weights stay VMEM-resident across graphs
            pl.BlockSpec(w_slab.shape, lambda g: (0, 0)),
        ],
        out_specs=pl.BlockSpec((None, N, 9 * F), lambda g: (g, 0, 0)),
        out_shape=jax.ShapeDtypeStruct((G, N, 9 * F), f32),
        compiler_params=pltpu.CompilerParams(
            dimension_semantics=("parallel",)),   # megacore-shard graphs on v7x
    )(x_comp, edge_slab, recv_row, w_slab)

    # [G, N, 9F] -> [G, N, F, 3, 3]
    return jnp.transpose(out.reshape(G, N, 9, F), (0, 1, 3, 2)).reshape(G, N, F, 3, 3)


# --------------------------------------------------------------- reference
def reference_forward(X, radial, phi, sender, receiver, num_nodes, raw):
    def tensor_norm(t):
        return jnp.sum(t * t, axis=(-2, -1))

    def decompose(t):
        eye = jnp.eye(3, dtype=t.dtype)
        tr3 = jnp.trace(t, axis1=-2, axis2=-1) / 3.0
        I = tr3[..., None, None] * eye
        A = 0.5 * (t - jnp.swapaxes(t, -1, -2))
        S = 0.5 * (t + jnp.swapaxes(t, -1, -2)) - I
        return I, A, S

    def lin(t, W):
        return jnp.einsum('nfrc,gf->ngrc', t, W)

    def silu(x):
        return x * jax.nn.sigmoid(x)

    Xn = X / (tensor_norm(X)[..., None, None] + 1.0)
    I_i, A_i, S_i = decompose(Xn)
    I_l, A_l, S_l = lin(I_i, raw["W_I"]), lin(A_i, raw["W_A"]), lin(S_i, raw["W_S"])
    Y = I_l + A_l + S_l
    h = radial * phi
    h = silu(h @ raw["W1"].T + raw["b1"])
    h = silu(h @ raw["W2"].T + raw["b2"])
    fs = phi * silu(h @ raw["Wout"].T + raw["bout"])
    F = X.shape[1]
    fs = fs.reshape(fs.shape[0], F, 3)
    f_I, f_A, f_S = fs[:, :, 0], fs[:, :, 1], fs[:, :, 2]
    M_ji = (f_I[:, :, None, None] * I_l[sender]
            + f_A[:, :, None, None] * A_l[sender]
            + f_S[:, :, None, None] * S_l[sender])
    M = jax.ops.segment_sum(M_ji, receiver, num_segments=num_nodes)
    T = jnp.matmul(M, Y) + jnp.matmul(Y, M)
    I_n, A_n, S_n = decompose(T)
    d = tensor_norm(I_n + A_n + S_n)[..., None, None] + 1.0
    I_n, A_n, S_n = I_n / d, A_n / d, S_n / d
    Yn = lin(I_n, raw["W_In"]) + lin(A_n, raw["W_An"]) + lin(S_n, raw["W_Sn"])
    return Xn + Yn + jnp.matmul(Yn, Yn)


if __name__ == "__main__":
    G, N, F, R, E = 2, 16, 32, 8, 32
    mlp_hidden = [32, 32]

    key = jax.random.PRNGKey(0)
    k_x, k_r, k_p, k_s, k_rcv, k_par = jax.random.split(key, 6)
    X = jax.random.normal(k_x, (G, N, F, 3, 3), jnp.float32)             # data['X_i']
    radial = jax.random.normal(k_r, (G, E, R), jnp.float32)              # radial_feats
    phi = jax.nn.sigmoid(jax.random.normal(k_p, (G, E, 1), jnp.float32))  # phi_ji
    sender = jax.random.randint(k_s, (G, E), 0, N)                       # edge_index[0]
    receiver = jax.random.randint(k_rcv, (G, E), 0, N)                   # edge_index[1]

    raw = init_raw_params(k_par, F, R, mlp_hidden)
    kp = prepare_kernel_params(raw, F, mlp_hidden)

    out = interaction_forward(X, radial, phi, sender, receiver, kp)
    out = jax.block_until_ready(out)

    for g in range(G):
        ref = reference_forward(X[g], radial[g], phi[g], sender[g], receiver[g], N, raw)
        np.testing.assert_allclose(np.asarray(out[g]), np.asarray(ref),
                                   rtol=5e-3, atol=5e-3)
    print("KERNEL_OK")
</pallas_src>

<mosaic_0001>
module attributes {stable_mosaic.version = 11 : i64} {
  func.func @kernel(%arg0: i32, %arg1: memref<1x9x16x32xf32, #tpu.memory_space<vmem>>, %arg2: memref<1x32x34xf32, #tpu.memory_space<vmem>>, %arg3: memref<1x1x32xf32, #tpu.memory_space<vmem>>, %arg4: memref<33x768xf32, #tpu.memory_space<vmem>>, %arg5: memref<1x16x288xf32, #tpu.memory_space<vmem>>) attributes {dimension_semantics = [#tpu.dimension_semantics<parallel>], iteration_bounds = array<i64: 2>, scalar_prefetch = 0 : i64, scratch_operands = 0 : i64, tpu.core_type = #tpu.core_type<tc>, window_params = [{transform_indices = @transform_0, window_bounds = array<i64: 1, 9, 16, 32>}, {transform_indices = @transform_1, window_bounds = array<i64: 1, 32, 34>}, {transform_indices = @transform_2, window_bounds = array<i64: 1, 1, 32>}, {pipeline_mode = #tpu.pipeline_mode<synchronous>, transform_indices = @transform_3, window_bounds = array<i64: 33, 768>}, {transform_indices = @transform_4, window_bounds = array<i64: 1, 16, 288>}]} {
    %c0 = arith.constant 0 : index
    %c0_0 = arith.constant 0 : index
    %0 = vector.load %arg4[%c0, %c0_0] : memref<33x768xf32, #tpu.memory_space<vmem>>, vector<32x96xf32>
    %c0_1 = arith.constant 0 : index
    %c128 = arith.constant 128 : index
    %1 = vector.load %arg4[%c0_1, %c128] : memref<33x768xf32, #tpu.memory_space<vmem>>, vector<32x96xf32>
    %c0_2 = arith.constant 0 : index
    %c256 = arith.constant 256 : index
    %2 = vector.load %arg4[%c0_2, %c256] : memref<33x768xf32, #tpu.memory_space<vmem>>, vector<32x32xf32>
    %c0_3 = arith.constant 0 : index
    %c384 = arith.constant 384 : index
    %3 = vector.load %arg4[%c0_3, %c384] : memref<33x768xf32, #tpu.memory_space<vmem>>, vector<32x320xf32>
    %c32 = arith.constant 32 : index
    %c0_4 = arith.constant 0 : index
    %4 = vector.load %arg4[%c32, %c0_4] : memref<33x768xf32, #tpu.memory_space<vmem>>, vector<1x32xf32>
    %c32_5 = arith.constant 32 : index
    %c128_6 = arith.constant 128 : index
    %5 = vector.load %arg4[%c32_5, %c128_6] : memref<33x768xf32, #tpu.memory_space<vmem>>, vector<1x32xf32>
    %c32_7 = arith.constant 32 : index
    %c256_8 = arith.constant 256 : index
    %6 = vector.load %arg4[%c32_7, %c256_8] : memref<33x768xf32, #tpu.memory_space<vmem>>, vector<1x320xf32>
    %c0_9 = arith.constant 0 : index
    %c0_10 = arith.constant 0 : index
    %c0_11 = arith.constant 0 : index
    %c0_12 = arith.constant 0 : index
    %7 = vector.load %arg1[%c0_9, %c0_10, %c0_11, %c0_12] : memref<1x9x16x32xf32, #tpu.memory_space<vmem>>, vector<1x1x16x32xf32>
    %8 = vector.shape_cast %7 : vector<1x1x16x32xf32> to vector<16x32xf32>
    %c0_13 = arith.constant 0 : index
    %c1 = arith.constant 1 : index
    %c0_14 = arith.constant 0 : index
    %c0_15 = arith.constant 0 : index
    %9 = vector.load %arg1[%c0_13, %c1, %c0_14, %c0_15] : memref<1x9x16x32xf32, #tpu.memory_space<vmem>>, vector<1x1x16x32xf32>
    %10 = vector.shape_cast %9 : vector<1x1x16x32xf32> to vector<16x32xf32>
    %c0_16 = arith.constant 0 : index
    %c2 = arith.constant 2 : index
    %c0_17 = arith.constant 0 : index
    %c0_18 = arith.constant 0 : index
    %11 = vector.load %arg1[%c0_16, %c2, %c0_17, %c0_18] : memref<1x9x16x32xf32, #tpu.memory_space<vmem>>, vector<1x1x16x32xf32>
    %12 = vector.shape_cast %11 : vector<1x1x16x32xf32> to vector<16x32xf32>
    %c0_19 = arith.constant 0 : index
    %c3 = arith.constant 3 : index
    %c0_20 = arith.constant 0 : index
    %c0_21 = arith.constant 0 : index
    %13 = vector.load %arg1[%c0_19, %c3, %c0_20, %c0_21] : memref<1x9x16x32xf32, #tpu.memory_space<vmem>>, vector<1x1x16x32xf32>
    %14 = vector.shape_cast %13 : vector<1x1x16x32xf32> to vector<16x32xf32>
    %c0_22 = arith.constant 0 : index
    %c4 = arith.constant 4 : index
    %c0_23 = arith.constant 0 : index
    %c0_24 = arith.constant 0 : index
    %15 = vector.load %arg1[%c0_22, %c4, %c0_23, %c0_24] : memref<1x9x16x32xf32, #tpu.memory_space<vmem>>, vector<1x1x16x32xf32>
    %16 = vector.shape_cast %15 : vector<1x1x16x32xf32> to vector<16x32xf32>
    %c0_25 = arith.constant 0 : index
    %c5 = arith.constant 5 : index
    %c0_26 = arith.constant 0 : index
    %c0_27 = arith.constant 0 : index
    %17 = vector.load %arg1[%c0_25, %c5, %c0_26, %c0_27] : memref<1x9x16x32xf32, #tpu.memory_space<vmem>>, vector<1x1x16x32xf32>
    %18 = vector.shape_cast %17 : vector<1x1x16x32xf32> to vector<16x32xf32>
    %c0_28 = arith.constant 0 : index
    %c6 = arith.constant 6 : index
    %c0_29 = arith.constant 0 : index
    %c0_30 = arith.constant 0 : index
    %19 = vector.load %arg1[%c0_28, %c6, %c0_29, %c0_30] : memref<1x9x16x32xf32, #tpu.memory_space<vmem>>, vector<1x1x16x32xf32>
    %20 = vector.shape_cast %19 : vector<1x1x16x32xf32> to vector<16x32xf32>
    %c0_31 = arith.constant 0 : index
    %c7 = arith.constant 7 : index
    %c0_32 = arith.constant 0 : index
    %c0_33 = arith.constant 0 : index
    %21 = vector.load %arg1[%c0_31, %c7, %c0_32, %c0_33] : memref<1x9x16x32xf32, #tpu.memory_space<vmem>>, vector<1x1x16x32xf32>
    %22 = vector.shape_cast %21 : vector<1x1x16x32xf32> to vector<16x32xf32>
    %c0_34 = arith.constant 0 : index
    %c8 = arith.constant 8 : index
    %c0_35 = arith.constant 0 : index
    %c0_36 = arith.constant 0 : index
    %23 = vector.load %arg1[%c0_34, %c8, %c0_35, %c0_36] : memref<1x9x16x32xf32, #tpu.memory_space<vmem>>, vector<1x1x16x32xf32>
    %24 = vector.shape_cast %23 : vector<1x1x16x32xf32> to vector<16x32xf32>
    %25 = arith.mulf %8, %8 : vector<16x32xf32>
    %26 = arith.mulf %10, %10 : vector<16x32xf32>
    %27 = arith.addf %25, %26 : vector<16x32xf32>
    %28 = arith.mulf %12, %12 : vector<16x32xf32>
    %29 = arith.addf %27, %28 : vector<16x32xf32>
    %30 = arith.mulf %14, %14 : vector<16x32xf32>
    %31 = arith.addf %29, %30 : vector<16x32xf32>
    %32 = arith.mulf %16, %16 : vector<16x32xf32>
    %33 = arith.addf %31, %32 : vector<16x32xf32>
    %34 = arith.mulf %18, %18 : vector<16x32xf32>
    %35 = arith.addf %33, %34 : vector<16x32xf32>
    %36 = arith.mulf %20, %20 : vector<16x32xf32>
    %37 = arith.addf %35, %36 : vector<16x32xf32>
    %38 = arith.mulf %22, %22 : vector<16x32xf32>
    %39 = arith.addf %37, %38 : vector<16x32xf32>
    %40 = arith.mulf %24, %24 : vector<16x32xf32>
    %41 = arith.addf %39, %40 : vector<16x32xf32>
    %cst = arith.constant 1.000000e+00 : f32
    %42 = vector.broadcast %cst : f32 to vector<16x32xf32>
    %43 = arith.addf %41, %42 : vector<16x32xf32>
    %44 = tpu.reciprocal %43 {approx = true} : vector<16x32xf32> -> vector<16x32xf32>
    %45 = arith.mulf %43, %44 : vector<16x32xf32>
    %cst_37 = arith.constant 2.000000e+00 : f32
    %46 = vector.broadcast %cst_37 : f32 to vector<16x32xf32>
    %47 = arith.subf %46, %45 : vector<16x32xf32>
    %48 = arith.mulf %44, %47 : vector<16x32xf32>
    %49 = arith.mulf %8, %48 : vector<16x32xf32>
    %50 = arith.mulf %10, %48 : vector<16x32xf32>
    %51 = arith.mulf %12, %48 : vector<16x32xf32>
    %52 = arith.mulf %14, %48 : vector<16x32xf32>
    %53 = arith.mulf %16, %48 : vector<16x32xf32>
    %54 = arith.mulf %18, %48 : vector<16x32xf32>
    %55 = arith.mulf %20, %48 : vector<16x32xf32>
    %56 = arith.mulf %22, %48 : vector<16x32xf32>
    %57 = arith.mulf %24, %48 : vector<16x32xf32>
    %c0_38 = arith.constant 0 : index
    %c0_39 = arith.constant 0 : index
    %c0_40 = arith.constant 0 : index
    %58 = vector.load %arg5[%c0_38, %c0_39, %c0_40] : memref<1x16x288xf32, #tpu.memory_space<vmem>>, vector<1x16x32xf32>
    %59 = vector.shape_cast %58 : vector<1x16x32xf32> to vector<16x32xf32>
    %60 = vector.shape_cast %49 : vector<16x32xf32> to vector<1x16x32xf32>
    tpu.vector_store %arg5[%c0_38, %c0_39, %c0_40], %60 {strides = array<i32>} : memref<1x16x288xf32, #tpu.memory_space<vmem>>, vector<1x16x32xf32>,
    %c0_41 = arith.constant 0 : index
    %c0_42 = arith.constant 0 : index
    %c32_43 = arith.constant 32 : index
    %61 = vector.load %arg5[%c0_41, %c0_42, %c32_43] : memref<1x16x288xf32, #tpu.memory_space<vmem>>, vector<1x16x32xf32>
    %62 = vector.shape_cast %61 : vector<1x16x32xf32> to vector<16x32xf32>
    %63 = vector.shape_cast %50 : vector<16x32xf32> to vector<1x16x32xf32>
    tpu.vector_store %arg5[%c0_41, %c0_42, %c32_43], %63 {strides = array<i32>} : memref<1x16x288xf32, #tpu.memory_space<vmem>>, vector<1x16x32xf32>,
    %c0_44 = arith.constant 0 : index
    %c0_45 = arith.constant 0 : index
    %c64 = arith.constant 64 : index
    %64 = vector.load %arg5[%c0_44, %c0_45, %c64] : memref<1x16x288xf32, #tpu.memory_space<vmem>>, vector<1x16x32xf32>
    %65 = vector.shape_cast %64 : vector<1x16x32xf32> to vector<16x32xf32>
    %66 = vector.shape_cast %51 : vector<16x32xf32> to vector<1x16x32xf32>
    tpu.vector_store %arg5[%c0_44, %c0_45, %c64], %66 {strides = array<i32>} : memref<1x16x288xf32, #tpu.memory_space<vmem>>, vector<1x16x32xf32>,
    %c0_46 = arith.constant 0 : index
    %c0_47 = arith.constant 0 : index
    %c96 = arith.constant 96 : index
    %67 = vector.load %arg5[%c0_46, %c0_47, %c96] : memref<1x16x288xf32, #tpu.memory_space<vmem>>, vector<1x16x32xf32>
    %68 = vector.shape_cast %67 : vector<1x16x32xf32> to vector<16x32xf32>
    %69 = vector.shape_cast %52 : vector<16x32xf32> to vector<1x16x32xf32>
    tpu.vector_store %arg5[%c0_46, %c0_47, %c96], %69 {strides = array<i32>} : memref<1x16x288xf32, #tpu.memory_space<vmem>>, vector<1x16x32xf32>,
    %c0_48 = arith.constant 0 : index
    %c0_49 = arith.constant 0 : index
    %c128_50 = arith.constant 128 : index
    %70 = vector.load %arg5[%c0_48, %c0_49, %c128_50] : memref<1x16x288xf32, #tpu.memory_space<vmem>>, vector<1x16x32xf32>
    %71 = vector.shape_cast %70 : vector<1x16x32xf32> to vector<16x32xf32>
    %72 = vector.shape_cast %53 : vector<16x32xf32> to vector<1x16x32xf32>
    tpu.vector_store %arg5[%c0_48, %c0_49, %c128_50], %72 {strides = array<i32>} : memref<1x16x288xf32, #tpu.memory_space<vmem>>, vector<1x16x32xf32>,
    %c0_51 = arith.constant 0 : index
    %c0_52 = arith.constant 0 : index
    %c160 = arith.constant 160 : index
    %73 = vector.load %arg5[%c0_51, %c0_52, %c160] : memref<1x16x288xf32, #tpu.memory_space<vmem>>, vector<1x16x32xf32>
    %74 = vector.shape_cast %73 : vector<1x16x32xf32> to vector<16x32xf32>
    %75 = vector.shape_cast %54 : vector<16x32xf32> to vector<1x16x32xf32>
    tpu.vector_store %arg5[%c0_51, %c0_52, %c160], %75 {strides = array<i32>} : memref<1x16x288xf32, #tpu.memory_space<vmem>>, vector<1x16x32xf32>,
    %c0_53 = arith.constant 0 : index
    %c0_54 = arith.constant 0 : index
    %c192 = arith.constant 192 : index
    %76 = vector.load %arg5[%c0_53, %c0_54, %c192] : memref<1x16x288xf32, #tpu.memory_space<vmem>>, vector<1x16x32xf32>
    %77 = vector.shape_cast %76 : vector<1x16x32xf32> to vector<16x32xf32>
    %78 = vector.shape_cast %55 : vector<16x32xf32> to vector<1x16x32xf32>
    tpu.vector_store %arg5[%c0_53, %c0_54, %c192], %78 {strides = array<i32>} : memref<1x16x288xf32, #tpu.memory_space<vmem>>, vector<1x16x32xf32>,
    %c0_55 = arith.constant 0 : index
    %c0_56 = arith.constant 0 : index
    %c224 = arith.constant 224 : index
    %79 = vector.load %arg5[%c0_55, %c0_56, %c224] : memref<1x16x288xf32, #tpu.memory_space<vmem>>, vector<1x16x32xf32>
    %80 = vector.shape_cast %79 : vector<1x16x32xf32> to vector<16x32xf32>
    %81 = vector.shape_cast %56 : vector<16x32xf32> to vector<1x16x32xf32>
    tpu.vector_store %arg5[%c0_55, %c0_56, %c224], %81 {strides = array<i32>} : memref<1x16x288xf32, #tpu.memory_space<vmem>>, vector<1x16x32xf32>,
    %c0_57 = arith.constant 0 : index
    %c0_58 = arith.constant 0 : index
    %c256_59 = arith.constant 256 : index
    %82 = vector.load %arg5[%c0_57, %c0_58, %c256_59] : memref<1x16x288xf32, #tpu.memory_space<vmem>>, vector<1x16x32xf32>
    %83 = vector.shape_cast %82 : vector<1x16x32xf32> to vector<16x32xf32>
    %84 = vector.shape_cast %57 : vector<16x32xf32> to vector<1x16x32xf32>
    tpu.vector_store %arg5[%c0_57, %c0_58, %c256_59], %84 {strides = array<i32>} : memref<1x16x288xf32, #tpu.memory_space<vmem>>, vector<1x16x32xf32>,
    %85 = arith.addf %49, %53 : vector<16x32xf32>
    %86 = arith.addf %85, %57 : vector<16x32xf32>
    %cst_60 = arith.constant 0.333333343 : f32
    %87 = vector.broadcast %cst_60 : f32 to vector<16x32xf32>
    %88 = arith.mulf %86, %87 : vector<16x32xf32>
    %89 = arith.subf %50, %52 : vector<16x32xf32>
    %cst_61 = arith.constant 5.000000e-01 : f32
    %90 = vector.broadcast %cst_61 : f32 to vector<16x32xf32>
    %91 = arith.mulf %90, %89 : vector<16x32xf32>
    %92 = arith.subf %51, %55 : vector<16x32xf32>
    %cst_62 = arith.constant 5.000000e-01 : f32
    %93 = vector.broadcast %cst_62 : f32 to vector<16x32xf32>
    %94 = arith.mulf %93, %92 : vector<16x32xf32>
    %95 = arith.subf %54, %56 : vector<16x32xf32>
    %cst_63 = arith.constant 5.000000e-01 : f32
    %96 = vector.broadcast %cst_63 : f32 to vector<16x32xf32>
    %97 = arith.mulf %96, %95 : vector<16x32xf32>
    %98 = arith.subf %49, %88 : vector<16x32xf32>
    %99 = arith.subf %53, %88 : vector<16x32xf32>
    %100 = arith.subf %57, %88 : vector<16x32xf32>
    %101 = arith.addf %50, %52 : vector<16x32xf32>
    %cst_64 = arith.constant 5.000000e-01 : f32
    %102 = vector.broadcast %cst_64 : f32 to vector<16x32xf32>
    %103 = arith.mulf %102, %101 : vector<16x32xf32>
    %104 = arith.addf %51, %55 : vector<16x32xf32>
    %cst_65 = arith.constant 5.000000e-01 : f32
    %105 = vector.broadcast %cst_65 : f32 to vector<16x32xf32>
    %106 = arith.mulf %105, %104 : vector<16x32xf32>
    %107 = arith.addf %54, %56 : vector<16x32xf32>
    %cst_66 = arith.constant 5.000000e-01 : f32
    %108 = vector.broadcast %cst_66 : f32 to vector<16x32xf32>
    %109 = arith.mulf %108, %107 : vector<16x32xf32>
    %110 = tpu.concatenate %88, %91, %94, %97, %98, %99, %100, %103, %106, %109 in 0 : vector<16x32xf32>, vector<16x32xf32>, vector<16x32xf32>, vector<16x32xf32>, vector<16x32xf32>, vector<16x32xf32>, vector<16x32xf32>, vector<16x32xf32>, vector<16x32xf32>, vector<16x32xf32> -> vector<160x32xf32>
    %cst_67 = arith.constant dense<0.000000e+00> : vector<160x96xf32>
    %111 = tpu.matmul %110, %0, %cst_67 {dimension_numbers = #tpu.dot_dimension_numbers<[1], [0], [0], [1], [0, 0, 1, 1], [], []>} : vector<160x32xf32>, vector<32x96xf32>, vector<160x96xf32> -> vector<160x96xf32>
    %112 = vector.extract_strided_slice %111 {offsets = [0, 0], sizes = [16, 32], strides = [1, 1]} : vector<160x96xf32> to vector<16x32xf32>
    %113 = vector.extract_strided_slice %111 {offsets = [16, 32], sizes = [16, 32], strides = [1, 1]} : vector<160x96xf32> to vector<16x32xf32>
    %114 = vector.extract_strided_slice %111 {offsets = [32, 32], sizes = [16, 32], strides = [1, 1]} : vector<160x96xf32> to vector<16x32xf32>
    %115 = vector.extract_strided_slice %111 {offsets = [48, 32], sizes = [16, 32], strides = [1, 1]} : vector<160x96xf32> to vector<16x32xf32>
    %116 = vector.extract_strided_slice %111 {offsets = [64, 64], sizes = [16, 32], strides = [1, 1]} : vector<160x96xf32> to vector<16x32xf32>
    %117 = vector.extract_strided_slice %111 {offsets = [80, 64], sizes = [16, 32], strides = [1, 1]} : vector<160x96xf32> to vector<16x32xf32>
    %118 = vector.extract_strided_slice %111 {offsets = [96, 64], sizes = [16, 32], strides = [1, 1]} : vector<160x96xf32> to vector<16x32xf32>
    %119 = vector.extract_strided_slice %111 {offsets = [112, 64], sizes = [16, 32], strides = [1, 1]} : vector<160x96xf32> to vector<16x32xf32>
    %120 = vector.extract_strided_slice %111 {offsets = [128, 64], sizes = [16, 32], strides = [1, 1]} : vector<160x96xf32> to vector<16x32xf32>
    %121 = vector.extract_strided_slice %111 {offsets = [144, 64], sizes = [16, 32], strides = [1, 1]} : vector<160x96xf32> to vector<16x32xf32>
    %122 = tpu.concatenate %112, %113, %114, %115, %116, %117, %118, %119, %120, %121 in 1 : vector<16x32xf32>, vector<16x32xf32>, vector<16x32xf32>, vector<16x32xf32>, vector<16x32xf32>, vector<16x32xf32>, vector<16x32xf32>, vector<16x32xf32>, vector<16x32xf32>, vector<16x32xf32> -> vector<16x320xf32>
    %c0_68 = arith.constant 0 : index
    %c0_69 = arith.constant 0 : index
    %c0_70 = arith.constant 0 : index
    %123 = vector.load %arg2[%c0_68, %c0_69, %c0_70] : memref<1x32x34xf32, #tpu.memory_space<vmem>>, vector<1x32x32xf32>
    %124 = vector.shape_cast %123 : vector<1x32x32xf32> to vector<32x32xf32>
    %c0_71 = arith.constant 0 : index
    %c0_72 = arith.constant 0 : index
    %c32_73 = arith.constant 32 : index
    %125 = vector.load %arg2[%c0_71, %c0_72, %c32_73] : memref<1x32x34xf32, #tpu.memory_space<vmem>>, vector<1x32x1xf32>
    %126 = vector.shape_cast %125 : vector<1x32x1xf32> to vector<32x1xf32>
    %c0_74 = arith.constant 0 : index
    %c0_75 = arith.constant 0 : index
    %c33 = arith.constant 33 : index
    %127 = vector.load %arg2[%c0_74, %c0_75, %c33] : memref<1x32x34xf32, #tpu.memory_space<vmem>>, vector<1x32x1xf32>
    %128 = vector.shape_cast %127 : vector<1x32x1xf32> to vector<32x1xf32>
    %129 = arith.fptosi %128 : vector<32x1xf32> to vector<32x1xi32>
    %130 = vector.broadcast %126 : vector<32x1xf32> to vector<32x32xf32>
    %131 = arith.mulf %130, %124 : vector<32x32xf32>
    %132 = vector.broadcast %4 : vector<1x32xf32> to vector<32x32xf32>
    %133 = arith.addf %131, %132 : vector<32x32xf32>
    %cst_76 = arith.constant 5.000000e-01 : f32
    %134 = vector.broadcast %cst_76 : f32 to vector<32x32xf32>
    %135 = arith.mulf %134, %133 : vector<32x32xf32>
    %136 = math.tanh %135 : vector<32x32xf32>
    %cst_77 = arith.constant 5.000000e-01 : f32
    %137 = vector.broadcast %cst_77 : f32 to vector<32x32xf32>
    %138 = arith.mulf %137, %136 : vector<32x32xf32>
    %cst_78 = arith.constant 5.000000e-01 : f32
    %139 = vector.broadcast %cst_78 : f32 to vector<32x32xf32>
    %140 = arith.addf %138, %139 : vector<32x32xf32>
    %141 = arith.mulf %133, %140 : vector<32x32xf32>
    %cst_79 = arith.constant dense<0.000000e+00> : vector<32x32xf32>
    %142 = tpu.matmul %141, %2, %cst_79 {dimension_numbers = #tpu.dot_dimension_numbers<[1], [0], [0], [1], [0, 0, 1, 1], [], []>} : vector<32x32xf32>, vector<32x32xf32>, vector<32x32xf32> -> vector<32x32xf32>
    %143 = vector.broadcast %5 : vector<1x32xf32> to vector<32x32xf32>
    %144 = arith.addf %142, %143 : vector<32x32xf32>
    %cst_80 = arith.constant 5.000000e-01 : f32
    %145 = vector.broadcast %cst_80 : f32 to vector<32x32xf32>
    %146 = arith.mulf %145, %144 : vector<32x32xf32>
    %147 = math.tanh %146 : vector<32x32xf32>
    %cst_81 = arith.constant 5.000000e-01 : f32
    %148 = vector.broadcast %cst_81 : f32 to vector<32x32xf32>
    %149 = arith.mulf %148, %147 : vector<32x32xf32>
    %cst_82 = arith.constant 5.000000e-01 : f32
    %150 = vector.broadcast %cst_82 : f32 to vector<32x32xf32>
    %151 = arith.addf %149, %150 : vector<32x32xf32>
    %152 = arith.mulf %144, %151 : vector<32x32xf32>
    %cst_83 = arith.constant dense<0.000000e+00> : vector<32x320xf32>
    %153 = tpu.matmul %152, %3, %cst_83 {dimension_numbers = #tpu.dot_dimension_numbers<[1], [0], [0], [1], [0, 0, 1, 1], [], []>} : vector<32x32xf32>, vector<32x320xf32>, vector<32x320xf32> -> vector<32x320xf32>
    %154 = vector.broadcast %6 : vector<1x320xf32> to vector<32x320xf32>
    %155 = arith.addf %153, %154 : vector<32x320xf32>
    %cst_84 = arith.constant 5.000000e-01 : f32
    %156 = vector.broadcast %cst_84 : f32 to vector<32x320xf32>
    %157 = arith.mulf %156, %155 : vector<32x320xf32>
    %158 = math.tanh %157 : vector<32x320xf32>
    %cst_85 = arith.constant 5.000000e-01 : f32
    %159 = vector.broadcast %cst_85 : f32 to vector<32x320xf32>
    %160 = arith.mulf %159, %158 : vector<32x320xf32>
    %cst_86 = arith.constant 5.000000e-01 : f32
    %161 = vector.broadcast %cst_86 : f32 to vector<32x320xf32>
    %162 = arith.addf %160, %161 : vector<32x320xf32>
    %163 = arith.mulf %155, %162 : vector<32x320xf32>
    %164 = vector.broadcast %126 : vector<32x1xf32> to vector<32x320xf32>
    %165 = arith.mulf %164, %163 : vector<32x320xf32>
    %c0_87 = arith.constant 0 : index
    %c0_88 = arith.constant 0 : index
    %c0_89 = arith.constant 0 : index
    %166 = vector.load %arg3[%c0_87, %c0_88, %c0_89] : memref<1x1x32xf32, #tpu.memory_space<vmem>>, vector<1x1x32xf32>
    %167 = vector.shape_cast %166 : vector<1x1x32xf32> to vector<1x32xf32>
    %168 = arith.fptosi %167 : vector<1x32xf32> to vector<1x32xi32>
    %169 = tpu.iota {dimensions = array<i32: 1>} : vector<32x16xi32>
    %170 = vector.broadcast %129 : vector<32x1xi32> to vector<32x16xi32>
    %171 = arith.cmpi eq, %169, %170 : vector<32x16xi32>
    %172 = arith.extui %171 : vector<32x16xi1> to vector<32x16xi32>
    %173 = arith.sitofp %172 : vector<32x16xi32> to vector<32x16xf32>
    %174 = tpu.iota {dimensions = array<i32: 0>} : vector<16x32xi32>
    %175 = vector.broadcast %168 : vector<1x32xi32> to vector<16x32xi32>
    %176 = arith.cmpi eq, %174, %175 : vector<16x32xi32>
    %177 = arith.extui %176 : vector<16x32xi1> to vector<16x32xi32>
    %178 = arith.sitofp %177 : vector<16x32xi32> to vector<16x32xf32>
    %cst_90 = arith.constant dense<0.000000e+00> : vector<32x320xf32>
    %179 = tpu.matmul %173, %122, %cst_90 {dimension_numbers = #tpu.dot_dimension_numbers<[1], [0], [0], [1], [0, 0, 1, 1], [], []>} : vector<32x16xf32>, vector<16x320xf32>, vector<32x320xf32> -> vector<32x320xf32>
    %180 = arith.mulf %179, %165 : vector<32x320xf32>
    %cst_91 = arith.constant dense<0.000000e+00> : vector<16x320xf32>
    %181 = tpu.matmul %178, %180, %cst_91 {dimension_numbers = #tpu.dot_dimension_numbers<[1], [0], [0], [1], [0, 0, 1, 1], [], []>} : vector<16x32xf32>, vector<32x320xf32>, vector<16x320xf32> -> vector<16x320xf32>
    %182 = vector.extract_strided_slice %122 {offsets = [0, 0], sizes = [16, 32], strides = [1, 1]} : vector<16x320xf32> to vector<16x32xf32>
    %183 = vector.extract_strided_slice %122 {offsets = [0, 32], sizes = [16, 32], strides = [1, 1]} : vector<16x320xf32> to vector<16x32xf32>
    %184 = vector.extract_strided_slice %122 {offsets = [0, 64], sizes = [16, 32], strides = [1, 1]} : vector<16x320xf32> to vector<16x32xf32>
    %185 = vector.extract_strided_slice %122 {offsets = [0, 96], sizes = [16, 32], strides = [1, 1]} : vector<16x320xf32> to vector<16x32xf32>
    %186 = vector.extract_strided_slice %122 {offsets = [0, 128], sizes = [16, 32], strides = [1, 1]} : vector<16x320xf32> to vector<16x32xf32>
    %187 = vector.extract_strided_slice %122 {offsets = [0, 160], sizes = [16, 32], strides = [1, 1]} : vector<16x320xf32> to vector<16x32xf32>
    %188 = vector.extract_strided_slice %122 {offsets = [0, 192], sizes = [16, 32], strides = [1, 1]} : vector<16x320xf32> to vector<16x32xf32>
    %189 = vector.extract_strided_slice %122 {offsets = [0, 224], sizes = [16, 32], strides = [1, 1]} : vector<16x320xf32> to vector<16x32xf32>
    %190 = vector.extract_strided_slice %122 {offsets = [0, 256], sizes = [16, 32], strides = [1, 1]} : vector<16x320xf32> to vector<16x32xf32>
    %191 = vector.extract_strided_slice %122 {offsets = [0, 288], sizes = [16, 32], strides = [1, 1]} : vector<16x320xf32> to vector<16x32xf32>
    %192 = arith.addf %182, %186 : vector<16x32xf32>
    %193 = arith.addf %182, %187 : vector<16x32xf32>
    %194 = arith.addf %182, %188 : vector<16x32xf32>
    %195 = arith.addf %183, %189 : vector<16x32xf32>
    %196 = arith.subf %189, %183 : vector<16x32xf32>
    %197 = arith.addf %184, %190 : vector<16x32xf32>
    %198 = arith.subf %190, %184 : vector<16x32xf32>
    %199 = arith.addf %185, %191 : vector<16x32xf32>
    %200 = arith.subf %191, %185 : vector<16x32xf32>
    %201 = vector.extract_strided_slice %181 {offsets = [0, 0], sizes = [16, 32], strides = [1, 1]} : vector<16x320xf32> to vector<16x32xf32>
    %202 = vector.extract_strided_slice %181 {offsets = [0, 32], sizes = [16, 32], strides = [1, 1]} : vector<16x320xf32> to vector<16x32xf32>
    %203 = vector.extract_strided_slice %181 {offsets = [0, 64], sizes = [16, 32], strides = [1, 1]} : vector<16x320xf32> to vector<16x32xf32>
    %204 = vector.extract_strided_slice %181 {offsets = [0, 96], sizes = [16, 32], strides = [1, 1]} : vector<16x320xf32> to vector<16x32xf32>
    %205 = vector.extract_strided_slice %181 {offsets = [0, 128], sizes = [16, 32], strides = [1, 1]} : vector<16x320xf32> to vector<16x32xf32>
    %206 = vector.extract_strided_slice %181 {offsets = [0, 160], sizes = [16, 32], strides = [1, 1]} : vector<16x320xf32> to vector<16x32xf32>
    %207 = vector.extract_strided_slice %181 {offsets = [0, 192], sizes = [16, 32], strides = [1, 1]} : vector<16x320xf32> to vector<16x32xf32>
    %208 = vector.extract_strided_slice %181 {offsets = [0, 224], sizes = [16, 32], strides = [1, 1]} : vector<16x320xf32> to vector<16x32xf32>
    %209 = vector.extract_strided_slice %181 {offsets = [0, 256], sizes = [16, 32], strides = [1, 1]} : vector<16x320xf32> to vector<16x32xf32>
    %210 = vector.extract_strided_slice %181 {offsets = [0, 288], sizes = [16, 32], strides = [1, 1]} : vector<16x320xf32> to vector<16x32xf32>
    %211 = arith.addf %201, %205 : vector<16x32xf32>
    %212 = arith.addf %201, %206 : vector<16x32xf32>
    %213 = arith.addf %201, %207 : vector<16x32xf32>
    %214 = arith.addf %202, %208 : vector<16x32xf32>
    %215 = arith.subf %208, %202 : vector<16x32xf32>
    %216 = arith.addf %203, %209 : vector<16x32xf32>
    %217 = arith.subf %209, %203 : vector<16x32xf32>
    %218 = arith.addf %204, %210 : vector<16x32xf32>
    %219 = arith.subf %210, %204 : vector<16x32xf32>
    %220 = arith.mulf %211, %192 : vector<16x32xf32>
    %221 = arith.mulf %192, %211 : vector<16x32xf32>
    %222 = arith.addf %220, %221 : vector<16x32xf32>
    %223 = arith.mulf %214, %196 : vector<16x32xf32>
    %224 = arith.mulf %195, %215 : vector<16x32xf32>
    %225 = arith.addf %223, %224 : vector<16x32xf32>
    %226 = arith.addf %222, %225 : vector<16x32xf32>
    %227 = arith.mulf %216, %198 : vector<16x32xf32>
    %228 = arith.mulf %197, %217 : vector<16x32xf32>
    %229 = arith.addf %227, %228 : vector<16x32xf32>
    %230 = arith.addf %226, %229 : vector<16x32xf32>
    %231 = arith.mulf %211, %195 : vector<16x32xf32>
    %232 = arith.mulf %192, %214 : vector<16x32xf32>
    %233 = arith.addf %231, %232 : vector<16x32xf32>
    %234 = arith.mulf %214, %193 : vector<16x32xf32>
    %235 = arith.mulf %195, %212 : vector<16x32xf32>
    %236 = arith.addf %234, %235 : vector<16x32xf32>
    %237 = arith.addf %233, %236 : vector<16x32xf32>
    %238 = arith.mulf %216, %200 : vector<16x32xf32>
    %239 = arith.mulf %197, %219 : vector<16x32xf32>
    %240 = arith.addf %238, %239 : vector<16x32xf32>
    %241 = arith.addf %237, %240 : vector<16x32xf32>
    %242 = arith.mulf %211, %197 : vector<16x32xf32>
    %243 = arith.mulf %192, %216 : vector<16x32xf32>
    %244 = arith.addf %242, %243 : vector<16x32xf32>
    %245 = arith.mulf %214, %199 : vector<16x32xf32>
    %246 = arith.mulf %195, %218 : vector<16x32xf32>
    %247 = arith.addf %245, %246 : vector<16x32xf32>
    %248 = arith.addf %244, %247 : vector<16x32xf32>
    %249 = arith.mulf %216, %194 : vector<16x32xf32>
    %250 = arith.mulf %197, %213 : vector<16x32xf32>
    %251 = arith.addf %249, %250 : vector<16x32xf32>
    %252 = arith.addf %248, %251 : vector<16x32xf32>
    %253 = arith.mulf %215, %192 : vector<16x32xf32>
    %254 = arith.mulf %196, %211 : vector<16x32xf32>
    %255 = arith.addf %253, %254 : vector<16x32xf32>
    %256 = arith.mulf %212, %196 : vector<16x32xf32>
    %257 = arith.mulf %193, %215 : vector<16x32xf32>
    %258 = arith.addf %256, %257 : vector<16x32xf32>
    %259 = arith.addf %255, %258 : vector<16x32xf32>
    %260 = arith.mulf %218, %198 : vector<16x32xf32>
    %261 = arith.mulf %199, %217 : vector<16x32xf32>
    %262 = arith.addf %260, %261 : vector<16x32xf32>
    %263 = arith.addf %259, %262 : vector<16x32xf32>
    %264 = arith.mulf %215, %195 : vector<16x32xf32>
    %265 = arith.mulf %196, %214 : vector<16x32xf32>
    %266 = arith.addf %264, %265 : vector<16x32xf32>
    %267 = arith.mulf %212, %193 : vector<16x32xf32>
    %268 = arith.mulf %193, %212 : vector<16x32xf32>
    %269 = arith.addf %267, %268 : vector<16x32xf32>
    %270 = arith.addf %266, %269 : vector<16x32xf32>
    %271 = arith.mulf %218, %200 : vector<16x32xf32>
    %272 = arith.mulf %199, %219 : vector<16x32xf32>
    %273 = arith.addf %271, %272 : vector<16x32xf32>
    %274 = arith.addf %270, %273 : vector<16x32xf32>
    %275 = arith.mulf %215, %197 : vector<16x32xf32>
    %276 = arith.mulf %196, %216 : vector<16x32xf32>
    %277 = arith.addf %275, %276 : vector<16x32xf32>
    %278 = arith.mulf %212, %199 : vector<16x32xf32>
    %279 = arith.mulf %193, %218 : vector<16x32xf32>
    %280 = arith.addf %278, %279 : vector<16x32xf32>
    %281 = arith.addf %277, %280 : vector<16x32xf32>
    %282 = arith.mulf %218, %194 : vector<16x32xf32>
    %283 = arith.mulf %199, %213 : vector<16x32xf32>
    %284 = arith.addf %282, %283 : vector<16x32xf32>
    %285 = arith.addf %281, %284 : vector<16x32xf32>
    %286 = arith.mulf %217, %192 : vector<16x32xf32>
    %287 = arith.mulf %198, %211 : vector<16x32xf32>
    %288 = arith.addf %286, %287 : vector<16x32xf32>
    %289 = arith.mulf %219, %196 : vector<16x32xf32>
    %290 = arith.mulf %200, %215 : vector<16x32xf32>
    %291 = arith.addf %289, %290 : vector<16x32xf32>
    %292 = arith.addf %288, %291 : vector<16x32xf32>
    %293 = arith.mulf %213, %198 : vector<16x32xf32>
    %294 = arith.mulf %194, %217 : vector<16x32xf32>
    %295 = arith.addf %293, %294 : vector<16x32xf32>
    %296 = arith.addf %292, %295 : vector<16x32xf32>
    %297 = arith.mulf %217, %195 : vector<16x32xf32>
    %298 = arith.mulf %198, %214 : vector<16x32xf32>
    %299 = arith.addf %297, %298 : vector<16x32xf32>
    %300 = arith.mulf %219, %193 : vector<16x32xf32>
    %301 = arith.mulf %200, %212 : vector<16x32xf32>
    %302 = arith.addf %300, %301 : vector<16x32xf32>
    %303 = arith.addf %299, %302 : vector<16x32xf32>
    %304 = arith.mulf %213, %200 : vector<16x32xf32>
    %305 = arith.mulf %194, %219 : vector<16x32xf32>
    %306 = arith.addf %304, %305 : vector<16x32xf32>
    %307 = arith.addf %303, %306 : vector<16x32xf32>
    %308 = arith.mulf %217, %197 : vector<16x32xf32>
    %309 = arith.mulf %198, %216 : vector<16x32xf32>
    %310 = arith.addf %308, %309 : vector<16x32xf32>
    %311 = arith.mulf %219, %199 : vector<16x32xf32>
    %312 = arith.mulf %200, %218 : vector<16x32xf32>
    %313 = arith.addf %311, %312 : vector<16x32xf32>
    %314 = arith.addf %310, %313 : vector<16x32xf32>
    %315 = arith.mulf %213, %194 : vector<16x32xf32>
    %316 = arith.mulf %194, %213 : vector<16x32xf32>
    %317 = arith.addf %315, %316 : vector<16x32xf32>
    %318 = arith.addf %314, %317 : vector<16x32xf32>
    %319 = arith.mulf %230, %230 : vector<16x32xf32>
    %320 = arith.mulf %241, %241 : vector<16x32xf32>
    %321 = arith.addf %319, %320 : vector<16x32xf32>
    %322 = arith.mulf %252, %252 : vector<16x32xf32>
    %323 = arith.addf %321, %322 : vector<16x32xf32>
    %324 = arith.mulf %263, %263 : vector<16x32xf32>
    %325 = arith.addf %323, %324 : vector<16x32xf32>
    %326 = arith.mulf %274, %274 : vector<16x32xf32>
    %327 = arith.addf %325, %326 : vector<16x32xf32>
    %328 = arith.mulf %285, %285 : vector<16x32xf32>
    %329 = arith.addf %327, %328 : vector<16x32xf32>
    %330 = arith.mulf %296, %296 : vector<16x32xf32>
    %331 = arith.addf %329, %330 : vector<16x32xf32>
    %332 = arith.mulf %307, %307 : vector<16x32xf32>
    %333 = arith.addf %331, %332 : vector<16x32xf32>
    %334 = arith.mulf %318, %318 : vector<16x32xf32>
    %335 = arith.addf %333, %334 : vector<16x32xf32>
    %cst_92 = arith.constant 1.000000e+00 : f32
    %336 = vector.broadcast %cst_92 : f32 to vector<16x32xf32>
    %337 = arith.addf %335, %336 : vector<16x32xf32>
    %338 = tpu.reciprocal %337 {approx = true} : vector<16x32xf32> -> vector<16x32xf32>
    %339 = arith.mulf %337, %338 : vector<16x32xf32>
    %cst_93 = arith.constant 2.000000e+00 : f32
    %340 = vector.broadcast %cst_93 : f32 to vector<16x32xf32>
    %341 = arith.subf %340, %339 : vector<16x32xf32>
    %342 = arith.mulf %338, %341 : vector<16x32xf32>
    %343 = arith.addf %230, %274 : vector<16x32xf32>
    %344 = arith.addf %343, %318 : vector<16x32xf32>
    %cst_94 = arith.constant 0.333333343 : f32
    %345 = vector.broadcast %cst_94 : f32 to vector<16x32xf32>
    %346 = arith.mulf %344, %345 : vector<16x32xf32>
    %347 = arith.mulf %346, %342 : vector<16x32xf32>
    %348 = arith.subf %241, %263 : vector<16x32xf32>
    %cst_95 = arith.constant 5.000000e-01 : f32
    %349 = vector.broadcast %cst_95 : f32 to vector<16x32xf32>
    %350 = arith.mulf %349, %348 : vector<16x32xf32>
    %351 = arith.mulf %350, %342 : vector<16x32xf32>
    %352 = arith.subf %252, %296 : vector<16x32xf32>
    %cst_96 = arith.constant 5.000000e-01 : f32
    %353 = vector.broadcast %cst_96 : f32 to vector<16x32xf32>
    %354 = arith.mulf %353, %352 : vector<16x32xf32>
    %355 = arith.mulf %354, %342 : vector<16x32xf32>
    %356 = arith.subf %285, %307 : vector<16x32xf32>
    %cst_97 = arith.constant 5.000000e-01 : f32
    %357 = vector.broadcast %cst_97 : f32 to vector<16x32xf32>
    %358 = arith.mulf %357, %356 : vector<16x32xf32>
    %359 = arith.mulf %358, %342 : vector<16x32xf32>
    %360 = arith.subf %230, %346 : vector<16x32xf32>
    %361 = arith.mulf %360, %342 : vector<16x32xf32>
    %362 = arith.subf %274, %346 : vector<16x32xf32>
    %363 = arith.mulf %362, %342 : vector<16x32xf32>
    %364 = arith.subf %318, %346 : vector<16x32xf32>
    %365 = arith.mulf %364, %342 : vector<16x32xf32>
    %366 = arith.addf %241, %263 : vector<16x32xf32>
    %cst_98 = arith.constant 5.000000e-01 : f32
    %367 = vector.broadcast %cst_98 : f32 to vector<16x32xf32>
    %368 = arith.mulf %367, %366 : vector<16x32xf32>
    %369 = arith.mulf %368, %342 : vector<16x32xf32>
    %370 = arith.addf %252, %296 : vector<16x32xf32>
    %cst_99 = arith.constant 5.000000e-01 : f32
    %371 = vector.broadcast %cst_99 : f32 to vector<16x32xf32>
    %372 = arith.mulf %371, %370 : vector<16x32xf32>
    %373 = arith.mulf %372, %342 : vector<16x32xf32>
    %374 = arith.addf %285, %307 : vector<16x32xf32>
    %cst_100 = arith.constant 5.000000e-01 : f32
    %375 = vector.broadcast %cst_100 : f32 to vector<16x32xf32>
    %376 = arith.mulf %375, %374 : vector<16x32xf32>
    %377 = arith.mulf %376, %342 : vector<16x32xf32>
    %378 = tpu.concatenate %347, %351, %355, %359, %361, %363, %365, %369, %373, %377 in 0 : vector<16x32xf32>, vector<16x32xf32>, vector<16x32xf32>, vector<16x32xf32>, vector<16x32xf32>, vector<16x32xf32>, vector<16x32xf32>, vector<16x32xf32>, vector<16x32xf32>, vector<16x32xf32> -> vector<160x32xf32>
    %cst_101 = arith.constant dense<0.000000e+00> : vector<160x96xf32>
    %379 = tpu.matmul %378, %1, %cst_101 {dimension_numbers = #tpu.dot_dimension_numbers<[1], [0], [0], [1], [0, 0, 1, 1], [], []>} : vector<160x32xf32>, vector<32x96xf32>, vector<160x96xf32> -> vector<160x96xf32>
    %380 = vector.extract_strided_slice %379 {offsets = [0, 0], sizes = [16, 32], strides = [1, 1]} : vector<160x96xf32> to vector<16x32xf32>
    %381 = vector.extract_strided_slice %379 {offsets = [16, 32], sizes = [16, 32], strides = [1, 1]} : vector<160x96xf32> to vector<16x32xf32>
    %382 = vector.extract_strided_slice %379 {offsets = [32, 32], sizes = [16, 32], strides = [1, 1]} : vector<160x96xf32> to vector<16x32xf32>
    %383 = vector.extract_strided_slice %379 {offsets = [48, 32], sizes = [16, 32], strides = [1, 1]} : vector<160x96xf32> to vector<16x32xf32>
    %384 = vector.extract_strided_slice %379 {offsets = [64, 64], sizes = [16, 32], strides = [1, 1]} : vector<160x96xf32> to vector<16x32xf32>
    %385 = vector.extract_strided_slice %379 {offsets = [80, 64], sizes = [16, 32], strides = [1, 1]} : vector<160x96xf32> to vector<16x32xf32>
    %386 = vector.extract_strided_slice %379 {offsets = [96, 64], sizes = [16, 32], strides = [1, 1]} : vector<160x96xf32> to vector<16x32xf32>
    %387 = vector.extract_strided_slice %379 {offsets = [112, 64], sizes = [16, 32], strides = [1, 1]} : vector<160x96xf32> to vector<16x32xf32>
    %388 = vector.extract_strided_slice %379 {offsets = [128, 64], sizes = [16, 32], strides = [1, 1]} : vector<160x96xf32> to vector<16x32xf32>
    %389 = vector.extract_strided_slice %379 {offsets = [144, 64], sizes = [16, 32], strides = [1, 1]} : vector<160x96xf32> to vector<16x32xf32>
    %390 = arith.addf %380, %384 : vector<16x32xf32>
    %391 = arith.addf %380, %385 : vector<16x32xf32>
    %392 = arith.addf %380, %386 : vector<16x32xf32>
    %393 = arith.addf %381, %387 : vector<16x32xf32>
    %394 = arith.subf %387, %381 : vector<16x32xf32>
    %395 = arith.addf %382, %388 : vector<16x32xf32>
    %396 = arith.subf %388, %382 : vector<16x32xf32>
    %397 = arith.addf %383, %389 : vector<16x32xf32>
    %398 = arith.subf %389, %383 : vector<16x32xf32>
    %399 = arith.mulf %390, %390 : vector<16x32xf32>
    %400 = arith.mulf %393, %394 : vector<16x32xf32>
    %401 = arith.addf %399, %400 : vector<16x32xf32>
    %402 = arith.mulf %395, %396 : vector<16x32xf32>
    %403 = arith.addf %401, %402 : vector<16x32xf32>
    %c0_102 = arith.constant 0 : index
    %c0_103 = arith.constant 0 : index
    %c0_104 = arith.constant 0 : index
    %404 = vector.load %arg5[%c0_102, %c0_103, %c0_104] : memref<1x16x288xf32, #tpu.memory_space<vmem>>, vector<1x16x32xf32>
    %405 = vector.shape_cast %404 : vector<1x16x32xf32> to vector<16x32xf32>
    %406 = arith.addf %405, %390 : vector<16x32xf32>
    %407 = arith.addf %406, %403 : vector<16x32xf32>
    %c0_105 = arith.constant 0 : index
    %c0_106 = arith.constant 0 : index
    %c0_107 = arith.constant 0 : index
    %408 = vector.load %arg5[%c0_105, %c0_106, %c0_107] : memref<1x16x288xf32, #tpu.memory_space<vmem>>, vector<1x16x32xf32>
    %409 = vector.shape_cast %408 : vector<1x16x32xf32> to vector<16x32xf32>
    %410 = vector.shape_cast %407 : vector<16x32xf32> to vector<1x16x32xf32>
    tpu.vector_store %arg5[%c0_105, %c0_106, %c0_107], %410 {strides = array<i32>} : memref<1x16x288xf32, #tpu.memory_space<vmem>>, vector<1x16x32xf32>,
    %411 = arith.mulf %390, %393 : vector<16x32xf32>
    %412 = arith.mulf %393, %391 : vector<16x32xf32>
    %413 = arith.addf %411, %412 : vector<16x32xf32>
    %414 = arith.mulf %395, %398 : vector<16x32xf32>
    %415 = arith.addf %413, %414 : vector<16x32xf32>
    %c0_108 = arith.constant 0 : index
    %c0_109 = arith.constant 0 : index
    %c32_110 = arith.constant 32 : index
    %416 = vector.load %arg5[%c0_108, %c0_109, %c32_110] : memref<1x16x288xf32, #tpu.memory_space<vmem>>, vector<1x16x32xf32>
    %417 = vector.shape_cast %416 : vector<1x16x32xf32> to vector<16x32xf32>
    %418 = arith.addf %417, %393 : vector<16x32xf32>
    %419 = arith.addf %418, %415 : vector<16x32xf32>
    %c0_111 = arith.constant 0 : index
    %c0_112 = arith.constant 0 : index
    %c32_113 = arith.constant 32 : index
    %420 = vector.load %arg5[%c0_111, %c0_112, %c32_113] : memref<1x16x288xf32, #tpu.memory_space<vmem>>, vector<1x16x32xf32>
    %421 = vector.shape_cast %420 : vector<1x16x32xf32> to vector<16x32xf32>
    %422 = vector.shape_cast %419 : vector<16x32xf32> to vector<1x16x32xf32>
    tpu.vector_store %arg5[%c0_111, %c0_112, %c32_113], %422 {strides = array<i32>} : memref<1x16x288xf32, #tpu.memory_space<vmem>>, vector<1x16x32xf32>,
    %423 = arith.mulf %390, %395 : vector<16x32xf32>
    %424 = arith.mulf %393, %397 : vector<16x32xf32>
    %425 = arith.addf %423, %424 : vector<16x32xf32>
    %426 = arith.mulf %395, %392 : vector<16x32xf32>
    %427 = arith.addf %425, %426 : vector<16x32xf32>
    %c0_114 = arith.constant 0 : index
    %c0_115 = arith.constant 0 : index
    %c64_116 = arith.constant 64 : index
    %428 = vector.load %arg5[%c0_114, %c0_115, %c64_116] : memref<1x16x288xf32, #tpu.memory_space<vmem>>, vector<1x16x32xf32>
    %429 = vector.shape_cast %428 : vector<1x16x32xf32> to vector<16x32xf32>
    %430 = arith.addf %429, %395 : vector<16x32xf32>
    %431 = arith.addf %430, %427 : vector<16x32xf32>
    %c0_117 = arith.constant 0 : index
    %c0_118 = arith.constant 0 : index
    %c64_119 = arith.constant 64 : index
    %432 = vector.load %arg5[%c0_117, %c0_118, %c64_119] : memref<1x16x288xf32, #tpu.memory_space<vmem>>, vector<1x16x32xf32>
    %433 = vector.shape_cast %432 : vector<1x16x32xf32> to vector<16x32xf32>
    %434 = vector.shape_cast %431 : vector<16x32xf32> to vector<1x16x32xf32>
    tpu.vector_store %arg5[%c0_117, %c0_118, %c64_119], %434 {strides = array<i32>} : memref<1x16x288xf32, #tpu.memory_space<vmem>>, vector<1x16x32xf32>,
    %435 = arith.mulf %394, %390 : vector<16x32xf32>
    %436 = arith.mulf %391, %394 : vector<16x32xf32>
    %437 = arith.addf %435, %436 : vector<16x32xf32>
    %438 = arith.mulf %397, %396 : vector<16x32xf32>
    %439 = arith.addf %437, %438 : vector<16x32xf32>
    %c0_120 = arith.constant 0 : index
    %c0_121 = arith.constant 0 : index
    %c96_122 = arith.constant 96 : index
    %440 = vector.load %arg5[%c0_120, %c0_121, %c96_122] : memref<1x16x288xf32, #tpu.memory_space<vmem>>, vector<1x16x32xf32>
    %441 = vector.shape_cast %440 : vector<1x16x32xf32> to vector<16x32xf32>
    %442 = arith.addf %441, %394 : vector<16x32xf32>
    %443 = arith.addf %442, %439 : vector<16x32xf32>
    %c0_123 = arith.constant 0 : index
    %c0_124 = arith.constant 0 : index
    %c96_125 = arith.constant 96 : index
    %444 = vector.load %arg5[%c0_123, %c0_124, %c96_125] : memref<1x16x288xf32, #tpu.memory_space<vmem>>, vector<1x16x32xf32>
    %445 = vector.shape_cast %444 : vector<1x16x32xf32> to vector<16x32xf32>
    %446 = vector.shape_cast %443 : vector<16x32xf32> to vector<1x16x32xf32>
    tpu.vector_store %arg5[%c0_123, %c0_124, %c96_125], %446 {strides = array<i32>} : memref<1x16x288xf32, #tpu.memory_space<vmem>>, vector<1x16x32xf32>,
    %447 = arith.mulf %394, %393 : vector<16x32xf32>
    %448 = arith.mulf %391, %391 : vector<16x32xf32>
    %449 = arith.addf %447, %448 : vector<16x32xf32>
    %450 = arith.mulf %397, %398 : vector<16x32xf32>
    %451 = arith.addf %449, %450 : vector<16x32xf32>
    %c0_126 = arith.constant 0 : index
    %c0_127 = arith.constant 0 : index
    %c128_128 = arith.constant 128 : index
    %452 = vector.load %arg5[%c0_126, %c0_127, %c128_128] : memref<1x16x288xf32, #tpu.memory_space<vmem>>, vector<1x16x32xf32>
    %453 = vector.shape_cast %452 : vector<1x16x32xf32> to vector<16x32xf32>
    %454 = arith.addf %453, %391 : vector<16x32xf32>
    %455 = arith.addf %454, %451 : vector<16x32xf32>
    %c0_129 = arith.constant 0 : index
    %c0_130 = arith.constant 0 : index
    %c128_131 = arith.constant 128 : index
    %456 = vector.load %arg5[%c0_129, %c0_130, %c128_131] : memref<1x16x288xf32, #tpu.memory_space<vmem>>, vector<1x16x32xf32>
    %457 = vector.shape_cast %456 : vector<1x16x32xf32> to vector<16x32xf32>
    %458 = vector.shape_cast %455 : vector<16x32xf32> to vector<1x16x32xf32>
    tpu.vector_store %arg5[%c0_129, %c0_130, %c128_131], %458 {strides = array<i32>} : memref<1x16x288xf32, #tpu.memory_space<vmem>>, vector<1x16x32xf32>,
    %459 = arith.mulf %394, %395 : vector<16x32xf32>
    %460 = arith.mulf %391, %397 : vector<16x32xf32>
    %461 = arith.addf %459, %460 : vector<16x32xf32>
    %462 = arith.mulf %397, %392 : vector<16x32xf32>
    %463 = arith.addf %461, %462 : vector<16x32xf32>
    %c0_132 = arith.constant 0 : index
    %c0_133 = arith.constant 0 : index
    %c160_134 = arith.constant 160 : index
    %464 = vector.load %arg5[%c0_132, %c0_133, %c160_134] : memref<1x16x288xf32, #tpu.memory_space<vmem>>, vector<1x16x32xf32>
    %465 = vector.shape_cast %464 : vector<1x16x32xf32> to vector<16x32xf32>
    %466 = arith.addf %465, %397 : vector<16x32xf32>
    %467 = arith.addf %466, %463 : vector<16x32xf32>
    %c0_135 = arith.constant 0 : index
    %c0_136 = arith.constant 0 : index
    %c160_137 = arith.constant 160 : index
    %468 = vector.load %arg5[%c0_135, %c0_136, %c160_137] : memref<1x16x288xf32, #tpu.memory_space<vmem>>, vector<1x16x32xf32>
    %469 = vector.shape_cast %468 : vector<1x16x32xf32> to vector<16x32xf32>
    %470 = vector.shape_cast %467 : vector<16x32xf32> to vector<1x16x32xf32>
    tpu.vector_store %arg5[%c0_135, %c0_136, %c160_137], %470 {strides = array<i32>} : memref<1x16x288xf32, #tpu.memory_space<vmem>>, vector<1x16x32xf32>,
    %471 = arith.mulf %396, %390 : vector<16x32xf32>
    %472 = arith.mulf %398, %394 : vector<16x32xf32>
    %473 = arith.addf %471, %472 : vector<16x32xf32>
    %474 = arith.mulf %392, %396 : vector<16x32xf32>
    %475 = arith.addf %473, %474 : vector<16x32xf32>
    %c0_138 = arith.constant 0 : index
    %c0_139 = arith.constant 0 : index
    %c192_140 = arith.constant 192 : index
    %476 = vector.load %arg5[%c0_138, %c0_139, %c192_140] : memref<1x16x288xf32, #tpu.memory_space<vmem>>, vector<1x16x32xf32>
    %477 = vector.shape_cast %476 : vector<1x16x32xf32> to vector<16x32xf32>
    %478 = arith.addf %477, %396 : vector<16x32xf32>
    %479 = arith.addf %478, %475 : vector<16x32xf32>
    %c0_141 = arith.constant 0 : index
    %c0_142 = arith.constant 0 : index
    %c192_143 = arith.constant 192 : index
    %480 = vector.load %arg5[%c0_141, %c0_142, %c192_143] : memref<1x16x288xf32, #tpu.memory_space<vmem>>, vector<1x16x32xf32>
    %481 = vector.shape_cast %480 : vector<1x16x32xf32> to vector<16x32xf32>
    %482 = vector.shape_cast %479 : vector<16x32xf32> to vector<1x16x32xf32>
    tpu.vector_store %arg5[%c0_141, %c0_142, %c192_143], %482 {strides = array<i32>} : memref<1x16x288xf32, #tpu.memory_space<vmem>>, vector<1x16x32xf32>,
    %483 = arith.mulf %396, %393 : vector<16x32xf32>
    %484 = arith.mulf %398, %391 : vector<16x32xf32>
    %485 = arith.addf %483, %484 : vector<16x32xf32>
    %486 = arith.mulf %392, %398 : vector<16x32xf32>
    %487 = arith.addf %485, %486 : vector<16x32xf32>
    %c0_144 = arith.constant 0 : index
    %c0_145 = arith.constant 0 : index
    %c224_146 = arith.constant 224 : index
    %488 = vector.load %arg5[%c0_144, %c0_145, %c224_146] : memref<1x16x288xf32, #tpu.memory_space<vmem>>, vector<1x16x32xf32>
    %489 = vector.shape_cast %488 : vector<1x16x32xf32> to vector<16x32xf32>
    %490 = arith.addf %489, %398 : vector<16x32xf32>
    %491 = arith.addf %490, %487 : vector<16x32xf32>
    %c0_147 = arith.constant 0 : index
    %c0_148 = arith.constant 0 : index
    %c224_149 = arith.constant 224 : index
    %492 = vector.load %arg5[%c0_147, %c0_148, %c224_149] : memref<1x16x288xf32, #tpu.memory_space<vmem>>, vector<1x16x32xf32>
    %493 = vector.shape_cast %492 : vector<1x16x32xf32> to vector<16x32xf32>
    %494 = vector.shape_cast %491 : vector<16x32xf32> to vector<1x16x32xf32>
    tpu.vector_store %arg5[%c0_147, %c0_148, %c224_149], %494 {strides = array<i32>} : memref<1x16x288xf32, #tpu.memory_space<vmem>>, vector<1x16x32xf32>,
    %495 = arith.mulf %396, %395 : vector<16x32xf32>
    %496 = arith.mulf %398, %397 : vector<16x32xf32>
    %497 = arith.addf %495, %496 : vector<16x32xf32>
    %498 = arith.mulf %392, %392 : vector<16x32xf32>
    %499 = arith.addf %497, %498 : vector<16x32xf32>
    %c0_150 = arith.constant 0 : index
    %c0_151 = arith.constant 0 : index
    %c256_152 = arith.constant 256 : index
    %500 = vector.load %arg5[%c0_150, %c0_151, %c256_152] : memref<1x16x288xf32, #tpu.memory_space<vmem>>, vector<1x16x32xf32>
    %501 = vector.shape_cast %500 : vector<1x16x32xf32> to vector<16x32xf32>
    %502 = arith.addf %501, %392 : vector<16x32xf32>
    %503 = arith.addf %502, %499 : vector<16x32xf32>
    %c0_153 = arith.constant 0 : index
    %c0_154 = arith.constant 0 : index
    %c256_155 = arith.constant 256 : index
    %504 = vector.load %arg5[%c0_153, %c0_154, %c256_155] : memref<1x16x288xf32, #tpu.memory_space<vmem>>, vector<1x16x32xf32>
    %505 = vector.shape_cast %504 : vector<1x16x32xf32> to vector<16x32xf32>
    %506 = vector.shape_cast %503 : vector<16x32xf32> to vector<1x16x32xf32>
    tpu.vector_store %arg5[%c0_153, %c0_154, %c256_155], %506 {strides = array<i32>} : memref<1x16x288xf32, #tpu.memory_space<vmem>>, vector<1x16x32xf32>,
    return
  }
  func.func @transform_0(%arg0: i32) -> (i32, i32, i32, i32) {
    %c0_i32 = arith.constant 0 : i32
    %c0_i32_0 = arith.constant 0 : i32
    %c0_i32_1 = arith.constant 0 : i32
    %c0_i32_2 = arith.constant 0 : i32
    return %arg0, %c0_i32, %c0_i32_0, %c0_i32_1 : i32, i32, i32, i32
  }
  func.func @transform_1(%arg0: i32) -> (i32, i32, i32) {
    %c0_i32 = arith.constant 0 : i32
    %c0_i32_0 = arith.constant 0 : i32
    %c0_i32_1 = arith.constant 0 : i32
    return %arg0, %c0_i32, %c0_i32_0 : i32, i32, i32
  }
  func.func @transform_2(%arg0: i32) -> (i32, i32, i32) {
    %c0_i32 = arith.constant 0 : i32
    %c0_i32_0 = arith.constant 0 : i32
    %c0_i32_1 = arith.constant 0 : i32
    return %arg0, %c0_i32, %c0_i32_0 : i32, i32, i32
  }
  func.func @transform_3(%arg0: i32) -> (i32, i32) {
    %c0_i32 = arith.constant 0 : i32
    %c0_i32_0 = arith.constant 0 : i32
    %c0_i32_1 = arith.constant 0 : i32
    return %c0_i32, %c0_i32_0 : i32, i32
  }
  func.func @transform_4(%arg0: i32) -> (i32, i32, i32) {
    %c0_i32 = arith.constant 0 : i32
    %c0_i32_0 = arith.constant 0 : i32
    %c0_i32_1 = arith.constant 0 : i32
    return %arg0, %c0_i32, %c0_i32_0 : i32, i32, i32
  }
}

</mosaic_0001>

<bundles_post_ra>
// kernel: tpu_custom_call.1
= control target key start
LH: loop header
LB: loop body
LE: loop exit
PB: predicated region body
PF: predicated region fallthrough
CT: control target
= control target key end

     0   :  { %s5712_s0 = inlined_call_operand.hbm [shape: f32[2,9,16,32], index: 0, kind: input, shape index: {}]   ;;  %s5713_s1 = inlined_call_operand.hbm [shape: f32[2,32,34], index: 1, kind: input, shape index: {}]   ;;  %s5714_s2 = inlined_call_operand.vmem [shape: f32[2,1,32], index: 2, kind: input, shape index: {}]   ;;  %s5715_s3 = inlined_call_operand.hbm [shape: f32[33,768], index: 3, kind: input, shape index: {}]   ;;  %s5716_s4 = inlined_call_operand.hbm [shape: f32[2,16,288], index: 4, kind: output, shape index: {}]  }
   0x1   :  { %5730 = sst [smem:[#allocation21_spill]] %s5712_s0 }
   0x2   :  { %5731 = sst [smem:[#allocation22_spill]] %s5715_s3 }
   0x3   :  { %9 = vsyncpa [#allocation3], 0 }
   0x4   :  { %11 = vsyncpa [#allocation3 + $0x1], 0 }
   0x5   :  { %12 = vsyncpa [#allocation6], 0 }
   0x6   :  { %14 = vsyncpa [#allocation6 + $0x1], 0 }
   0x7   :  { %15 = vsyncpa [#allocation4], 0 }
   0x8   :  { %17 = vsyncpa [#allocation4 + $0x1], 0  ;;  %s3975_s15 = smov 0   ;;  %s3977_s16 = smov 0  }
   0x9   :  { %s3979_s17 = smov 0   ;;  %s3981_s18 = smov 0  }
   0xa LB: > { %s3996_s19 = sadd.s32 4294967295, %s3932_s18   ;;  %s3259_s20 = sadd.s32 4294967294, %s3932_s18   ;;  %s3932_s18 = sphi %s3981_s18, %s5767_s18   ;;  %s3928_s17 = sphi %s3979_s17, %s5766_s17   ;;  %s3924_s16 = sphi %s3977_s16, %s5765_s16   ;;  %s3920_s15 = sphi %s3975_s15, %s5764_s15  }
   0xb   : > { %p43_p0 = scmp.ne.s32.totalorder %s3924_s16, %s3920_s15  ;;  %p5717_p1 = scmp.eq.s32.totalorder %s3996_s19, 0 }
   0xc   : > { %p146_p3 = scmp.eq.s32.totalorder %s3259_s20, 1  ;;  %p3260_p5 = scmp.ge.s32.totalorder %s3932_s18, 1 }
   0xd   : > { %p4005_p4 = por %p5717_p1, %p43_p0  ;;  %p153_p7 = scmp.lt.s32.totalorder %s3932_s18, 3 }
   0xe   : > { %p4010_p6 = por %p146_p3, %p43_p0  ;;  %s3934_s24 = smov [#allocation7]  }
   0xf   : > { %s5732_s21 = scalar_select %p4005_p4, 1, 0 }
  0x10   : > { %s5733_s22 = scalar_select %p4010_p6, 1, 0 }
  0x11   : > { %p4015_p8 = pnand %p3260_p5, %p153_p7  ;;  %s165_s25 = sshll.u32 %s3934_s24, 4  ;;  %s4019_s25 = int_to_ptr.vmem [resolvable:$true] %s165_s25 }
  0x12   : > { %s4031_s27 = sadd.s32 1, %s3932_s18   ;;  %s30_s28 = sadd.s32 1, %s3928_s17 }
  0x13   : > { %s5734_s23 = scalar_select %p4015_p8, 1, 0 }
  0x14   : > { %p3654_p9 = pneg %p4015_p8  ;;  %s27_s29 = ssub.s32 %s3932_s18, %s4031_s27 }
  0x15   : > { %s5736_s3 = sld [smem:[#allocation22_spill]] }
  0x16   : > { %p4026_p11 = pnand %p3654_p9, %p5717_p1 }
  0x18   : > { %p3772_p13 = pneg %p4026_p11 }
  0x1b   : > { %s3770_s6 = scalar_lea.hbm %s5736_s3, 3840 }
  0x1c   : > { %p3771_p12 = scmp.ne.s32.totalorder %s5736_s3, %s3770_s6  ;;  %p3777_p5 = scmp.lt.u32.totalorder %s3770_s6, %s5736_s3 }
  0x1e   : > { %p3773_p0 = pnand %p3772_p13, %p3771_p12 }
  0x20   : > { %p3774_p3 = pneg %p3773_p0 }
  0x22   : > { %p3779_p7 = pnand %p3777_p5, %p3774_p3 }
  0x24   : > { %3782 = shalt.err (!%p3779_p7)
}
  0x25   : > { %s3783_s11 = scalar_lea.vmem %s4019_s25, 3840  ;;  %p3791_p2 = scmp.lt.s32.totalorder %s4019_s25, %s4019_s25 }
  0x26   : > { %p3784_p9 = scmp.ne.s32.totalorder %s4019_s25, %s3783_s11  ;;  %p3792_p6 = scmp.lt.s32.totalorder %s3783_s11, %s3783_s11 }
  0x28   : > { %p3786_p10 = pnand %p3784_p9, %p3772_p13  ;;  %p3793_p4 = por %p3792_p6, %p3791_p2 }
  0x2a   : > { %p3787_p1 = pneg %p3786_p10 }
  0x2c   : > { %p3794_p8 = pnand %p3793_p4, %p3787_p1 }
  0x2e   : > { %3797 = shalt.err (!%p3794_p8)
}
  0x2f   : > { %s3935_s12 = smov 768   ;;  %s3936_s13 = smov 48  }
  0x30   : > { %3657 = dma.hbm_to_vmem [thread:$0]  (!%p4026_p11), %s5736_s3, 3840, %s4019_s25, [#allocation6], %s3935_s12, %s3935_s12, %s3936_s13  }
  0x31   : > { %p28_p2 = scmp.eq.s32.totalorder %s27_s29, 0  ;;  %p37_p1 = scmp.ne.s32.totalorder %s3928_s17, %s3924_s16 }
  0x32   : > { %p38_p4 = scmp.eq.s32.totalorder %s3932_s18, 0  ;;  %p3670_p6 = scmp.lt.s32.totalorder %s3932_s18, 2 }
  0x33   : > { %s4062_s24 = scalar_select %p28_p2, %s3928_s17, %s30_s28  }
  0x34   : > { %p39_p8 = por %p38_p4, %p37_p1  ;;  %p5737_p10 = scmp.eq.s32.totalorder %s3996_s19, 1 }
  0x35   : > { %s4071_s5 = sand.u32 1, %s3928_s17   ;;  %s3630_s26 = smul.u32 2304, %s3932_s18 }
  0x36   : > { %p4066_p12 = por %p5737_p10, %p37_p1  ;;  %s3629_s6 = smul.u32 144, %s4071_s5 }
  0x37   : > { %s5739_s0 = sld [smem:[#allocation21_spill]]  ;;  %p4080_p11 = pnand %p3670_p6, %p39_p8 }
  0x38   : > { %s183_s8 = scalar_lea.vmem [#allocation2], %s3629_s6  ;;  %s180_s10 = scalar_lea.sflag [#allocation3], %s4071_s5 }
  0x39   : > { %s190_s9 = sshll.u32 %s183_s8, 4  ;;  %p3800_p0 = pneg %p4080_p11  ;;  %s4084_s9 = int_to_ptr.vmem [resolvable:$true] %s190_s9 }
  0x3d   : > { %s4078_s29 = scalar_lea.hbm %s5739_s0, %s3630_s26  ;;  %s3803_s14 = scalar_lea.hbm %s5739_s0, 4608 }
  0x3e   : > { %s3798_s11 = scalar_lea.hbm %s4078_s29, 2304  ;;  %p3804_p7 = scmp.lt.u32.totalorder %s4078_s29, %s5739_s0 }
  0x3f   : > { %p3799_p13 = scmp.ne.s32.totalorder %s4078_s29, %s3798_s11  ;;  %p3805_p9 = scmp.lt.u32.totalorder %s3803_s14, %s3798_s11 }
  0x40   : > { %p3807_p1 = scmp.lt.u32.totalorder %s3798_s11, %s4078_s29 }
  0x41   : > { %p3801_p3 = pnand %p3800_p0, %p3799_p13  ;;  %p3806_p2 = por %p3805_p9, %p3804_p7 }
  0x43   : > { %p3802_p5 = pneg %p3801_p3  ;;  %p3808_p4 = por %p3807_p1, %p3806_p2 }
  0x45   : > { %p3809_p6 = pnand %p3808_p4, %p3802_p5 }
  0x47   : > { %3812 = shalt.err (!%p3809_p6)
}
  0x48   : > { %s3813_s6 = scalar_lea.vmem %s4084_s9, 2304  ;;  %s3937_s7 = smov [#allocation2]  }
  0x49   : > { %p3814_p8 = scmp.ne.s32.totalorder %s4084_s9, %s3813_s6  ;;  %s3818_s25 = sshll.u32 %s3937_s7, 4  ;;  %s3819_s25 = int_to_ptr.vmem [resolvable:$false] %s3818_s25 }
  0x4a   : > { %s3820_s8 = scalar_lea.vmem %s3819_s25, 4608  ;;  %p3821_p3 = scmp.lt.s32.totalorder %s4084_s9, %s3819_s25 }
  0x4b   : > { %p3816_p10 = pnand %p3814_p8, %p3800_p0  ;;  %p3822_p7 = scmp.lt.s32.totalorder %s3820_s8, %s3813_s6 }
  0x4d   : > { %p3817_p13 = pneg %p3816_p10  ;;  %p3823_p9 = por %p3822_p7, %p3821_p3 }
  0x4f   : > { %p3824_p2 = pnand %p3823_p9, %p3817_p13 }
  0x51   : > { %3827 = shalt.err (!%p3824_p2)
}
  0x52   : > { %s3938_s11 = smov 128   ;;  %s3939_s12 = smov 8  }
  0x53   : > { %3661 = dma.hbm_to_vmem [thread:$0]  (!%p4080_p11), %s4078_s29, 2304, %s4084_s9, %s180_s10, %s3938_s11, %s3938_s11, %s3939_s12  }
  0x54   : > { %s200_s13 = sand.u32 1, %s3932_s18   ;;  %s3264_s14 = sshll.u32 %s4071_s5, 5 }
  0x55   : > { %s3359_s20 = sshll.u32 %s3932_s18, 9  ;;  %s204_s26 = scalar_lea.vmem [#allocation5], %s3264_s14 }
  0x56   : > { %s211_s6 = sshll.u32 %s204_s26, 4  ;;  %s4123_s8 = scalar_lea.hbm %s5713_s1, %s3359_s20  ;;  %s4125_s6 = int_to_ptr.vmem [resolvable:$true] %s211_s6 }
  0x57   : > { %s4127_s0 = scalar_lea.sflag [#allocation6], %s200_s13  ;;  %s3828_s3 = scalar_lea.hbm %s4123_s8, 512 }
  0x58   : > { %p3829_p5 = scmp.ne.s32.totalorder %s4123_s8, %s3828_s3  ;;  %s3833_s9 = scalar_lea.hbm %s5713_s1, 1024 }
  0x59   : > { %p3834_p6 = scmp.lt.u32.totalorder %s4123_s8, %s5713_s1  ;;  %p3835_p8 = scmp.lt.u32.totalorder %s3833_s9, %s3828_s3 }
  0x5a   : > { %p3831_p1 = pnand %p3829_p5, %p3800_p0  ;;  %p3837_p13 = scmp.lt.u32.totalorder %s3828_s3, %s4123_s8 }
  0x5b   : > { %p3836_p10 = por %p3835_p8, %p3834_p6 }
  0x5c   : > { %p3832_p4 = pneg %p3831_p1 }
  0x5d   : > { %p3838_p3 = por %p3837_p13, %p3836_p10 }
  0x5f   : > { %p3839_p7 = pnand %p3838_p3, %p3832_p4 }
  0x61   : > { %3842 = shalt.err (!%p3839_p7)
}
  0x62   : > { %s3843_s13 = scalar_lea.vmem %s4125_s6, 512  ;;  %s3940_s20 = smov [#allocation5]  }
  0x63   : > { %p3844_p9 = scmp.ne.s32.totalorder %s4125_s6, %s3843_s13  ;;  %s3848_s26 = sshll.u32 %s3940_s20, 4  ;;  %s3849_s26 = int_to_ptr.vmem [resolvable:$false] %s3848_s26 }
  0x64   : > { %s3850_s7 = scalar_lea.vmem %s3849_s26, 1024  ;;  %p3851_p1 = scmp.lt.s32.totalorder %s4125_s6, %s3849_s26 }
  0x65   : > { %p3846_p2 = pnand %p3844_p9, %p3800_p0  ;;  %p3852_p6 = scmp.lt.s32.totalorder %s3850_s7, %s3843_s13 }
  0x67   : > { %p3847_p5 = pneg %p3846_p2  ;;  %p3853_p8 = por %p3852_p6, %p3851_p1 }
  0x69   : > { %p3854_p10 = pnand %p3853_p8, %p3847_p5 }
  0x6b   : > { %3857 = shalt.err (!%p3854_p10)
}
  0x6c   : > { %3664 = dma.hbm_to_vmem [thread:$0]  (!%p4080_p11), %s4123_s8, 512, %s4125_s6, %s4127_s0, %s3938_s11, %s3938_s11, %s3939_s12  }
  0x6d   : > { %p5741_p0 = scmp.ne.s32.totalorder %s5734_s23, 0 }
  0x6f   : > { %229 = sbr.rel (%p5741_p0) target bundleno = 2556 (0x9fc), region = 36 }
  0x76   : > { %s4159_s3 = sand.u32 1, %s3924_s16   ;;  %p5742_p4 = scmp.ne.s32.totalorder %s5732_s21, 0 }
  0x77   : > { %s3631_s25 = smul.u32 144, %s4159_s3  ;;  %s232_s5 = scalar_lea.sflag [#allocation3], %s4159_s3 }
  0x79   : > { %s4163_s29 = scalar_lea.vmem [#allocation2], %s3631_s25 }
  0x7a   : > { %3903 = dma.done.wait (%p5742_p4), %s232_s5, 2304  }
  0x7b   : > { %3905 = vsyncadd (%p5742_p4), %s232_s5, 4294964992  ;;  %s240_s0 = sand.u32 1, %s3996_s19   ;;  %s3268_s23 = sshll.u32 %s4159_s3, 5 }
  0x7c   : > { %s241_s28 = scalar_lea.sflag [#allocation6], %s240_s0  ;;  %s244_s11 = scalar_lea.vmem [#allocation5], %s3268_s23 }
  0x7d   : > { %3907 = dma.done.wait (%p5742_p4), %s241_s28, 512  }
  0x7e   : > { %3909 = vsyncadd (%p5742_p4), %s241_s28, 4294966784  ;;  %p5743_p11 = scmp.eq.s32.totalorder %s3996_s19, 0 }
  0x80   : > { %3911 = dma.done.wait (%p5743_p11), [#allocation6], 3840   ;;  %p5744_p13 = pmov %p5743_p11 }
  0x81   : > { %v3941_v0 = vmov 32   ;;  %v4179_v1 = vld [vmem:[%s244_s11 + $0x10] sm:$0xff]  ;;  %v4181_v2 = vld [vmem:[%s244_s11] sm:$0xff]  ;;  %v4183_v3 = vld [vmem:[%s244_s11 + $0x18] sm:$0xff]  ;;  %s3632_s21 = smul.u32 48, %s4159_s3  ;;  %vm400_vm0 = vcmask 261120  }
  0x82   : > { %3913 = vsyncadd (%p5744_p13), [#allocation6], 4294963456  ;;  %3719 = vset.pattern.permute.xlu1 %v3941_v0  ;;  %3718 = vset.pattern.permute.xlu0 %v3941_v0  ;;  %v4187_v4 = vld [vmem:[%s244_s11 + $0x8] sm:$0xff]  ;;  %v284_v5 = vld [vmem:[#allocation7] sm:$0xff]  ;;  %s3944_s6 = smov 96   ;;  %vm1291_vm1 = vcmask 130048  }
  0x83   : > { %823 = vperm.xlu1 %3719, %v4179_v1   ;;  %813 = vperm.xlu0 %3718, %v4181_v2   ;;  %v285_v6 = vld [vmem:[#allocation7 + $0x30] sm:$0xff]  ;;  %v286_v8 = vld [vmem:[#allocation7 + $0x60] sm:$0xff]  ;;  %v4213_v19 = vld [vmem:[%s4163_s29 + $0x8] sm:$0xff]  ;;  %s4288_s12 = scalar_lea.vmem [#allocation8], %s3632_s21  ;;  %s3945_s8 = smov 32   ;;  %vm789_vm3 = vcmask 523264  }
  0x84   : > { %v3561_v7 = vpack.c.bf16 %v285_v6, %v284_v5  ;;  %v287_v9 = vld [vmem:[#allocation7 + $0x90] sm:$0xff]  ;;  %v4218_v22 = vld [vmem:[%s4163_s29 + $0x18] sm:$0xff]  ;;  %v4221_v23 = vld [vmem:[%s4163_s29 + $0x28] sm:$0xff]  ;;  %v339_v26 = vmul.f32 %v4213_v19, %v4213_v19  ;;  %s3946_s9 = smov 64   ;;  %vm792_vm4 = vcmask 785408   ;;  %p281_p3 = scmp.lt.s32.totalorder %s3996_s19, 1 }
  0x85   : > { %v4190_v10 = vld [vmem:[%s4163_s29] sm:$0xff]  ;;  %v3565_v11 = vpack.c.bf16 %v287_v9, %v286_v8  ;;  %v4193_v12 = vld [vmem:[%s4163_s29 + $0x10] sm:$0xff]  ;;  %v4224_v24 = vld [vmem:[%s4163_s29 + $0x38] sm:$0xff]  ;;  %v341_v27 = vmul.f32 %v4218_v22, %v4218_v22  ;;  %v345_v28 = vmul.f32 %v4221_v23, %v4221_v23  ;;  %v3633_v8 = vtrunc.f32 %v4181_v2  ;;  %s3643_s26 = smul.u32 768, %s3996_s19  ;;  %s3145_s7 = sshll.u32 %s4288_s12, 4  ;;  %s5660_s7 = int_to_ptr.vmem [resolvable:$true] %s3145_s7 }
  0x86   : > { %v4196_v13 = vld [vmem:[%s4163_s29 + $0x20] sm:$0xff]  ;;  %v4199_v14 = vld [vmem:[%s4163_s29 + $0x30] sm:$0xff]  ;;  %v338_v15 = vmul.f32 %v4190_v10, %v4190_v10  ;;  %3562 = vmatprep.subr.bf16.mxu0 %v3561_v7  ;;  %3625 = vmatprep.subr.bf16.mxu1 %v3561_v7  ;;  %v340_v16 = vmul.f32 %v4193_v12, %v4193_v12  ;;  %v4238_v31 = vld [vmem:[%s4163_s29 + $0x48] sm:$0xff]  ;;  %v349_v34 = vmul.f32 %v4224_v24, %v4224_v24  ;;  %s282_s10 = scalar_select %p281_p3, %s3996_s19, 1  ;;  %vm411_vm10 = vcmask 523520  }
  0x87   : > { %v344_v17 = vmul.f32 %v4196_v13, %v4196_v13  ;;  %828 = vperm.xlu1 %3719, %v4183_v3   ;;  %818 = vperm.xlu0 %3718, %v4187_v4   ;;  %v4210_v18 = vld [vmem:[%s4163_s29 + $0x40] sm:$0xff]  ;;  %v348_v21 = vmul.f32 %v4199_v14, %v4199_v14  ;;  %v4227_v25 = vld [vmem:[%s4163_s29 + $0x50] sm:$0xff]  ;;  %v343_v33 = vadd.f32 %v341_v27, %v339_v26  ;;  %v4248_v37 = vld [vmem:[%s4163_s29 + $0x58] sm:$0xff]  ;;  %v3634_v9 = vcvt.f32.s32 %v3633_v8  ;;  %s5658_s5 = scalar_lea.hbm %s5716_s4, %s3643_s26  ;;  %s3858_s0 = scalar_lea.vmem %s5660_s7, 768 }
  0x88   : > { %3564 = vmatpush3.bf16.msra.mxu0 %v3561_v7  ;;  %3627 = vmatpush3.bf16.msra.mxu1 %v3561_v7  ;;  %v342_v20 = vadd.f32 %v340_v16, %v338_v15  ;;  %v352_v30 = vmul.f32 %v4210_v18, %v4210_v18  ;;  %v4241_v32 = vld [vmem:[%s4163_s29 + $0x60] sm:$0xff]  ;;  %v356_v36 = vmul.f32 %v4227_v25, %v4227_v25  ;;  %v4251_v38 = vld [vmem:[%s4163_s29 + $0x70] sm:$0xff]  ;;  %v4258_v43 = vld [vmem:[%s4163_s29 + $0x68] sm:$0xff]  ;;  %s283_s20 = scalar_lea.vmem %s5714_s2, %s282_s10  ;;  %vm422_vm11 = vcmask 785920   ;;  %p3859_p7 = scmp.ne.s32.totalorder %s5660_s7, %s3858_s0 }
  0x89   : > { %3566 = vmatprep.subr.bf16.mxu0 %v3565_v11  ;;  %3626 = vmatprep.subr.bf16.mxu1 %v3565_v11  ;;  %v347_v39 = vadd.f32 %v345_v28, %v343_v33  ;;  %v353_v40 = vmul.f32 %v4238_v31, %v4238_v31  ;;  %v360_v42 = vmul.f32 %v4241_v32, %v4241_v32  ;;  %v3284_v44 = vld [vmem:[%s4163_s29 + $0x80] sm:$0xff]  ;;  %v4266_v49 = vld [vmem:[%s4163_s29 + $0x78] sm:$0xff]  ;;  %v3285_v54 = vld [vmem:[%s4163_s29 + $0x88] sm:$0xff]  ;;  %vm433_vm12 = vcmask 1048320   ;;  %s3132_s29 = scalar_lea.sflag [#allocation4], %s4159_s3  ;;  %s3947_s23 = smov [#allocation8]  }
  0x8a   : > { %v346_v29 = vadd.f32 %v344_v17, %v342_v20  ;;  %v357_v46 = vmul.f32 %v4248_v37, %v4248_v37  ;;  %v364_v48 = vmul.f32 %v4251_v38, %v4251_v38  ;;  %v361_v51 = vmul.f32 %v4258_v43, %v4258_v43  ;;  %v292_v63 = vld [vmem:[#allocation7 + $0x10] sm:$0xff]  ;;  %v293_v0 = vld [vmem:[#allocation7 + $0x40] sm:$0xff]  ;;  %p3860_p9 = pnand %p3859_p7, %p4066_p12  ;;  %s3862_s28 = sshll.u32 %s3947_s23, 4  ;;  %s3863_s28 = int_to_ptr.vmem [resolvable:$false] %s3862_s28 }
  0x8b   : > { %v351_v45 = vadd.f32 %v349_v34, %v347_v39  ;;  %v368_v53 = vmul.f32 %v3284_v44, %v3284_v44  ;;  %v365_v56 = vmul.f32 %v4266_v49, %v4266_v49  ;;  %v369_v59 = vmul.f32 %v3285_v54, %v3285_v54  ;;  %s3864_s11 = scalar_lea.vmem %s3863_s28, 1536  ;;  %p3865_p5 = scmp.lt.s32.totalorder %s5660_s7, %s3863_s28 }
  0x8c   : > { %3568 = vmatpush3.bf16.msra.mxu0 %v3565_v11  ;;  %3628 = vmatpush3.bf16.msra.mxu1 %v3565_v11  ;;  %v350_v35 = vadd.f32 %v348_v21, %v346_v29  ;;  %v4273_v6 = vpack.c.bf16 %v293_v0, %v292_v63  ;;  %v3942_v11 = vmov 33   ;;  %p3861_p2 = pneg %p3860_p9  ;;  %p3866_p1 = scmp.lt.s32.totalorder %s3864_s11, %s3858_s0 }
  0x8d   : > { %v355_v50 = vadd.f32 %v353_v40, %v351_v45  ;;  %3720 = vset.pattern.permute.xlu0 %v3942_v11  ;;  %3721 = vset.pattern.permute.xlu1 %v3942_v11 }
  0x8e   : > { %v354_v41 = vadd.f32 %v352_v30, %v350_v35  ;;  %3570 = vmatprep.subr.bf16.mxu1 %v4273_v6  ;;  %1255 = vperm.xlu0 %3720, %v3634_v9   ;;  %p3867_p6 = por %p3866_p1, %p3865_p5 }
  0x8f   : > { %v359_v55 = vadd.f32 %v357_v46, %v355_v50  ;;  %v294_v46 = vld [vmem:[#allocation7 + $0x70] sm:$0xff] }
  0x90   : > { %v358_v47 = vadd.f32 %v356_v36, %v354_v41  ;;  %p3868_p8 = pnand %p3867_p6, %p3861_p2 }
  0x91   : > { %v363_v58 = vadd.f32 %v361_v51, %v359_v55 }
  0x92   : > { %v362_v52 = vadd.f32 %v360_v42, %v358_v47  ;;  %v295_v47 = vld [vmem:[#allocation7 + $0xa0] sm:$0xff] }
  0x93   : > { %v367_v61 = vadd.f32 %v365_v56, %v363_v58 }
  0x94   : > { %v366_v57 = vadd.f32 %v364_v48, %v362_v52 }
  0x95   : > { %v371_v5 = vadd.f32 %v369_v59, %v367_v61 }
  0x96   : > { %v370_v60 = vadd.f32 %v368_v53, %v366_v57 }
  0x97   : > { %v373_v7 = vadd.f32 1.0, %v371_v5 }
  0x98   : > { %v372_v62 = vadd.f32 1.0, %v370_v60 }
  0x9a   : > { %3722 = vrcp.f32 %v372_v62 }
  0x9b   : > { %3724 = vrcp.f32 %v373_v7 }
  0xa4   : > { %v3723_v15 = vpop.eup %3722 }
  0xa5   : > { %v376_v16 = vmul.f32 %v3723_v15, %v372_v62  ;;  %v3725_v17 = vpop.eup %3724 }
  0xa6   : > { %v377_v21 = vmul.f32 %v3725_v17, %v373_v7 }
  0xa7   : > { %v378_v20 = vsub.f32 2.0, %v376_v16 }
  0xa8   : > { %v379_v27 = vsub.f32 2.0, %v377_v21 }
  0xa9   : > { %v380_v26 = vmul.f32 %v3723_v15, %v378_v20 }
  0xaa   : > { %v381_v34 = vmul.f32 %v3725_v17, %v379_v27 }
  0xab   : > { %v4279_v28 = vmul.f32 %v380_v26, %v4190_v10  ;;  %v390_v29 = vmul.f32 %v4210_v18, %v380_v26  ;;  %v398_v30 = vmul.f32 %v3284_v44, %v380_v26  ;;  %v4283_v33 = vmul.f32 %v4193_v12, %v380_v26 }
  0xac   : > { %v4286_v35 = vmul.f32 %v4199_v14, %v380_v26  ;;  %v4299_v12 = vmul.f32 %v4196_v13, %v380_v26  ;;  %v4302_v14 = vmul.f32 %v381_v34, %v4213_v19  ;;  %v391_v18 = vmul.f32 %v4238_v31, %v381_v34 }
  0xad   : > { %468 = vst.msk [vmem:[%s4288_s12 + $0x10] sm:$0xff] %vm400_vm0, %v398_v30  ;;  %v470_v10 = vadd.f32 %v390_v29, %v4279_v28  ;;  %401 = vst.msk [vmem:[%s4288_s12] sm:$0xff] %vm400_vm0, %v4279_v28  ;;  %v399_v36 = vmul.f32 %v3285_v54, %v381_v34  ;;  %v4306_v39 = vmul.f32 %v4241_v32, %v380_v26 }
  0xae   : > { %5745 = vst [vmem:[#allocation13_spill] sm:$0xff] %v4286_v35  ;;  %436 = vst.msk [vmem:[%s4288_s12 + $0x8] sm:$0xff] %vm400_vm0, %v390_v29  ;;  %v476_v41 = vsub.f32 %v4283_v33, %v4286_v35  ;;  %v4311_v42 = vmul.f32 %v4218_v22, %v381_v34  ;;  %v4314_v44 = vmul.f32 %v4224_v24, %v381_v34 }
  0xaf   : > { %5746 = vst [vmem:[#allocation14_spill] sm:$0xff] %v4299_v12  ;;  %5747 = vst [vmem:[#allocation15_spill] sm:$0xff] %v4306_v39  ;;  %v472_v40 = vadd.f32 %v470_v10, %v398_v30  ;;  %v471_v13 = vadd.f32 %v391_v18, %v4302_v14  ;;  %v4325_v31 = vmul.f32 %v4221_v23, %v381_v34 }
  0xb0   : > { %5748 = vst [vmem:[#allocation16_spill] sm:$0xff] %v4314_v44  ;;  %469 = vst.msk [vmem:[%s4288_s12 + $0x28] sm:$0xff] %vm400_vm0, %v399_v36  ;;  %v4328_v32 = vmul.f32 %v4258_v43, %v381_v34  ;;  %v477_v24 = vsub.f32 %v4311_v42, %v4314_v44  ;;  %v4333_v45 = vmul.f32 %v4227_v25, %v380_v26  ;;  %v478_v50 = vmul.f32 0.5, %v476_v41 }
  0xb1   : > { %402 = vst.msk [vmem:[%s4288_s12 + $0x18] sm:$0xff] %vm400_vm0, %v4302_v14  ;;  %437 = vst.msk [vmem:[%s4288_s12 + $0x20] sm:$0xff] %vm400_vm0, %v391_v18  ;;  %v474_v19 = vmul.f32 0.33333334, %v472_v40  ;;  %v473_v22 = vadd.f32 %v471_v13, %v399_v36  ;;  %v480_v23 = vsub.f32 %v4299_v12, %v4306_v39  ;;  %v4339_v51 = vmul.f32 %v4251_v38, %v380_v26 }
  0xb2   : > { %5749 = vst [vmem:[#allocation17_spill] sm:$0xff] %v4325_v31  ;;  %5750 = vst [vmem:[#allocation18_spill] sm:$0xff] %v4328_v32  ;;  %v481_v25 = vsub.f32 %v4325_v31, %v4328_v32  ;;  %v494_v53 = vadd.f32 %v4286_v35, %v4283_v33  ;;  %v3573_v54 = vpack.c.bf16 %v295_v47, %v294_v46  ;;  %v479_v56 = vmul.f32 0.5, %v477_v24 }
  0xb3   : > { %3444 = vmatprep.mubr.msk.f32.mxu0 %vm400_vm0, %v474_v19  ;;  %v490_v48 = vsub.f32 %v390_v29, %v474_v19  ;;  %5751 = vst [vmem:[#allocation19_spill] sm:$0xff] %v4339_v51  ;;  %v475_v43 = vmul.f32 0.33333334, %v473_v22  ;;  %v492_v52 = vsub.f32 %v398_v30, %v474_v19  ;;  %v4348_v57 = vmul.f32 %v4248_v37, %v381_v34 }
  0xb4   : > { %v4351_v38 = vmul.f32 %v4266_v49, %v381_v34  ;;  %v482_v58 = vmul.f32 0.5, %v480_v23  ;;  %v484_v59 = vsub.f32 %v4333_v45, %v4339_v51  ;;  %v495_v61 = vadd.f32 %v4314_v44, %v4311_v42 }
  0xb5   : > { %3459 = vmatprep.mubr.msk.f32.mxu1 %vm400_vm0, %v490_v48  ;;  %3445 = vmatmul.mubr.msk.f32.vlgmr.msra.gmra.mrb[0].mxu0 %vm400_vm0, %v475_v43  ;;  %v491_v55 = vsub.f32 %v391_v18, %v475_v43  ;;  %v493_v60 = vsub.f32 %v399_v36, %v475_v43  ;;  %v496_v62 = vmul.f32 0.5, %v494_v53  ;;  %v498_v37 = vadd.f32 %v4306_v39, %v4299_v12 }
  0xb6   : > { %5752 = vst [vmem:[#allocation20_spill] sm:$0xff] %v4351_v38  ;;  %3447 = vmatprep.mubr.msk.f32.mxu0 %vm400_vm0, %v478_v50  ;;  %v483_v49 = vmul.f32 0.5, %v481_v25  ;;  %v485_v63 = vsub.f32 %v4348_v57, %v4351_v38  ;;  %v486_v0 = vmul.f32 0.5, %v484_v59  ;;  %v497_v5 = vmul.f32 0.5, %v495_v61 }
  0xb7   : > { %3460 = vmatmul.mubr.msk.f32.vlgmr.msra.gmra.mrb[0].mxu1 %vm400_vm0, %v491_v55  ;;  %v499_v7 = vadd.f32 %v4328_v32, %v4325_v31  ;;  %v500_v8 = vmul.f32 0.5, %v498_v37  ;;  %v488_v11 = vsub.f32 %v4279_v28, %v474_v19  ;;  %v503_v16 = vadd.f32 %v4351_v38, %v4348_v57  ;;  %v308_v28 = vld [vmem:[#allocation7 + $0xc0] ss:$0 sm:$0xff]  ;;  %v300_v37 = vld [vmem:[#allocation7 + $0x50] sm:$0xff] }
  0xb8   : > { %3462 = vmatprep.mubr.msk.f32.mxu1 %vm400_vm0, %v492_v52  ;;  %3572 = vmatpush3.bf16.msra.mxu1 %v4273_v6  ;;  %v502_v6 = vadd.f32 %v4339_v51, %v4333_v45  ;;  %v487_v9 = vmul.f32 0.5, %v485_v63  ;;  %v489_v20 = vsub.f32 %v4302_v14, %v475_v43  ;;  %v296_v63 = vld [vmem:[#allocation7 + $0x18] sm:$0xff] }
  0xb9   : > { %3448 = vmatmul.mubr.msk.f32.gmra.mrb[2].mxu0 %vm400_vm0, %v479_v56  ;;  %3574 = vmatprep.subr.bf16.mxu1 %v3573_v54  ;;  %v501_v15 = vmul.f32 0.5, %v499_v7  ;;  %v505_v21 = vmul.f32 0.5, %v503_v16  ;;  %v303_v7 = vld [vmem:[#allocation7 + $0x80] sm:$0xff] }
  0xba   : > { %3450 = vmatprep.mubr.msk.f32.mxu0 %vm400_vm0, %v482_v58  ;;  %v504_v17 = vmul.f32 0.5, %v502_v6 }
  0xbb   : > { %3463 = vmatmul.mubr.msk.f32.gmra.mrb[2].mxu1 %vm400_vm0, %v493_v60 }
  0xbc   : > { %3465 = vmatprep.mubr.msk.f32.mxu1 %vm400_vm0, %v496_v62  ;;  %3576 = vmatpush3.bf16.msra.mxu1 %v3573_v54  ;;  %v297_v62 = vld [vmem:[#allocation7 + $0x20] sm:$0xff] }
  0xbd   : > { %3451 = vmatmul.mubr.msk.f32.gmra.mrb[4].mxu0 %vm400_vm0, %v483_v49  ;;  %v3577_v49 = vpack.c.bf16 %v300_v37, %v297_v62 }
  0xbe   : > { %3453 = vmatprep.mubr.msk.f32.mxu0 %vm400_vm0, %v486_v0  ;;  %v299_v0 = vld [vmem:[#allocation7 + $0x48] sm:$0xff] }
  0xbf   : > { %3466 = vmatmul.mubr.msk.f32.gmra.mrb[4].mxu1 %vm400_vm0, %v497_v5  ;;  %v3579_v5 = vpack.c.bf16 %v299_v0, %v296_v63  ;;  %3578 = vmatprep.subr.bf16.mxu1 %v3577_v49 }
  0xc0   : > { %3468 = vmatprep.mubr.msk.f32.mxu1 %vm400_vm0, %v500_v8  ;;  %v306_v8 = vld [vmem:[#allocation7 + $0xb0] sm:$0xff] }
  0xc1   : > { %3454 = vmatmul.mubr.msk.f32.gmra.mrb[6].mxu0 %vm400_vm0, %v487_v9  ;;  %v3581_v6 = vpack.c.bf16 %v306_v8, %v303_v7  ;;  %v302_v9 = vld [vmem:[#allocation7 + $0x78] sm:$0xff] }
  0xc2   : > { %3456 = vmatprep.mubr.msk.f32.mxu0 %vm400_vm0, %v488_v11  ;;  %v305_v11 = vld [vmem:[#allocation7 + $0xa8] sm:$0xff] }
  0xc3   : > { %3469 = vmatmul.mubr.msk.f32.gmra.mrb[6].mxu1 %vm400_vm0, %v501_v15  ;;  %v3583_v15 = vpack.c.bf16 %v305_v11, %v302_v9 }
  0xc4   : > { %3471 = vmatprep.mubr.msk.f32.mxu1 %vm400_vm0, %v504_v17  ;;  %v977_v17 = vlaneseq }
  0xc5   : > { %3457 = vmatmul.mubr.msk.f32.gmra.mrb[8].mxu0 %vm400_vm0, %v489_v20 }
  0xc7   : > { %3472 = vmatmul.mubr.msk.f32.gmra.mrb[8].mxu1 %vm400_vm0, %v505_v21  ;;  %v5720_v21 = vmov 0.0  }
 0x102   : > { %v4387_v26 = vpop.permute.xlu1 %823  ;;  %v4389_v27 = vpop.permute.xlu0 %813 }
 0x103   : > { %v833_v29 = vmul.f32 %v4387_v26, %v4179_v1  ;;  %v831_v30 = vmul.f32 %v4389_v27, %v4181_v2 }
 0x105   : > { %v835_v34 = vadd.f32 %v831_v30, %v308_v28  ;;  %v837_v10 = vadd.f32 %v833_v29, %v308_v28  ;;  %v4409_v29 = vand.u32 127, %v977_v17 }
 0x106   : > { %v4395_v14 = vpop.permute.xlu1 %828  ;;  %v4397_v18 = vpop.permute.xlu0 %818 }
 0x107   : > { %v834_v36 = vmul.f32 %v4395_v14, %v4183_v3  ;;  %v832_v40 = vmul.f32 %v4397_v18, %v4187_v4  ;;  %v839_v41 = vmul.f32 0.5, %v835_v34  ;;  %v841_v13 = vmul.f32 0.5, %v837_v10 }
 0x109   : > { %v836_v19 = vadd.f32 %v832_v40, %v308_v28  ;;  %3726 = vtanh.f32 %v839_v41  ;;  %v838_v22 = vadd.f32 %v834_v36, %v308_v28 }
 0x10a   : > { %3728 = vtanh.f32 %v841_v13 }
 0x10b   : > { %v840_v24 = vmul.f32 0.5, %v836_v19  ;;  %v842_v2 = vmul.f32 0.5, %v838_v22 }
 0x10d   : > { %3730 = vtanh.f32 %v840_v24 }
 0x10e   : > { %3732 = vtanh.f32 %v842_v2 }
 0x113   : > { %v3727_v46 = vpop.eup %3726 }
 0x114   : > { %v3729_v47 = vpop.eup %3728  ;;  %v847_v48 = vmul.f32 0.5, %v3727_v46  ;;  %v298_v46 = vld [vmem:[#allocation7 + $0x28] sm:$0xff] }
 0x115   : > { %v849_v50 = vmul.f32 0.5, %v3729_v47  ;;  %v301_v47 = vld [vmem:[#allocation7 + $0x58] sm:$0xff] }
 0x116   : > { %v851_v23 = vadd.f32 0.5, %v847_v48 }
 0x117   : > { %v3731_v43 = vpop.eup %3730  ;;  %v853_v54 = vadd.f32 0.5, %v849_v50  ;;  %v4430_v50 = vpack.c.bf16 %v301_v47, %v298_v46 }
 0x118   : > { %v3733_v52 = vpop.eup %3732  ;;  %v848_v25 = vmul.f32 0.5, %v3731_v43  ;;  %v855_v53 = vmul.f32 %v851_v23, %v835_v34  ;;  %v1256_v34 = vpop.permute.xlu0 %1255  ;;  %v3635_v43 = vtrunc.f32 %v4187_v4 }
 0x119   : > { %v850_v55 = vmul.f32 0.5, %v3733_v52  ;;  %v857_v60 = vmul.f32 %v853_v54, %v837_v10  ;;  %vm1266_vm2 = vcmp.eq.s32.totalorder %v4409_v29, %v1256_v34 }
 0x11a   : > { %v852_v56 = vadd.f32 0.5, %v848_v25  ;;  %3482 = vmatprep.mubr.msk.f32.mxu1 %vm400_vm0, %v855_v53  ;;  %v4418_v41 = vsel %vm1266_vm2, 1.0, %v5720_v21 }
 0x11b   : > { %v854_v59 = vadd.f32 0.5, %v850_v55  ;;  %3506 = vmatprep.mubr.msk.f32.mxu0 %vm1291_vm1, %v4418_v41 }
 0x11c   : > { %v856_v58 = vmul.f32 %v852_v56, %v836_v19  ;;  %v3636_v56 = vcvt.f32.s32 %v3635_v43 }
 0x11d   : > { %v858_v61 = vmul.f32 %v854_v59, %v838_v22 }
 0x11e   : > { %3483 = vmatmul.mubr.msk.f32.vlgmr.msra.gmra.mrb[10].mxu1 %vm400_vm0, %v856_v58 }
 0x11f   : > { %3485 = vmatprep.mubr.msk.f32.mxu1 %vm400_vm0, %v857_v60  ;;  %3580 = vmatpush1.bf16.msra.mxu1 %v3579_v5  ;;  %v3639_v60 = vtrunc.f32 %v4183_v3  ;;  %v309_v3 = vld [vmem:[#allocation7 + $0xc8] ss:$0 sm:$0xff] }
 0x120   : > { %3582 = vmatprep.subr.bf16.mxu1 %v3581_v6 }
 0x121   : > { %v3640_v62 = vcvt.f32.s32 %v3639_v60 }
 0x122   : > { %3486 = vmatmul.mubr.msk.f32.gmra.mrb[12].mxu1 %vm400_vm0, %v858_v61  ;;  %v3637_v61 = vtrunc.f32 %v4179_v1 }
 0x123   : > { %3584 = vmatpush1.bf16.msra.mxu1 %v3583_v15  ;;  %1068 = vmatprep.mubr.f32.mxu1 %v5720_v21 }
 0x124   : > { %3586 = vmatprep.subr.bf16.mxu1 %v4430_v50  ;;  %v3638_v37 = vcvt.f32.s32 %v3637_v61 }
 0x188   : > { %v3446_v16 = vpop.f32.mrb[0].mxu0 }
 0x189   : > { %v632_v20 = vpop.f32.mrb[1].mxu0 }
 0x18a   : > { %v3461_v28 = vpop.f32.mrb[0].mxu1 }
 0x18b   : > { %v682_v30 = vpop.f32.mrb[1].mxu1  ;;  %759 = vrot.lane.b32.xlu1 %v3461_v28, %s3944_s6 }
 0x18c   : > { %757 = vrot.lane.b32.xlu0 %v682_v30, %s3944_s6  ;;  %v3449_v10 = vpop.f32.mrb[2].mxu0 }
 0x18d   : > { %v4415_v36 = vsel %vm400_vm0, %v3446_v16, %v3449_v10  ;;  %v642_v40 = vpop.f32.mrb[3].mxu0 }
 0x18e   : > { %v4421_v13 = vsel %vm400_vm0, %v632_v20, %v642_v40  ;;  %v4423_v19 = vpop.f32.mrb[2].mxu1  ;;  %v304_v40 = vld [vmem:[#allocation7 + $0x88] sm:$0xff] }
 0x18f   : > { %v4427_v22 = vpop.f32.mrb[3].mxu1 }
 0x190   : > { %v3452_v24 = vpop.f32.mrb[4].mxu0 }
 0x191   : > { %735 = vrot.lane.b32.xlu1 %v3452_v24, %s3945_s8  ;;  %v652_v2 = vpop.f32.mrb[5].mxu0  ;;  %v307_v24 = vld [vmem:[#allocation7 + $0xb8] sm:$0xff] }
 0x192   : > { %v3467_v48 = vpop.f32.mrb[4].mxu1 }
 0x193   : > { %v702_v23 = vpop.f32.mrb[5].mxu1 }
 0x194   : > { %765 = vrot.lane.b32.xlu0 %v702_v23, %s3945_s8  ;;  %v3455_v52 = vpop.f32.mrb[6].mxu0 }
 0x195   : > { %733 = vrot.lane.b32.xlu1 %v652_v2, %s3945_s8  ;;  %v662_v25 = vpop.f32.mrb[7].mxu0 }
 0x196   : > { %v3470_v53 = vpop.f32.mrb[6].mxu1 }
 0x197   : > { %v712_v54 = vpop.f32.mrb[7].mxu1 }
 0x198   : > { %741 = vrot.lane.b32.xlu0 %v662_v25, %s3946_s9  ;;  %v3458_v55 = vpop.f32.mrb[8].mxu0 }
 0x199   : > { %767 = vrot.lane.b32.xlu1 %v3467_v48, %s3945_s8  ;;  %v672_v58 = vpop.f32.mrb[9].mxu0 }
 0x19a   : > { %v3473_v59 = vpop.f32.mrb[8].mxu1 }
 0x19b   : > { %v722_v4 = vpop.f32.mrb[9].mxu1 }
 0x19c   : > { %1258 = vperm.xlu0 %3720, %v3636_v56  }
 0x19d   : > { %751 = vrot.lane.b32.xlu1 %v3458_v55, %s3946_s9 }
 0x1a0   : > { %749 = vrot.lane.b32.xlu0 %v672_v58, %s3946_s9 }
 0x1a1   : > { %743 = vrot.lane.b32.xlu1 %v3455_v52, %s3946_s9  ;;  %v3589_v52 = vpack.c.bf16 %v307_v24, %v304_v40 }
 0x1a4   : > { %1264 = vperm.xlu0 %3720, %v3640_v62  }
 0x1a5   : > { %1261 = vperm.xlu1 %3721, %v3638_v37  }
 0x1a8   : > { %775 = vrot.lane.b32.xlu0 %v3470_v53, %s3946_s9 }
 0x1a9   : > { %773 = vrot.lane.b32.xlu1 %v712_v54, %s3946_s9 }
 0x1ac   : > { %783 = vrot.lane.b32.xlu0 %v3473_v59, %s3944_s6 }
 0x1ad   : > { %781 = vrot.lane.b32.xlu1 %v722_v4, %s3944_s6 }
 0x1f1   : > { %v3484_v1 = vpop.f32.mrb[10].mxu1 }
 0x1f2   : > { %v943_v49 = vadd.f32 %v3484_v1, %v309_v3  ;;  %v937_v63 = vpop.f32.mrb[11].mxu1 }
 0x1f3   : > { %v938_v0 = vadd.f32 %v937_v63, %v309_v3 }
 0x1f4   : > { %v957_v5 = vmul.f32 0.5, %v943_v49 }
 0x1f5   : > { %v956_v7 = vmul.f32 0.5, %v938_v0  ;;  %v3487_v8 = vpop.f32.mrb[12].mxu1 }
 0x1f6   : > { %3734 = vtanh.f32 %v957_v5  ;;  %v953_v6 = vadd.f32 %v3487_v8, %v309_v3  ;;  %v947_v9 = vpop.f32.mrb[13].mxu1 }
 0x1f7   : > { %3736 = vtanh.f32 %v956_v7  ;;  %v948_v11 = vadd.f32 %v947_v9, %v309_v3 }
 0x1f8   : > { %v959_v15 = vmul.f32 0.5, %v953_v6 }
 0x1f9   : > { %v958_v16 = vmul.f32 0.5, %v948_v11 }
 0x1fb   : > { %3738 = vtanh.f32 %v958_v16 }
 0x1fc   : > { %3740 = vtanh.f32 %v959_v15 }
 0x1fd   : > { %v760_v28 = vpop.permute.xlu1 %759 }
 0x1fe   : > { %v758_v58 = vpop.permute.xlu0 %757 }
 0x200   : > { %v3735_v20 = vpop.eup %3734 }
 0x201   : > { %v3737_v30 = vpop.eup %3736  ;;  %v965_v34 = vmul.f32 0.5, %v3735_v20 }
 0x202   : > { %v964_v10 = vmul.f32 0.5, %v3737_v30 }
 0x203   : > { %v736_v46 = vpop.permute.xlu1 %735  ;;  %v969_v48 = vadd.f32 0.5, %v965_v34 }
 0x204   : > { %v968_v2 = vadd.f32 0.5, %v964_v10  ;;  %v791_v37 = vsel %vm789_vm3, %v4415_v36, %v736_v46 }
 0x205   : > { %v3739_v47 = vpop.eup %3738  ;;  %v973_v54 = vmul.f32 %v969_v48, %v943_v49  ;;  %v1250_v48 = vld [vmem:[%s283_s20] sm:$0x1] }
 0x206   : > { %v972_v23 = vmul.f32 %v968_v2, %v938_v0  ;;  %v966_v43 = vmul.f32 0.5, %v3739_v47  ;;  %v3741_v25 = vpop.eup %3740  ;;  %v766_v61 = vpop.permute.xlu0 %765  ;;  %v4523_v47 = vshrl.u32 %v977_v17, 7 }
 0x207   : > { %v734_v53 = vpop.permute.xlu1 %733  ;;  %v967_v55 = vmul.f32 0.5, %v3741_v25 }
 0x208   : > { %3310 = vmatmul.mubr.msk.f32.vlgmr.msra.gmra.mrb[14].mxu1 %vm400_vm0, %v972_v23  ;;  %v970_v56 = vadd.f32 0.5, %v966_v43  ;;  %v790_v63 = vsel %vm789_vm3, %v4421_v13, %v734_v53  ;;  %v3641_v43 = vtrunc.f32 %v1250_v48  ;;  %v979_v25 = vsub.s32 0, %v4523_v47 }
 0x209   : > { %1074 = vmatprep.mubr.f32.mxu1 %v5720_v21  ;;  %3588 = vmatpush3.bf16.msra.mxu1 %v4430_v50  ;;  %v971_v4 = vadd.f32 0.5, %v967_v55 }
 0x20a   : > { %3590 = vmatprep.subr.bf16.mxu1 %v3589_v52  ;;  %v974_v60 = vmul.f32 %v970_v56, %v948_v11  ;;  %v742_v49 = vpop.permute.xlu0 %741  ;;  %v3642_v53 = vcvt.f32.s32 %v3641_v43  ;;  %v4547_v56 = vadd.s32 8, %v4523_v47 }
 0x20b   : > { %v768_v59 = vpop.permute.xlu1 %767  ;;  %v975_v50 = vmul.f32 %v971_v4, %v953_v6  ;;  %v4467_v36 = vsel %vm792_vm4, %v790_v63, %v742_v49 }
 0x20c   : > { %3311 = vmatmul.mubr.msk.f32.gmra.mrb[16].mxu1 %vm400_vm0, %v973_v54 }
 0x20d   : > { %1080 = vmatprep.mubr.f32.mxu1 %v5720_v21  ;;  %3592 = vmatpush3.bf16.msra.mxu1 %v3589_v52 }
 0x20f   : > { %v752_v62 = vpop.permute.xlu1 %751 }
 0x210   : > { %3312 = vmatmul.mubr.msk.f32.gmra.mrb[18].mxu1 %vm400_vm0, %v974_v60  ;;  %v796_v5 = vsel %vm400_vm0, %v752_v62, %v760_v28 }
 0x211   : > { %1086 = vmatprep.mubr.f32.mxu1 %v5720_v21  ;;  %v798_v13 = vsel %vm789_vm3, %v796_v5, %v4423_v19 }
 0x212   : > { %v4481_v9 = vsel %vm792_vm4, %v798_v13, %v768_v59 }
 0x213   : > { %v744_v3 = vpop.permute.xlu1 %743 }
 0x214   : > { %3313 = vmatmul.mubr.msk.f32.gmra.mrb[20].mxu1 %vm400_vm0, %v975_v50  ;;  %v4458_v1 = vsel %vm792_vm4, %v791_v37, %v744_v3 }
 0x215   : > { %3496 = vmatprep.mubr.msk.f32.mxu1 %vm400_vm0, %v972_v23  ;;  %1672 = vrot.lane.b32.xlu1 %v4458_v1, %s3946_s9  ;;  %v3595_v19 = vpack.c.bf16 %v4458_v1, %v4467_v36 }
 0x218   : > { %3497 = vmatmul.mubr.msk.f32.vlgmr.msra.gmra.mrb[22].mxu1 %vm400_vm0, %v973_v54  ;;  %v4534_v54 = vrot.slane %v3642_v53, %v979_v25 }
 0x219   : > { %3499 = vmatprep.mubr.msk.f32.mxu1 %vm400_vm0, %v974_v60  ;;  %1670 = vrot.lane.b32.xlu1 %v4467_v36, %s3946_s9 }
 0x21a   : > { %vm1285_vm8 = vcmp.eq.s32.totalorder %v4523_v47, %v4534_v54  ;;  %vm1286_vm9 = vcmp.eq.s32.totalorder %v4547_v56, %v4534_v54 }
 0x21b   : > { %v1259_v0 = vpop.permute.xlu0 %1258  ;;  %v4544_v55 = vsel %vm1285_vm8, 1.0, %v5720_v21 }
 0x21c   : > { %3500 = vmatmul.mubr.msk.f32.gmra.mrb[24].mxu1 %vm400_vm0, %v975_v50  ;;  %vm1267_vm5 = vcmp.eq.s32.totalorder %v4409_v29, %v1259_v0 }
 0x21d   : > { %1368 = vmatprep.mubr.f32.mxu1 %v5720_v21  ;;  %v3319_v34 = vsel %vm1267_vm5, 1.0, %v5720_v21 }
 0x21f   : > { %v750_v7 = vpop.permute.xlu0 %749 }
 0x220   : > { %v795_v8 = vsel %vm400_vm0, %v750_v7, %v758_v58  ;;  %v311_v7 = vld [vmem:[#allocation7 + $0xd0] ss:$8 sm:$0x7] }
 0x221   : > { %v797_v6 = vsel %vm789_vm3, %v795_v8, %v4427_v22  ;;  %v983_v8 = vsub.s32 1, %v4523_v47 }
 0x222   : > { %v4484_v11 = vsel %vm792_vm4, %v797_v6, %v766_v61 }
 0x223   : > { %v1265_v15 = vpop.permute.xlu0 %1264  ;;  %v3593_v16 = vpack.c.bf16 %v4481_v9, %v4484_v11  ;;  %v4600_v5 = vadd.f32 %v4484_v11, %v4467_v36 }
 0x224   : > { %v1262_v20 = vpop.permute.xlu1 %1261  ;;  %vm1269_vm7 = vcmp.eq.s32.totalorder %v4409_v29, %v1265_v15  ;;  %v980_v15 = vrot.slane %v311_v7, %v979_v25 }
 0x225   : > { %3594 = vmatprep.subr.bf16.mxu1 %v3593_v16  ;;  %vm1268_vm6 = vcmp.eq.s32.totalorder %v4409_v29, %v1262_v20  ;;  %v3321_v46 = vsel %vm1269_vm7, 1.0, %v5720_v21  ;;  %v984_v16 = vrot.slane %v311_v7, %v983_v8  ;;  %v4612_v20 = vadd.f32 %v4481_v9, %v4458_v1 }
 0x226   : > { %3596 = vmatpush1.bf16.msra.mxu1 %v3595_v19 }
 0x227   : > { %v776_v28 = vpop.permute.xlu0 %775 }
 0x228   : > { %v774_v30 = vpop.permute.xlu1 %773 }
 0x229   : > { %3324 = vmatmul.mubr.msk.f32.vlgmr.msra.gmra.mrb[26].mxu1 %vm1291_vm1, %v4418_v41  ;;  %v3320_v41 = vsel %vm1268_vm6, 1.0, %v5720_v21 }
 0x22a   : > { %1374 = vmatprep.mubr.f32.mxu1 %v5720_v21 }
 0x22b   : > { %v784_v22 = vpop.permute.xlu0 %783 }
 0x22c   : > { %v802_v10 = vsel %vm400_vm0, %v776_v28, %v784_v22  ;;  %v782_v40 = vpop.permute.xlu1 %781 }
 0x22d   : > { %3325 = vmatmul.mubr.msk.f32.gmra.mrb[28].mxu1 %vm1291_vm1, %v3319_v34  ;;  %v801_v24 = vsel %vm400_vm0, %v774_v30, %v782_v40 }
 0x22e   : > { %1680 = vrot.lane.b32.xlu1 %v801_v24, %s3946_s9  ;;  %1380 = vmatprep.mubr.f32.mxu1 %v5720_v21  ;;  %v3597_v2 = vpack.c.bf16 %v802_v10, %v801_v24 }
 0x230   : > { %3598 = vmatprep.subr.bf16.mxu0 %v3597_v2 }
 0x231   : > { %3326 = vmatmul.mubr.msk.f32.gmra.mrb[30].mxu1 %vm1291_vm1, %v3320_v41  ;;  %3600 = vmatpush3.bf16.msra.mxu0 %v3597_v2 }
 0x232   : > { %1682 = vrot.lane.b32.xlu1 %v802_v10, %s3946_s9  ;;  %1386 = vmatprep.mubr.f32.mxu1 %v5720_v21 }
 0x234   : > { %3507 = vmatmul.mubr.msk.f32.vlgmr.msra.gmra.mrb[10].mxu0 %vm1291_vm1, %v3319_v34 }
 0x235   : > { %3327 = vmatmul.mubr.msk.f32.gmra.mrb[32].mxu1 %vm1291_vm1, %v3321_v46  ;;  %3509 = vmatprep.mubr.msk.f32.mxu0 %vm1291_vm1, %v3320_v41 }
 0x236   : > { %1652 = vrot.lane.b32.xlu1 %v4484_v11, %s3944_s6  ;;  %3520 = vmatprep.mubr.msk.f32.mxu1 %vm400_vm0, %v4544_v55 }
 0x238   : > { %3510 = vmatmul.mubr.msk.f32.gmra.mrb[12].mxu0 %vm1291_vm1, %v3321_v46 }
 0x239   : > { %1560 = vmatprep.mubr.f32.mxu0 %v5720_v21 }
 0x23a   : > { %1654 = vrot.lane.b32.xlu1 %v4481_v9, %s3944_s6 }
 0x23e   : > { %1660 = vrot.lane.b32.xlu1 %v4484_v11, %s3946_s9 }
 0x242   : > { %1662 = vrot.lane.b32.xlu1 %v4481_v9, %s3946_s9 }
 0x287   : > { %v1673_v29 = vpop.permute.xlu1 %1672 }
 0x288   : > { %v4537_v17 = vsub.f32 %v4481_v9, %v1673_v29  ;;  %v4562_v60 = vsub.f32 %v802_v10, %v1673_v29  ;;  %v987_v29 = vsub.s32 2, %v4523_v47 }
 0x28b   : > { %v1671_v23 = vpop.permute.xlu1 %1670 }
 0x28c   : > { %v4529_v52 = vsub.f32 %v4484_v11, %v1671_v23  ;;  %v4551_v58 = vsub.f32 %v801_v24, %v1671_v23 }
 0x28e   : > { %1970 = vrot.lane.b32.xlu1 %v4529_v52, %s3945_s8 }
 0x292   : > { %1972 = vrot.lane.b32.xlu1 %v4537_v17, %s3945_s8 }
 0x296   : > { %1770 = vrot.lane.b32.xlu1 %v4551_v58, %s3946_s9 }
 0x2a0   : > { %v1681_v59 = vpop.permute.xlu1 %1680 }
 0x2a1   : > { %v4558_v4 = vadd.f32 %v1681_v59, %v4467_v36 }
 0x2a3   : > { %2034 = vrot.lane.b32.xlu1 %v4558_v4, %s3945_s8 }
 0x2a4   : > { %v1683_v61 = vpop.permute.xlu1 %1682 }
 0x2a5   : > { %v4567_v62 = vadd.f32 %v1683_v61, %v4458_v1  ;;  %v988_v61 = vrot.slane %v311_v7, %v987_v29 }
 0x2a7   : > { %1772 = vrot.lane.b32.xlu1 %v4562_v60, %s3946_s9 }
 0x2a8   : > { %v1653_v50 = vpop.permute.xlu1 %1652 }
 0x2a9   : > { %v4574_v37 = vadd.f32 %v1653_v50, %v4467_v36 }
 0x2ab   : > { %2036 = vrot.lane.b32.xlu1 %v4567_v62, %s3945_s8 }
 0x2ac   : > { %v1655_v3 = vpop.permute.xlu1 %1654 }
 0x2ad   : > { %v4581_v49 = vadd.f32 %v1655_v3, %v4458_v1 }
 0x2af   : > { %1738 = vrot.lane.b32.xlu1 %v4529_v52, %s3946_s9 }
 0x2b0   : > { %v1661_v63 = vpop.permute.xlu1 %1660 }
 0x2b1   : > { %v4594_v0 = vadd.f32 %v1661_v63, %v4467_v36 }
 0x2b3   : > { %1824 = vrot.lane.b32.xlu1 %v4574_v37, %s3945_s8 }
 0x2b4   : > { %v1663_v13 = vpop.permute.xlu1 %1662 }
 0x2b5   : > { %v4606_v6 = vadd.f32 %v1663_v13, %v4458_v1 }
 0x2b7   : > { %1740 = vrot.lane.b32.xlu1 %v4537_v17, %s3946_s9 }
 0x2bb   : > { %1826 = vrot.lane.b32.xlu1 %v4581_v49, %s3945_s8 }
 0x2bf   : > { %1854 = vrot.lane.b32.xlu1 %v4551_v58, %s3945_s8 }
 0x2c3   : > { %1884 = vrot.lane.b32.xlu1 %v4558_v4, %s3946_s9 }
 0x2c7   : > { %1856 = vrot.lane.b32.xlu1 %v4562_v60, %s3945_s8 }
 0x2cb   : > { %1886 = vrot.lane.b32.xlu1 %v4567_v62, %s3946_s9 }
 0x2cf   : > { %1920 = vrot.lane.b32.xlu1 %v4594_v0, %s3946_s9 }
 0x2d3   : > { %1950 = vrot.lane.b32.xlu1 %v4600_v5, %s3944_s6 }
 0x2d7   : > { %1922 = vrot.lane.b32.xlu1 %v4606_v6, %s3946_s9 }
 0x2db   : > { %v1070_v36 = vpop.f32.mrb[14].mxu1  ;;  %1952 = vrot.lane.b32.xlu1 %v4612_v20, %s3944_s6 }
 0x2dc   : > { %v4616_v11 = vadd.f32 %v1070_v36, %v980_v15  ;;  %v1072_v19 = vpop.f32.mrb[15].mxu1 }
 0x2dd   : > { %v4618_v28 = vadd.f32 %v1072_v19, %v984_v16 }
 0x2de   : > { %v1178_v30 = vmul.f32 0.5, %v4616_v11 }
 0x2df   : > { %v1076_v22 = vpop.f32.mrb[16].mxu1  ;;  %1998 = vrot.lane.b32.xlu1 %v4551_v58, %s3944_s6  ;;  %v1179_v34 = vmul.f32 0.5, %v4618_v28 }
 0x2e0   : > { %v4624_v10 = vadd.f32 %v1076_v22, %v980_v15  ;;  %v1078_v1 = vpop.f32.mrb[17].mxu1  ;;  %3742 = vtanh.f32 %v1178_v30 }
 0x2e1   : > { %v4626_v9 = vadd.f32 %v1078_v1, %v984_v16  ;;  %3744 = vtanh.f32 %v1179_v34 }
 0x2e2   : > { %v1181_v40 = vmul.f32 0.5, %v4624_v10 }
 0x2e3   : > { %v1082_v24 = vpop.f32.mrb[18].mxu1  ;;  %2000 = vrot.lane.b32.xlu1 %v4562_v60, %s3944_s6  ;;  %v1182_v2 = vmul.f32 0.5, %v4626_v9 }
 0x2e4   : > { %v4632_v41 = vadd.f32 %v1082_v24, %v980_v15  ;;  %v1084_v46 = vpop.f32.mrb[19].mxu1  ;;  %3746 = vtanh.f32 %v1181_v40 }
 0x2e5   : > { %v4635_v48 = vadd.f32 %v1084_v46, %v984_v16  ;;  %3748 = vtanh.f32 %v1182_v2 }
 0x2e6   : > { %v1184_v23 = vmul.f32 0.5, %v4632_v41 }
 0x2e7   : > { %v1185_v43 = vmul.f32 0.5, %v4635_v48  ;;  %v1088_v25 = vpop.f32.mrb[20].mxu1  ;;  %1802 = vrot.lane.b32.xlu1 %v4594_v0, %s3944_s6 }
 0x2e8   : > { %v4641_v53 = vadd.f32 %v1088_v25, %v980_v15  ;;  %v1090_v59 = vpop.f32.mrb[21].mxu1  ;;  %3750 = vtanh.f32 %v1184_v23 }
 0x2e9   : > { %v4643_v50 = vadd.f32 %v1090_v59, %v984_v16  ;;  %3752 = vtanh.f32 %v1185_v43 }
 0x2ea   : > { %v1187_v47 = vmul.f32 0.5, %v4641_v53  ;;  %v3743_v13 = vpop.eup %3742 }
 0x2eb   : > { %v1188_v3 = vmul.f32 0.5, %v4643_v50  ;;  %v3498_v63 = vpop.f32.mrb[22].mxu1  ;;  %v3745_v30 = vpop.eup %3744  ;;  %v1202_v7 = vmul.f32 0.5, %v3743_v13 }
 0x2ec   : > { %v4647_v8 = vadd.f32 %v3498_v63, %v988_v61  ;;  %v1159_v36 = vpop.f32.mrb[23].mxu1  ;;  %3754 = vtanh.f32 %v1187_v47  ;;  %v1203_v24 = vmul.f32 0.5, %v3745_v30 }
 0x2ed   : > { %v4649_v19 = vadd.f32 %v1159_v36, %v988_v61  ;;  %3756 = vtanh.f32 %v1188_v3  ;;  %v1214_v23 = vadd.f32 0.5, %v1202_v7 }
 0x2ee   : > { %v1183_v15 = vmul.f32 0.5, %v4647_v8  ;;  %v3747_v34 = vpop.eup %3746  ;;  %v1215_v3 = vadd.f32 0.5, %v1203_v24 }
 0x2ef   : > { %v1180_v16 = vmul.f32 0.5, %v4649_v19  ;;  %v3501_v22 = vpop.f32.mrb[24].mxu1  ;;  %v3749_v46 = vpop.eup %3748  ;;  %v1205_v43 = vmul.f32 0.5, %v3747_v34  ;;  %v1226_v13 = vmul.f32 %v1214_v23, %v4616_v11 }
 0x2f0   : > { %3758 = vtanh.f32 %v1183_v15  ;;  %v4653_v1 = vadd.f32 %v3501_v22, %v988_v61  ;;  %v1169_v40 = vpop.f32.mrb[25].mxu1  ;;  %v1206_v63 = vmul.f32 0.5, %v3749_v46  ;;  %v1227_v22 = vmul.f32 %v1215_v3, %v4618_v28 }
 0x2f1   : > { %3760 = vtanh.f32 %v1180_v16  ;;  %v4655_v2 = vadd.f32 %v1169_v40, %v988_v61  ;;  %v1217_v36 = vadd.f32 0.5, %v1205_v43 }
 0x2f2   : > { %v1189_v29 = vmul.f32 0.5, %v4653_v1  ;;  %v3751_v59 = vpop.eup %3750  ;;  %v1218_v40 = vadd.f32 0.5, %v1206_v63 }
 0x2f3   : > { %v1186_v25 = vmul.f32 0.5, %v4655_v2  ;;  %v3753_v47 = vpop.eup %3752  ;;  %v1208_v15 = vmul.f32 0.5, %v3751_v59  ;;  %v1229_v21 = vmul.f32 %v1217_v36, %v4624_v10 }
 0x2f4   : > { %3762 = vtanh.f32 %v1189_v29  ;;  %v1209_v61 = vmul.f32 0.5, %v3753_v47  ;;  %v1238_v29 = vmul.f32 %v1226_v13, %v4389_v27  ;;  %v1230_v11 = vmul.f32 %v1218_v40, %v4626_v9 }
 0x2f5   : > { %3764 = vtanh.f32 %v1186_v25  ;;  %v1220_v24 = vadd.f32 0.5, %v1208_v15  ;;  %v1239_v47 = vmul.f32 %v1227_v22, %v4389_v27  ;;  %v1241_v13 = vmul.f32 %v1229_v21, %v4397_v18 }
 0x2f6   : > { %v3755_v30 = vpop.eup %3754  ;;  %v1221_v46 = vadd.f32 0.5, %v1209_v61 }
 0x2f7   : > { %v3757_v16 = vpop.eup %3756  ;;  %v1211_v25 = vmul.f32 0.5, %v3755_v30  ;;  %v1232_v15 = vmul.f32 %v1220_v24, %v4632_v41 }
 0x2f8   : > { %v1212_v23 = vmul.f32 0.5, %v3757_v16  ;;  %v1233_v30 = vmul.f32 %v1221_v46, %v4635_v48 }
 0x2f9   : > { %v1223_v61 = vadd.f32 0.5, %v1211_v25  ;;  %v1244_v48 = vmul.f32 %v1232_v15, %v4387_v26 }
 0x2fa   : > { %v3759_v7 = vpop.eup %3758  ;;  %v1224_v16 = vadd.f32 0.5, %v1212_v23 }
 0x2fb   : > { %v3761_v34 = vpop.eup %3760  ;;  %v1207_v51 = vmul.f32 0.5, %v3759_v7  ;;  %v1242_v7 = vmul.f32 %v1230_v11, %v4397_v18  ;;  %v1235_v21 = vmul.f32 %v1223_v61, %v4641_v53 }
 0x2fc   : > { %v1204_v38 = vmul.f32 0.5, %v3761_v34  ;;  %v1370_v59 = vpop.f32.mrb[26].mxu1  ;;  %v1236_v24 = vmul.f32 %v1224_v16, %v4643_v50 }
 0x2fd   : > { %v1219_v43 = vadd.f32 0.5, %v1207_v51  ;;  %v1478_v3 = vmul.f32 %v1370_v59, %v1238_v29  ;;  %v1372_v63 = vpop.f32.mrb[27].mxu1 }
 0x2fe   : > { %v3763_v28 = vpop.eup %3762  ;;  %v1216_v44 = vadd.f32 0.5, %v1204_v38  ;;  %v1479_v36 = vmul.f32 %v1372_v63, %v1239_v47 }
 0x2ff   : > { %v3765_v35 = vpop.eup %3764  ;;  %v1213_v10 = vmul.f32 0.5, %v3763_v28  ;;  %v1231_v51 = vmul.f32 %v1219_v43, %v4647_v8 }
 0x300   : > { %v1210_v9 = vmul.f32 0.5, %v3765_v35  ;;  %v1376_v22 = vpop.f32.mrb[28].mxu1  ;;  %v1228_v59 = vmul.f32 %v1216_v44, %v4649_v19  ;;  %v1245_v35 = vmul.f32 %v1233_v30, %v4387_v26 }
 0x301   : > { %v1225_v40 = vadd.f32 0.5, %v1213_v10  ;;  %v1481_v29 = vmul.f32 %v1376_v22, %v1241_v13  ;;  %v1378_v38 = vpop.f32.mrb[29].mxu1  ;;  %v1243_v11 = vmul.f32 %v1231_v51, %v4397_v18 }
 0x302   : > { %v1222_v34 = vadd.f32 0.5, %v1210_v9  ;;  %v1482_v47 = vmul.f32 %v1378_v38, %v1242_v7  ;;  %v1240_v53 = vmul.f32 %v1228_v59, %v4389_v27 }
 0x303   : > { %v3603_v41 = vpack.c.bf16 %v1481_v29, %v1478_v3  ;;  %v1237_v8 = vmul.f32 %v1225_v40, %v4653_v1  ;;  %v1247_v3 = vmul.f32 %v1235_v21, %v4395_v14  ;;  %v1248_v1 = vmul.f32 %v1236_v24, %v4395_v14 }
 0x304   : > { %v3601_v46 = vpack.c.bf16 %v1482_v47, %v1479_v36  ;;  %v1382_v25 = vpop.f32.mrb[30].mxu1  ;;  %v1234_v23 = vmul.f32 %v1222_v34, %v4655_v2 }
 0x305   : > { %v1484_v43 = vmul.f32 %v1382_v25, %v1244_v48  ;;  %v1384_v44 = vpop.f32.mrb[31].mxu1  ;;  %v1249_v10 = vmul.f32 %v1237_v8, %v4395_v14 }
 0x306   : > { %v1485_v19 = vmul.f32 %v1384_v44, %v1245_v35  ;;  %3602 = vmatprep.subr.bf16.mxu0 %v3601_v46  ;;  %v1246_v2 = vmul.f32 %v1234_v23, %v4387_v26  ;;  %v5753_v26 = vmov 0.0  }
 0x307   : > { %v3508_v28 = vpop.f32.mrb[10].mxu0  ;;  %3604 = vmatpush1.bf16.msra.mxu0 %v3603_v41  ;;  %v3323_v14 = vsel %vm1286_vm9, 1.0, %v5753_v26 }
 0x308   : > { %v1483_v63 = vmul.f32 %v3508_v28, %v1243_v11  ;;  %v1388_v50 = vpop.f32.mrb[32].mxu1  ;;  %v1459_v18 = vpop.f32.mrb[11].mxu0 }
 0x309   : > { %v1487_v36 = vmul.f32 %v1388_v50, %v1247_v3  ;;  %v1390_v13 = vpop.f32.mrb[33].mxu1  ;;  %v1480_v15 = vmul.f32 %v1459_v18, %v1240_v53  ;;  %v1971_v18 = vpop.permute.xlu1 %1970 }
 0x30a   : > { %v1488_v30 = vmul.f32 %v1390_v13, %v1248_v1 }
 0x30b   : > { %v3607_v61 = vpack.c.bf16 %v1487_v36, %v1484_v43  ;;  %v3511_v9 = vpop.f32.mrb[12].mxu0  ;;  %v3609_v27 = vpack.c.bf16 %v1483_v63, %v1480_v15 }
 0x30c   : > { %v3605_v16 = vpack.c.bf16 %v1488_v30, %v1485_v19  ;;  %v1489_v51 = vmul.f32 %v3511_v9, %v1249_v10  ;;  %v1469_v40 = vpop.f32.mrb[13].mxu0 }
 0x30d   : > { %v1486_v22 = vmul.f32 %v1469_v40, %v1246_v2  ;;  %3610 = vmatprep.subr.bf16.mxu1 %v3609_v27  ;;  %v1973_v2 = vpop.permute.xlu1 %1972 }
 0x30e   : > { %3606 = vmatprep.subr.bf16.mxu0 %v3605_v16  ;;  %3612 = vmatpush3.bf16.msra.mxu1 %v3609_v27 }
 0x30f   : > { %v3613_v7 = vpack.c.bf16 %v1489_v51, %v1486_v22  ;;  %3608 = vmatpush1.bf16.msra.mxu0 %v3607_v61 }
 0x311   : > { %3614 = vmatprep.subr.bf16.mxu1 %v3613_v7  ;;  %v1771_v15 = vpop.permute.xlu1 %1770 }
 0x312   : > { %3332 = vmatmul.mubr.msk.f32.vlgmr.msra.gmra.mrb[14].mxu0 %vm400_vm0, %v4544_v55  ;;  %3616 = vmatpush3.bf16.msra.mxu1 %v3613_v7 }
 0x313   : > { %1566 = vmatprep.mubr.f32.mxu0 %v5753_v26 }
 0x315   : > { %3521 = vmatmul.mubr.msk.f32.vlgmr.msra.gmra.mrb[34].mxu1 %vm400_vm0, %v3323_v14  ;;  %v4776_v30 = vpop.permute.xlu1 %2034 }
 0x316   : > { %3333 = vmatmul.mubr.msk.f32.gmra.mrb[16].mxu0 %vm400_vm0, %v3323_v14 }
 0x319   : > { %v1773_v61 = vpop.permute.xlu1 %1772 }
 0x31d   : > { %v4780_v51 = vpop.permute.xlu1 %2036 }
 0x3e5   : > { %v1562_v34 = vpop.f32.mrb[14].mxu0 }
 0x3e6   : > { %1712 = vrot.lane.b32.xlu0 %v1562_v34, %s3946_s9  ;;  %v1564_v29 = vpop.f32.mrb[15].mxu0 }
 0x3e7   : > { %v4693_v38 = vadd.f32 %v1564_v29, %v1562_v34 }
 0x3e8   : > { %v3522_v55 = vpop.f32.mrb[34].mxu1 }
 0x3e9   : > { %v1568_v59 = vpop.f32.mrb[16].mxu0  ;;  %v1639_v21 = vpop.f32.mrb[35].mxu1 }
 0x3ea   : > { %1714 = vrot.lane.b32.xlu0 %v1568_v59, %s3946_s9  ;;  %v1570_v47 = vpop.f32.mrb[17].mxu0 }
 0x3eb   : > { %v4696_v41 = vadd.f32 %v1570_v47, %v1568_v59 }
 0x3ee   : > { %1722 = vrot.lane.b32.xlu0 %v1639_v21, %s3946_s9 }
 0x3f2   : > { %1724 = vrot.lane.b32.xlu0 %v3522_v55, %s3946_s9 }
 0x3f6   : > { %1694 = vrot.lane.b32.xlu0 %v1564_v29, %s3944_s6 }
 0x3fa   : > { %1696 = vrot.lane.b32.xlu0 %v1570_v47, %s3944_s6 }
 0x3fe   : > { %1702 = vrot.lane.b32.xlu0 %v1564_v29, %s3946_s9 }
 0x402   : > { %1704 = vrot.lane.b32.xlu0 %v1570_v47, %s3946_s9 }
 0x458   : > { %v1713_v54 = vpop.permute.xlu0 %1712 }
 0x459   : > { %v4704_v56 = vsub.f32 %v1564_v29, %v1713_v54  ;;  %v4708_v35 = vsub.f32 %v1639_v21, %v1713_v54 }
 0x45b   : > { %1978 = vrot.lane.b32.xlu0 %v4704_v56, %s3945_s8 }
 0x45c   : > { %v1715_v48 = vpop.permute.xlu0 %1714 }
 0x45d   : > { %v4720_v43 = vsub.f32 %v1570_v47, %v1715_v48  ;;  %v4725_v53 = vsub.f32 %v3522_v55, %v1715_v48 }
 0x45f   : > { %1780 = vrot.lane.b32.xlu0 %v4708_v35, %s3946_s9 }
 0x460   : > { %v1723_v24 = vpop.permute.xlu0 %1722 }
 0x461   : > { %v4743_v1 = vadd.f32 %v1723_v24, %v1562_v34 }
 0x463   : > { %1748 = vrot.lane.b32.xlu0 %v4704_v56, %s3946_s9  ;;  %v1776_v7 = vmul.f32 %v1771_v15, %v4743_v1 }
 0x464   : > { %v1725_v8 = vpop.permute.xlu0 %1724 }
 0x465   : > { %v4739_v50 = vadd.f32 %v1725_v8, %v1568_v59 }
 0x468   : > { %v1695_v46 = vpop.permute.xlu0 %1694 }
 0x469   : > { %v4714_v25 = vadd.f32 %v1695_v46, %v1562_v34  ;;  %v1777_v46 = vmul.f32 %v1773_v61, %v4739_v50 }
 0x46b   : > { %1834 = vrot.lane.b32.xlu0 %v4714_v25, %s3945_s8  ;;  %v2018_v11 = vmul.f32 %v4714_v25, %v4574_v37  ;;  %v1976_v27 = vmul.f32 %v1971_v18, %v4714_v25 }
 0x46c   : > { %v1697_v23 = vpop.permute.xlu0 %1696 }
 0x46d   : > { %v2020_v44 = vadd.f32 %v2018_v11, %v2018_v11  ;;  %v4735_v63 = vadd.f32 %v1697_v23, %v1568_v59 }
 0x46f   : > { %2024 = vrot.lane.b32.xlu1 %v2020_v44, %s3945_s8  ;;  %1980 = vrot.lane.b32.xlu0 %v4720_v43, %s3945_s8  ;;  %v2019_v36 = vmul.f32 %v4735_v63, %v4581_v49  ;;  %v1977_v54 = vmul.f32 %v1973_v2, %v4735_v63 }
 0x470   : > { %v1703_v19 = vpop.permute.xlu0 %1702 }
 0x471   : > { %v4753_v10 = vadd.f32 %v1703_v19, %v1562_v34  ;;  %v2021_v13 = vadd.f32 %v2019_v36, %v2019_v36  ;;  %v4787_v34 = vpop.permute.xlu1 %1738 }
 0x473   : > { %1782 = vrot.lane.b32.xlu0 %v4725_v53, %s3946_s9  ;;  %v1744_v61 = vmul.f32 %v4787_v34, %v4753_v10 }
 0x474   : > { %v1705_v28 = vpop.permute.xlu0 %1704 }
 0x475   : > { %v4729_v3 = vadd.f32 %v1705_v28, %v1568_v59  ;;  %v4793_v59 = vpop.permute.xlu1 %1824  ;;  %v2144_v28 = vmul.f32 %v4753_v10, %v4594_v0 }
 0x477   : > { %1814 = vrot.lane.b32.xlu1 %v4729_v3, %s3944_s6  ;;  %1750 = vrot.lane.b32.xlu0 %v4720_v43, %s3946_s9  ;;  %v2146_v2 = vadd.f32 %v2144_v28, %v2144_v28 }
 0x479   : > { %v4797_v47 = vpop.permute.xlu1 %1740 }
 0x47b   : > { %1836 = vrot.lane.b32.xlu0 %v4735_v63, %s3945_s8 }
 0x47d   : > { %v4804_v23 = vpop.permute.xlu1 %1826 }
 0x47f   : > { %2044 = vrot.lane.b32.xlu0 %v4739_v50, %s3945_s8 }
 0x481   : > { %v1855_v36 = vpop.permute.xlu1 %1854 }
 0x483   : > { %2042 = vrot.lane.b32.xlu0 %v4743_v1, %s3945_s8 }
 0x487   : > { %1862 = vrot.lane.b32.xlu0 %v4708_v35, %s3945_s8 }
 0x48b   : > { %1864 = vrot.lane.b32.xlu0 %v4725_v53, %s3945_s8 }
 0x48f   : > { %1896 = vrot.lane.b32.xlu0 %v4739_v50, %s3946_s9 }
 0x493   : > { %1928 = vrot.lane.b32.xlu0 %v4753_v10, %s3946_s9 }
 0x497   : > { %1960 = vrot.lane.b32.xlu0 %v4693_v38, %s3944_s6 }
 0x49b   : > { %1930 = vrot.lane.b32.xlu0 %v4729_v3, %s3946_s9 }
 0x49f   : > { %1962 = vrot.lane.b32.xlu0 %v4696_v41, %s3944_s6 }
 0x4a3   : > { %2006 = vrot.lane.b32.xlu0 %v4708_v35, %s3944_s6 }
 0x4a7   : > { %2008 = vrot.lane.b32.xlu0 %v4725_v53, %s3944_s6 }
 0x4ab   : > { %1812 = vrot.lane.b32.xlu0 %v4753_v10, %s3944_s6 }
 0x4af   : > { %1804 = vrot.lane.b32.xlu0 %v4606_v6, %s3944_s6 }
 0x4b3   : > { %1894 = vrot.lane.b32.xlu0 %v4743_v1, %s3946_s9 }
 0x4b7   : > { %2026 = vrot.lane.b32.xlu0 %v2021_v13, %s3945_s8 }
 0x4cd   : > { %v1979_v9 = vpop.permute.xlu0 %1978 }
 0x4ce   : > { %v1984_v16 = vmul.f32 %v1979_v9, %v4574_v37  ;;  %v4823_v9 = vpop.permute.xlu1 %1884 }
 0x4d0   : > { %v1986_v40 = vadd.f32 %v1984_v16, %v1976_v27 }
 0x4d1   : > { %v1781_v22 = vpop.permute.xlu0 %1780 }
 0x4d2   : > { %v1786_v26 = vmul.f32 %v1781_v22, %v4558_v4  ;;  %1990 = vrot.lane.b32.xlu1 %v1986_v40, %s3944_s6 }
 0x4d4   : > { %v4785_v14 = vadd.f32 %v1786_v26, %v1776_v7  ;;  %v1745_v7 = vmul.f32 %v4797_v47, %v4729_v3  ;;  %v2052_v26 = vmul.f32 %v4776_v30, %v4714_v25  ;;  %v2053_v25 = vmul.f32 %v4780_v51, %v4735_v63 }
 0x4d5   : > { %v4791_v29 = vpop.permute.xlu0 %1748 }
 0x4d6   : > { %1792 = vrot.lane.b32.xlu1 %v4785_v14, %s3946_s9  ;;  %v1754_v13 = vmul.f32 %v4791_v29, %v4594_v0 }
 0x4d8   : > { %v4825_v27 = vadd.f32 %v1754_v13, %v1744_v61 }
 0x4dd   : > { %v4795_v55 = vpop.permute.xlu0 %1834 }
 0x4de   : > { %v1840_v63 = vmul.f32 %v4795_v55, %v4594_v0 }
 0x4e1   : > { %v1981_v21 = vpop.permute.xlu0 %1980 }
 0x4e2   : > { %v1985_v48 = vmul.f32 %v1981_v21, %v4581_v49 }
 0x4e4   : > { %v1987_v24 = vadd.f32 %v1985_v48, %v1977_v54 }
 0x4e5   : > { %v1783_v8 = vpop.permute.xlu0 %1782 }
 0x4e6   : > { %v1787_v11 = vmul.f32 %v1783_v8, %v4567_v62  ;;  %1992 = vrot.lane.b32.xlu0 %v1987_v24, %s3944_s6  ;;  %v1857_v24 = vpop.permute.xlu1 %1856 }
 0x4e7   : > { %v1861_v13 = vmul.f32 %v1857_v24, %v4739_v50 }
 0x4e8   : > { %v4806_v44 = vadd.f32 %v1787_v11, %v1777_v46  ;;  %v1860_v46 = vmul.f32 %v1855_v36, %v4743_v1 }
 0x4e9   : > { %v1751_v19 = vpop.permute.xlu0 %1750 }
 0x4ea   : > { %1794 = vrot.lane.b32.xlu1 %v4806_v44, %s3946_s9  ;;  %v1755_v16 = vmul.f32 %v1751_v19, %v4606_v6  ;;  %v4853_v36 = vpop.permute.xlu1 %1886 }
 0x4ec   : > { %v4840_v54 = vadd.f32 %v1755_v16, %v1745_v7  ;;  %v2145_v16 = vmul.f32 %v4729_v3, %v4606_v6 }
 0x4ed   : > { %v4812_v18 = vpop.permute.xlu0 %1836 }
 0x4ee   : > { %2136 = vrot.lane.b32.xlu1 %v4785_v14, %s3944_s6  ;;  %v2147_v7 = vadd.f32 %v2145_v16, %v2145_v16 }
 0x4f1   : > { %v4818_v15 = vpop.permute.xlu0 %2044 }
 0x4f2   : > { %2150 = vrot.lane.b32.xlu1 %v2146_v2, %s3946_s9  ;;  %v2055_v21 = vmul.f32 %v4818_v15, %v4581_v49 }
 0x4f4   : > { %v2057_v28 = vadd.f32 %v2055_v21, %v2053_v25 }
 0x4f5   : > { %v4828_v40 = vpop.permute.xlu0 %2042 }
 0x4f6   : > { %v2054_v22 = vmul.f32 %v4828_v40, %v4574_v37  ;;  %1760 = vrot.lane.b32.xlu1 %v4825_v27, %s3944_s6 }
 0x4f8   : > { %v2056_v48 = vadd.f32 %v2054_v22, %v2052_v26  ;;  %v1921_v26 = vpop.permute.xlu1 %1920 }
 0x4f9   : > { %v1863_v8 = vpop.permute.xlu0 %1862 }
 0x4fa   : > { %v1868_v37 = vmul.f32 %v1863_v8, %v4558_v4  ;;  %1762 = vrot.lane.b32.xlu1 %v4840_v54, %s3944_s6  ;;  %2060 = vrot.lane.b32.xlu0 %v2056_v48, %s3944_s6  ;;  %v1926_v48 = vmul.f32 %v1921_v26, %v4743_v1  ;;  %v1830_v8 = vmul.f32 %v4793_v59, %v4753_v10 }
 0x4fb   : > { %v2083_v26 = vmul.f32 %v4797_v47, %v4725_v53 }
 0x4fc   : > { %v1870_v11 = vadd.f32 %v1868_v37, %v1860_v46  ;;  %v2084_v46 = vmul.f32 %v4791_v29, %v4551_v58  ;;  %v1841_v37 = vmul.f32 %v4812_v18, %v4606_v6  ;;  %v2085_v29 = vmul.f32 %v1751_v19, %v4562_v60 }
 0x4fd   : > { %v1865_v49 = vpop.permute.xlu0 %1864 }
 0x4fe   : > { %v1869_v2 = vmul.f32 %v1865_v49, %v4567_v62  ;;  %2062 = vrot.lane.b32.xlu0 %v2057_v28, %s3944_s6  ;;  %1874 = vrot.lane.b32.xlu1 %v1870_v11, %s3946_s9  ;;  %v1842_v11 = vadd.f32 %v1840_v63, %v1830_v8  ;;  %v2082_v49 = vmul.f32 %v4787_v34, %v4708_v35 }
 0x4ff   : > { %v1905_v34 = vmul.f32 %v4853_v36, %v4729_v3 }
 0x500   : > { %v1871_v61 = vadd.f32 %v1869_v2, %v1861_v13  ;;  %v1831_v13 = vmul.f32 %v4804_v23, %v4729_v3  ;;  %v1951_v2 = vpop.permute.xlu1 %1950 }
 0x501   : > { %v4857_v22 = vpop.permute.xlu0 %1896 }
 0x502   : > { %2138 = vrot.lane.b32.xlu0 %v4806_v44, %s3944_s6  ;;  %1876 = vrot.lane.b32.xlu1 %v1871_v61, %s3946_s9  ;;  %v2086_v61 = vadd.f32 %v2084_v46, %v2082_v49  ;;  %v1907_v16 = vmul.f32 %v4857_v22, %v4606_v6 }
 0x504   : > { %v1909_v19 = vadd.f32 %v1907_v16, %v1905_v34  ;;  %v1923_v8 = vpop.permute.xlu1 %1922 }
 0x505   : > { %v1929_v21 = vpop.permute.xlu0 %1928  ;;  %v1927_v47 = vmul.f32 %v1923_v8, %v4739_v50 }
 0x506   : > { %v1934_v24 = vmul.f32 %v1929_v21, %v4558_v4  ;;  %2152 = vrot.lane.b32.xlu0 %v2147_v7, %s3946_s9  ;;  %v1843_v7 = vadd.f32 %v1841_v37, %v1831_v13  ;;  %v2114_v21 = vmul.f32 %v4795_v55, %v4551_v58  ;;  %v2112_v37 = vmul.f32 %v4793_v59, %v4708_v35 }
 0x507   : > { %v2113_v13 = vmul.f32 %v4804_v23, %v4725_v53 }
 0x508   : > { %v1936_v25 = vadd.f32 %v1934_v24, %v1926_v48  ;;  %v2087_v48 = vadd.f32 %v2085_v29, %v2083_v26 }
 0x509   : > { %v1961_v28 = vpop.permute.xlu0 %1960 }
 0x50a   : > { %1846 = vrot.lane.b32.xlu0 %v1842_v11, %s3944_s6  ;;  %1940 = vrot.lane.b32.xlu1 %v1936_v25, %s3946_s9  ;;  %v2116_v25 = vadd.f32 %v2114_v21, %v2112_v37  ;;  %v2115_v11 = vmul.f32 %v4812_v18, %v4562_v60  ;;  %v1966_v8 = vmul.f32 %v1961_v28, %v4529_v52 }
 0x50b   : > { %v1956_v37 = vmul.f32 %v1951_v2, %v4704_v56 }
 0x50c   : > { %v2117_v59 = vadd.f32 %v2115_v11, %v2113_v13 }
 0x50d   : > { %v1931_v63 = vpop.permute.xlu0 %1930  ;;  %v1968_v11 = vadd.f32 %v1966_v8, %v1956_v37 }
 0x50e   : > { %1848 = vrot.lane.b32.xlu0 %v1843_v7, %s3944_s6  ;;  %2090 = vrot.lane.b32.xlu1 %v2086_v61, %s3944_s6  ;;  %v1935_v24 = vmul.f32 %v1931_v63, %v4567_v62  ;;  %v1953_v7 = vpop.permute.xlu1 %1952  ;;  %v1904_v63 = vmul.f32 %v4823_v9, %v4753_v10 }
 0x50f   : > { %v1957_v37 = vmul.f32 %v1953_v7, %v4720_v43 }
 0x510   : > { %v1937_v55 = vadd.f32 %v1935_v24, %v1927_v47 }
 0x511   : > { %v1963_v46 = vpop.permute.xlu0 %1962 }
 0x512   : > { %1914 = vrot.lane.b32.xlu0 %v1909_v19, %s3944_s6  ;;  %2092 = vrot.lane.b32.xlu1 %v2087_v48, %s3944_s6  ;;  %v4918_v34 = vpop.permute.xlu1 %1998  ;;  %v1967_v8 = vmul.f32 %v1963_v46, %v4537_v17 }
 0x513   : > { %v2004_v13 = vmul.f32 %v4918_v34, %v4743_v1 }
 0x515   : > { %v4898_v49 = vpop.permute.xlu0 %2006 }
 0x516   : > { %1942 = vrot.lane.b32.xlu0 %v1937_v55, %s3946_s9  ;;  %2120 = vrot.lane.b32.xlu1 %v2116_v25, %s3944_s6  ;;  %v4920_v21 = vpop.permute.xlu1 %2000  ;;  %v2012_v25 = vmul.f32 %v4898_v49, %v4558_v4 }
 0x519   : > { %v4904_v61 = vpop.permute.xlu0 %2008 }
 0x51a   : > { %2122 = vrot.lane.b32.xlu1 %v2117_v59, %s3944_s6  ;;  %v4922_v48 = vpop.permute.xlu1 %1802 }
 0x51d   : > { %v4907_v29 = vpop.permute.xlu0 %1812 }
 0x51e   : > { %v2025_v19 = vpop.permute.xlu1 %2024 }
 0x51f   : > { %v2030_v55 = vadd.f32 %v2025_v19, %v4825_v27 }
 0x521   : > { %v4909_v16 = vpop.permute.xlu0 %1804 }
 0x522   : > { %v4924_v24 = vpop.permute.xlu1 %1814 }
 0x525   : > { %v4911_v18 = vpop.permute.xlu0 %1894 }
 0x526   : > { %v1906_v23 = vmul.f32 %v4911_v18, %v4594_v0 }
 0x528   : > { %v1908_v26 = vadd.f32 %v1906_v23, %v1904_v63  ;;  %v2014_v23 = vadd.f32 %v2012_v25, %v2004_v13  ;;  %v2013_v25 = vmul.f32 %v4904_v61, %v4567_v62 }
 0x529   : > { %v2027_v19 = vpop.permute.xlu0 %2026 }
 0x52a   : > { %1912 = vrot.lane.b32.xlu0 %v1908_v26, %s3944_s6  ;;  %v2031_v13 = vadd.f32 %v2027_v19, %v4840_v54  ;;  %v2048_v54 = vmul.f32 %v4828_v40, %v4529_v52  ;;  %v2069_v52 = vmul.f32 %v4909_v16, %v4739_v50 }
 0x544   : > { %v1991_v47 = vpop.permute.xlu1 %1990 }
 0x545   : > { %v1996_v59 = vadd.f32 %v1991_v47, %v1968_v11  ;;  %v1969_v11 = vadd.f32 %v1967_v8, %v1957_v37 }
 0x547   : > { %v4938_v28 = vadd.f32 %v2014_v23, %v1996_v59 }
 0x548   : > { %v4933_v63 = vpop.permute.xlu1 %1792 }
 0x549   : > { %v4936_v26 = vadd.f32 %v2030_v55, %v4933_v63  ;;  %v2168_v27 = vmul.f32 %v4938_v28, %v4938_v28  ;;  %v2005_v55 = vmul.f32 %v4920_v21, %v4739_v50 }
 0x54b   : > { %v2180_v2 = vmul.f32 %v4936_v26, %v4936_v26 }
 0x54d   : > { %2184 = vrot.lane.b32.xlu0 %v2180_v2, %s3944_s6  ;;  %v2015_v2 = vadd.f32 %v2013_v25, %v2005_v55  ;;  %v2040_v25 = vmul.f32 %v4776_v30, %v4704_v56  ;;  %v2071_v56 = vmul.f32 %v4924_v24, %v4567_v62 }
 0x54f   : > { %v2050_v55 = vadd.f32 %v2048_v54, %v2040_v25  ;;  %v2073_v54 = vadd.f32 %v2071_v56, %v2069_v52 }
 0x551   : > { %2172 = vrot.lane.b32.xlu0 %v2168_v27, %s3945_s8 }
 0x558   : > { %v1993_v47 = vpop.permute.xlu0 %1992 }
 0x559   : > { %v1997_v59 = vadd.f32 %v1993_v47, %v1969_v11  ;;  %v2070_v47 = vmul.f32 %v4907_v29, %v4558_v4  ;;  %v2049_v11 = vmul.f32 %v4818_v15, %v4537_v17  ;;  %v2041_v4 = vmul.f32 %v4780_v51, %v4720_v43 }
 0x55b   : > { %v4958_v46 = vadd.f32 %v2015_v2, %v1997_v59  ;;  %v2051_v15 = vadd.f32 %v2049_v11, %v2041_v4  ;;  %v2077_v4 = vmul.f32 %v4725_v53, %v4612_v20 }
 0x55c   : > { %v4953_v23 = vpop.permute.xlu1 %1794 }
 0x55d   : > { %v4956_v27 = vadd.f32 %v2031_v13, %v4953_v23  ;;  %v2169_v8 = vmul.f32 %v4958_v46, %v4958_v46  ;;  %v2068_v13 = vmul.f32 %v4922_v48, %v4743_v1 }
 0x55f   : > { %v2181_v7 = vmul.f32 %v4956_v27, %v4956_v27  ;;  %v2072_v40 = vadd.f32 %v2070_v47, %v2068_v13 }
 0x560   : > { %v2137_v39 = vpop.permute.xlu1 %2136 }
 0x561   : > { %2186 = vrot.lane.b32.xlu0 %v2181_v7, %s3944_s6  ;;  %v2142_v17 = vadd.f32 %v2137_v39, %v4785_v14 }
 0x564   : > { %v2151_v37 = vpop.permute.xlu1 %2150 }
 0x565   : > { %2174 = vrot.lane.b32.xlu0 %v2169_v8, %s3945_s8  ;;  %v4989_v8 = vadd.f32 %v2151_v37, %v2142_v17 }
 0x567   : > { %v2212_v39 = vmul.f32 %v4989_v8, %v4989_v8 }
 0x568   : > { %v4968_v19 = vpop.permute.xlu1 %1760 }
 0x56c   : > { %v4978_v59 = vpop.permute.xlu1 %1762  ;;  %v2061_v2 = vpop.permute.xlu0 %2060 }
 0x56d   : > { %v2066_v7 = vadd.f32 %v2061_v2, %v2050_v55 }
 0x56f   : > { %v4987_v30 = vadd.f32 %v2072_v40, %v2066_v7  ;;  %v289_v40 = vld [vmem:[#allocation7 + $0x38] sm:$0xff] }
 0x570   : > { %v2063_v1 = vpop.permute.xlu0 %2062  ;;  %v4993_v47 = vpop.permute.xlu1 %1874 }
 0x571   : > { %v2067_v25 = vadd.f32 %v2063_v1, %v2051_v15  ;;  %v2192_v50 = vmul.f32 %v4987_v30, %v4987_v30  ;;  %v1901_v15 = vmul.f32 %v4857_v22, %v4612_v20  ;;  %v2079_v1 = vmul.f32 %v4696_v41, %v4562_v60 }
 0x572   : > { %v2108_v22 = vmul.f32 %v4907_v29, %v4551_v58 }
 0x573   : > { %v4995_v55 = vadd.f32 %v2073_v54, %v2067_v25  ;;  %2196 = vrot.lane.b32.xlu1 %v2192_v50, %s3945_s8  ;;  %v290_v54 = vld [vmem:[#allocation7 + $0x68] sm:$0xff]  ;;  %v291_v25 = vld [vmem:[#allocation7 + $0x98] sm:$0xff] }
 0x574   : > { %v2139_v62 = vpop.permute.xlu0 %2138  ;;  %v5005_v14 = vpop.permute.xlu1 %1876  ;;  %v3621_v50 = vpack.c.bf16 %v291_v25, %v290_v54 }
 0x575   : > { %v2193_v43 = vmul.f32 %v4995_v55, %v4995_v55  ;;  %v2143_v51 = vadd.f32 %v2139_v62, %v4806_v44  ;;  %v288_v44 = vld [vmem:[#allocation7 + $0x8] sm:$0xff]  ;;  %v1891_v62 = vmul.f32 %v4853_v36, %v4696_v41  ;;  %v2106_v36 = vmul.f32 %v4922_v48, %v4708_v35 }
 0x576   : > { %v3617_v7 = vpack.c.bf16 %v289_v40, %v288_v44  ;;  %v2101_v40 = vmul.f32 %v4725_v53, %v4606_v6 }
 0x577   : > { %2198 = vrot.lane.b32.xlu0 %v2193_v43, %s3945_s8  ;;  %2216 = vrot.lane.b32.xlu1 %v2212_v39, %s3946_s9  ;;  %v2081_v39 = vadd.f32 %v2079_v1, %v2077_v4  ;;  %v2099_v43 = vmul.f32 %v4729_v3, %v4562_v60  ;;  %v1903_v44 = vadd.f32 %v1901_v15, %v1891_v62 }
 0x578   : > { %v2153_v37 = vpop.permute.xlu0 %2152  ;;  %3618 = vmatprep.subr.bf16.mxu0 %v3617_v7  ;;  %v2128_v4 = vmul.f32 %v4918_v34, %v4753_v10  ;;  %v2110_v54 = vadd.f32 %v2108_v22, %v2106_v36  ;;  %v2107_v15 = vmul.f32 %v4909_v16, %v4725_v53  ;;  %v2100_v36 = vmul.f32 %v4708_v35, %v4594_v0 }
 0x579   : > { %v5007_v11 = vadd.f32 %v2153_v37, %v2143_v51  ;;  %3620 = vmatpush3.bf16.msra.mxu0 %v3617_v7  ;;  %v2130_v51 = vmul.f32 %v4898_v49, %v4594_v0  ;;  %v2103_v49 = vadd.f32 %v2101_v40, %v2099_v43  ;;  %v1818_v0 = vmul.f32 %v4907_v29, %v4600_v5 }
 0x57a   : > { %3622 = vmatprep.subr.bf16.mxu0 %v3621_v50 }
 0x57b   : > { %v2213_v13 = vmul.f32 %v5007_v11, %v5007_v11  ;;  %2236 = vrot.lane.b32.xlu1 %v4936_v26, %s3944_s6  ;;  %v2132_v25 = vadd.f32 %v2130_v51, %v2128_v4 }
 0x57c   : > { %v5013_v2 = vpop.permute.xlu1 %1940  ;;  %v5015_v52 = vpop.permute.xlu0 %1846 }
 0x57d   : > { %2218 = vrot.lane.b32.xlu0 %v2213_v13, %s3946_s9  ;;  %3624 = vmatpush3.bf16.msra.mxu0 %v3621_v50  ;;  %v2129_v50 = vmul.f32 %v4920_v21, %v4729_v3  ;;  %v2076_v3 = vmul.f32 %v4708_v35, %v4600_v5  ;;  %v1900_v21 = vmul.f32 %v4911_v18, %v4600_v5 }
 0x57e   : > { %v1732_v35 = vmul.f32 %v4693_v38, %v4600_v5 }
 0x57f   : > { %2246 = vrot.lane.b32.xlu1 %v4989_v8, %s3946_s9 }
 0x580   : > { %v5022_v56 = vpop.permute.xlu0 %1848  ;;  %v2091_v17 = vpop.permute.xlu1 %2090 }
 0x581   : > { %2238 = vrot.lane.b32.xlu0 %v4956_v27, %s3944_s6 }
 0x584   : > { %v1915_v37 = vpop.permute.xlu0 %1914  ;;  %v2093_v13 = vpop.permute.xlu1 %2092 }
 0x585   : > { %v2097_v7 = vadd.f32 %v2093_v13, %v2081_v39  ;;  %2248 = vrot.lane.b32.xlu0 %v5007_v11, %s3946_s9  ;;  %v1919_v1 = vadd.f32 %v1915_v37, %v1903_v44  ;;  %v2109_v39 = vmul.f32 %v4924_v24, %v4562_v60  ;;  %v2131_v13 = vmul.f32 %v4904_v61, %v4606_v6 }
 0x586   : > { %v2078_v37 = vmul.f32 %v4693_v38, %v4551_v58  ;;  %v2098_v44 = vmul.f32 %v4753_v10, %v4551_v58 }
 0x587   : > { %v5052_v12 = vadd.f32 %v2103_v49, %v2097_v7  ;;  %v2111_v60 = vadd.f32 %v2109_v39, %v2107_v15  ;;  %v2133_v6 = vadd.f32 %v2131_v13, %v2129_v50  ;;  %v1890_v7 = vmul.f32 %v4823_v9, %v4693_v38 }
 0x588   : > { %v1943_v62 = vpop.permute.xlu0 %1942  ;;  %v2121_v32 = vpop.permute.xlu1 %2120  ;;  %v2080_v40 = vadd.f32 %v2078_v37, %v2076_v3  ;;  %v1808_v9 = vmul.f32 %v4922_v48, %v4693_v38  ;;  %v1733_v39 = vmul.f32 %v4696_v41, %v4612_v20 }
 0x589   : > { %v5054_v31 = vadd.f32 %v1943_v62, %v1919_v1  ;;  %v2126_v34 = vadd.f32 %v2121_v32, %v2110_v54  ;;  %v1902_v1 = vadd.f32 %v1900_v21, %v1890_v7  ;;  %v2102_v54 = vadd.f32 %v2100_v36, %v2098_v44 }
 0x58a   : > { %v2096_v4 = vadd.f32 %v2091_v17, %v2080_v40  ;;  %v1820_v17 = vadd.f32 %v1818_v0, %v1808_v9  ;;  %v1734_v62 = vadd.f32 %v1732_v35, %v1732_v35  ;;  %v2205_v9 = vmul.f32 %v5052_v12, %v5052_v12 }
 0x58b   : > { %v2273_v53 = vsub.f32 %v5054_v31, %v5052_v12  ;;  %v5062_v43 = vadd.f32 %v5052_v12, %v5054_v31  ;;  %v5064_v22 = vadd.f32 %v2132_v25, %v2126_v34  ;;  %v1819_v34 = vmul.f32 %v4924_v24, %v4612_v20 }
 0x58c   : > { %v2123_v51 = vpop.permute.xlu1 %2122  ;;  %v5084_v25 = vadd.f32 %v2102_v54, %v2096_v4  ;;  %v1852_v13 = vadd.f32 %v5015_v52, %v1820_v17  ;;  %v1766_v50 = vadd.f32 %v4968_v19, %v1734_v62 }
 0x58d   : > { %v2127_v61 = vadd.f32 %v2123_v51, %v2111_v60  ;;  %2280 = vrot.lane.b32.xlu1 %v5064_v22, %s3944_s6  ;;  %v1735_v60 = vadd.f32 %v1733_v39, %v1733_v39  ;;  %v2208_v54 = vmul.f32 %v5064_v22, %v5064_v22 }
 0x58e   : > { %v5110_v38 = vadd.f32 %v4993_v47, %v1852_v13  ;;  %v2204_v4 = vmul.f32 %v5084_v25, %v5084_v25 }
 0x58f   : > { %v5068_v32 = vadd.f32 %v2133_v6, %v2127_v61  ;;  %v2165_v61 = vmul.f32 %v5054_v31, %v5054_v31 }
 0x590   : > { %v2160_v20 = vmul.f32 %v5110_v38, %v5110_v38 }
 0x591   : > { %2282 = vrot.lane.b32.xlu0 %v5068_v32, %s3944_s6  ;;  %v2209_v39 = vmul.f32 %v5068_v32, %v5068_v32 }
 0x59c   : > { %v1913_v49 = vpop.permute.xlu0 %1912 }
 0x59d   : > { %v1918_v15 = vadd.f32 %v1913_v49, %v1902_v1 }
 0x59f   : > { %v5087_v18 = vadd.f32 %v5013_v2, %v1918_v15  ;;  %v1809_v2 = vmul.f32 %v4909_v16, %v4696_v41  ;;  %v5114_v16 = vadd.f32 %v4933_v63, %v1766_v50  ;;  %v1767_v41 = vadd.f32 %v4978_v59, %v1735_v60 }
 0x5a1   : > { %v2272_v58 = vsub.f32 %v5087_v18, %v5084_v25  ;;  %v5093_v10 = vadd.f32 %v5084_v25, %v5087_v18  ;;  %v1821_v5 = vadd.f32 %v1819_v34, %v1809_v2  ;;  %v5123_v24 = vadd.f32 %v4953_v23, %v1767_v41 }
 0x5a2   : > { %v2158_v19 = vmul.f32 %v5114_v16, %v5114_v16  ;;  %v2164_v47 = vmul.f32 %v5087_v18, %v5087_v18 }
 0x5a3   : > { %v1853_v48 = vadd.f32 %v5022_v56, %v1821_v5 }
 0x5a4   : > { %v2162_v56 = vadd.f32 %v2160_v20, %v2158_v19 }
 0x5a5   : > { %v5118_v52 = vadd.f32 %v5005_v14, %v1853_v48  ;;  %v2159_v14 = vmul.f32 %v5123_v24, %v5123_v24 }
 0x5a6   : > { %v2166_v6 = vadd.f32 %v2164_v47, %v2162_v56 }
 0x5a7   : > { %v2161_v59 = vmul.f32 %v5118_v52, %v5118_v52 }
 0x5a9   : > { %v2163_v3 = vadd.f32 %v2161_v59, %v2159_v14 }
 0x5ab   : > { %v2167_v37 = vadd.f32 %v2165_v61, %v2163_v3 }
 0x5bf   : > { %v2185_v29 = vpop.permute.xlu0 %2184 }
 0x5c3   : > { %v2173_v51 = vpop.permute.xlu0 %2172 }
 0x5c4   : > { %v2178_v23 = vadd.f32 %v2173_v51, %v2166_v6 }
 0x5c6   : > { %v2190_v40 = vadd.f32 %v2185_v29, %v2178_v23 }
 0x5d3   : > { %v2187_v63 = vpop.permute.xlu0 %2186 }
 0x5d7   : > { %v2175_v21 = vpop.permute.xlu0 %2174 }
 0x5d8   : > { %v2179_v44 = vadd.f32 %v2175_v21, %v2167_v37 }
 0x5da   : > { %v2191_v49 = vadd.f32 %v2187_v63, %v2179_v44 }
 0x5e5   : > { %v2197_v7 = vpop.permute.xlu1 %2196 }
 0x5e6   : > { %v2202_v36 = vadd.f32 %v2197_v7, %v2190_v40 }
 0x5e8   : > { %v2206_v1 = vadd.f32 %v2204_v4, %v2202_v36 }
 0x5e9   : > { %v2199_v15 = vpop.permute.xlu0 %2198  ;;  %v2217_v0 = vpop.permute.xlu1 %2216 }
 0x5ea   : > { %v2203_v35 = vadd.f32 %v2199_v15, %v2191_v49  ;;  %v2210_v17 = vadd.f32 %v2208_v54, %v2206_v1 }
 0x5ec   : > { %v2207_v2 = vadd.f32 %v2205_v9, %v2203_v35  ;;  %v2222_v62 = vadd.f32 %v2217_v0, %v2210_v17 }
 0x5ed   : > { %v2237_v13 = vpop.permute.xlu1 %2236 }
 0x5ee   : > { %v2224_v34 = vadd.f32 1.0, %v2222_v62  ;;  %v2211_v29 = vadd.f32 %v2209_v39, %v2207_v2  ;;  %v2242_v5 = vadd.f32 %v2237_v13, %v5114_v16 }
 0x5ef   : > { %v2219_v50 = vpop.permute.xlu0 %2218 }
 0x5f0   : > { %3766 = vrcp.f32 %v2224_v34  ;;  %v2223_v22 = vadd.f32 %v2219_v50, %v2211_v29 }
 0x5f1   : > { %v2247_v60 = vpop.permute.xlu1 %2246 }
 0x5f2   : > { %v2225_v48 = vadd.f32 1.0, %v2223_v22  ;;  %v2252_v41 = vadd.f32 %v2247_v60, %v2242_v5 }
 0x5f3   : > { %v2239_v51 = vpop.permute.xlu0 %2238 }
 0x5f4   : > { %3768 = vrcp.f32 %v2225_v48  ;;  %v5144_v20 = vmul.f32 0.33333334, %v2252_v41  ;;  %v2243_v19 = vadd.f32 %v2239_v51, %v5123_v24 }
 0x5f6   : > { %2306 = vrot.lane.b32.xlu1 %v5144_v20, %s3945_s8 }
 0x5f7   : > { %v2249_v32 = vpop.permute.xlu0 %2248 }
 0x5f8   : > { %v2253_v47 = vadd.f32 %v2249_v32, %v2243_v19 }
 0x5fa   : > { %v3767_v63 = vpop.eup %3766  ;;  %v5149_v56 = vmul.f32 0.33333334, %v2253_v47 }
 0x5fb   : > { %v2228_v59 = vmul.f32 %v3767_v63, %v2224_v34 }
 0x5fc   : > { %2308 = vrot.lane.b32.xlu0 %v5149_v56, %s3945_s8 }
 0x5fd   : > { %v2230_v6 = vsub.f32 2.0, %v2228_v59 }
 0x5fe   : > { %v3769_v14 = vpop.eup %3768 }
 0x5ff   : > { %v5153_v61 = vmul.f32 %v3767_v63, %v2230_v6  ;;  %v2229_v23 = vmul.f32 %v3769_v14, %v2225_v48  ;;  %v2281_v40 = vpop.permute.xlu1 %2280 }
 0x600   : > { %v2286_v7 = vsub.f32 %v4987_v30, %v2281_v40  ;;  %v2350_v13 = vadd.f32 %v2281_v40, %v4987_v30 }
 0x601   : > { %v2231_v3 = vsub.f32 2.0, %v2229_v23  ;;  %2292 = vrot.lane.b32.xlu1 %v5153_v61, %s3944_s6  ;;  %v2256_v21 = vmul.f32 %v5144_v20, %v5153_v61 }
 0x602   : > { %v2288_v1 = vmul.f32 0.5, %v2286_v7  ;;  %v2352_v48 = vmul.f32 0.5, %v2350_v13 }
 0x603   : > { %v5159_v37 = vmul.f32 %v3769_v14, %v2231_v3  ;;  %3531 = vmatprep.mubr.msk.f32.mxu0 %vm400_vm0, %v2256_v21  ;;  %v2283_v36 = vpop.permute.xlu0 %2282  ;;  %v2274_v14 = vmul.f32 0.5, %v2272_v58  ;;  %v2275_v21 = vmul.f32 0.5, %v2273_v53  ;;  %v2300_v58 = vsub.f32 %v5114_v16, %v5144_v20 }
 0x604   : > { %v2287_v49 = vsub.f32 %v4995_v55, %v2283_v36  ;;  %v2301_v53 = vsub.f32 %v5123_v24, %v5149_v56 }
 0x605   : > { %v2257_v44 = vmul.f32 %v5149_v56, %v5159_v37  ;;  %2294 = vrot.lane.b32.xlu0 %v5159_v37, %s3944_s6  ;;  %2322 = vrot.lane.b32.xlu1 %v5144_v20, %s3946_s9  ;;  %v2276_v3 = vmul.f32 %v2274_v14, %v5153_v61  ;;  %v2302_v31 = vmul.f32 %v2300_v58, %v5153_v61 }
 0x606   : > { %v2289_v35 = vmul.f32 0.5, %v2287_v49  ;;  %v2303_v7 = vmul.f32 %v2301_v53, %v5159_v37 }
 0x607   : > { %3532 = vmatmul.mubr.msk.f32.vlgmr.msra.gmra.mrb[18].mxu0 %vm400_vm0, %v2257_v44  ;;  %v2277_v44 = vmul.f32 %v2275_v21, %v5159_v37 }
 0x609   : > { %2324 = vrot.lane.b32.xlu0 %v5149_v56, %s3946_s9  ;;  %2314 = vrot.lane.b32.xlu1 %v5153_v61, %s3945_s8 }
 0x60d   : > { %2316 = vrot.lane.b32.xlu0 %v5159_v37, %s3945_s8  ;;  %2330 = vrot.lane.b32.xlu1 %v5153_v61, %s3946_s9 }
 0x611   : > { %2332 = vrot.lane.b32.xlu0 %v5159_v37, %s3946_s9  ;;  %2260 = vrot.lane.b32.xlu1 %v4938_v28, %s3945_s8 }
 0x615   : > { %2262 = vrot.lane.b32.xlu0 %v4958_v46, %s3945_s8 }
 0x668   : > { %v2307_v4 = vpop.permute.xlu1 %2306 }
 0x669   : > { %v2312_v2 = vsub.f32 %v4936_v26, %v2307_v4  ;;  %v2351_v26 = vadd.f32 %v2283_v36, %v4995_v55 }
 0x66b   : > { %v2353_v32 = vmul.f32 0.5, %v2351_v26 }
 0x66e   : > { %v2309_v54 = vpop.permute.xlu0 %2308 }
 0x66f   : > { %v2313_v34 = vsub.f32 %v4956_v27, %v2309_v54 }
 0x673   : > { %v2293_v15 = vpop.permute.xlu1 %2292 }
 0x674   : > { %v2298_v0 = vmul.f32 %v2293_v15, %v2288_v1  ;;  %v2354_v27 = vmul.f32 %v2352_v48, %v2293_v15 }
 0x676   : > { %2358 = vrot.lane.b32.xlu1 %v2298_v0, %s3945_s8  ;;  %v2347_v0 = vmul.f32 0.5, %v5062_v43 }
 0x677   : > { %v2295_v9 = vpop.permute.xlu0 %2294  ;;  %v2323_v17 = vpop.permute.xlu1 %2322 }
 0x678   : > { %v2299_v28 = vmul.f32 %v2295_v9, %v2289_v35  ;;  %v2328_v29 = vsub.f32 %v4989_v8, %v2323_v17  ;;  %v2355_v55 = vmul.f32 %v2353_v32, %v2295_v9  ;;  %v2349_v35 = vmul.f32 %v2347_v0, %v5159_v37 }
 0x67a   : > { %2360 = vrot.lane.b32.xlu0 %v2299_v28, %s3945_s8 }
 0x67b   : > { %v2325_v46 = vpop.permute.xlu0 %2324  ;;  %v2315_v62 = vpop.permute.xlu1 %2314 }
 0x67c   : > { %v2320_v39 = vmul.f32 %v2315_v62, %v2312_v2  ;;  %v2329_v41 = vsub.f32 %v5007_v11, %v2325_v46 }
 0x67e   : > { %2364 = vrot.lane.b32.xlu1 %v2320_v39, %s3944_s6 }
 0x67f   : > { %v2317_v50 = vpop.permute.xlu0 %2316  ;;  %v2331_v5 = vpop.permute.xlu1 %2330 }
 0x680   : > { %v2321_v22 = vmul.f32 %v2317_v50, %v2313_v34  ;;  %v2336_v60 = vmul.f32 %v2331_v5, %v2328_v29 }
 0x682   : > { %2366 = vrot.lane.b32.xlu0 %v2321_v22, %s3944_s6  ;;  %2370 = vrot.lane.b32.xlu1 %v2336_v60, %s3946_s9 }
 0x683   : > { %v2333_v30 = vpop.permute.xlu0 %2332  ;;  %v2261_v51 = vpop.permute.xlu1 %2260 }
 0x684   : > { %v2337_v19 = vmul.f32 %v2333_v30, %v2329_v41  ;;  %v2266_v8 = vsub.f32 %v5110_v38, %v2261_v51  ;;  %v2338_v36 = vadd.f32 %v2261_v51, %v5110_v38  ;;  %v2346_v38 = vmul.f32 0.5, %v5093_v10 }
 0x686   : > { %v2268_v47 = vmul.f32 0.5, %v2266_v8  ;;  %2372 = vrot.lane.b32.xlu0 %v2337_v19, %s3946_s9  ;;  %2376 = vrot.lane.b32.xlu1 %v2354_v27, %s3945_s8  ;;  %v2340_v20 = vmul.f32 0.5, %v2338_v36 }
 0x687   : > { %v2263_v63 = vpop.permute.xlu0 %2262 }
 0x688   : > { %v2270_v11 = vmul.f32 %v2268_v47, %v5153_v61  ;;  %v2267_v59 = vsub.f32 %v5118_v52, %v2263_v63  ;;  %v2339_v16 = vadd.f32 %v2263_v63, %v5118_v52  ;;  %v2342_v56 = vmul.f32 %v2340_v20, %v5153_v61 }
 0x689   : > { %v2348_v52 = vmul.f32 %v2346_v38, %v5153_v61 }
 0x68a   : > { %v2269_v6 = vmul.f32 0.5, %v2267_v59  ;;  %2378 = vrot.lane.b32.xlu0 %v2355_v55, %s3945_s8  ;;  %3534 = vmatprep.mubr.msk.f32.mxu0 %vm400_vm0, %v2270_v11  ;;  %v2341_v24 = vmul.f32 0.5, %v2339_v16 }
 0x68c   : > { %v2271_v23 = vmul.f32 %v2269_v6, %v5159_v37  ;;  %v2343_v15 = vmul.f32 %v2341_v24, %v5159_v37 }
 0x68e   : > { %3535 = vmatmul.mubr.msk.f32.gmra.mrb[20].mxu0 %vm400_vm0, %v2271_v23 }
 0x68f   : > { %3537 = vmatprep.mubr.msk.f32.mxu0 %vm400_vm0, %v2276_v3 }
 0x692   : > { %3538 = vmatmul.mubr.msk.f32.gmra.mrb[22].mxu0 %vm400_vm0, %v2277_v44 }
 0x6da   : > { %v5215_v40 = vpop.f32.mrb[18].mxu0 }
 0x6db   : > { %v5217_v25 = vpop.f32.mrb[19].mxu0 }
 0x6e8   : > { %v2359_v18 = vpop.permute.xlu1 %2358 }
 0x6e9   : > { %3540 = vmatprep.mubr.msk.f32.mxu0 %vm400_vm0, %v2359_v18 }
 0x6ec   : > { %v2361_v12 = vpop.permute.xlu0 %2360 }
 0x6ed   : > { %3541 = vmatmul.mubr.msk.f32.gmra.mrb[24].mxu0 %vm400_vm0, %v2361_v12 }
 0x6ee   : > { %3543 = vmatprep.mubr.msk.f32.mxu0 %vm400_vm0, %v2302_v31 }
 0x6f0   : > { %v2365_v4 = vpop.permute.xlu1 %2364 }
 0x6f1   : > { %3544 = vmatmul.mubr.msk.f32.gmra.mrb[26].mxu0 %vm400_vm0, %v2303_v7 }
 0x6f2   : > { %3546 = vmatprep.mubr.msk.f32.mxu0 %vm400_vm0, %v2365_v4 }
 0x6f4   : > { %v2367_v1 = vpop.permute.xlu0 %2366  ;;  %v2371_v49 = vpop.permute.xlu1 %2370 }
 0x6f5   : > { %3547 = vmatmul.mubr.msk.f32.gmra.mrb[28].mxu0 %vm400_vm0, %v2367_v1 }
 0x6f6   : > { %3549 = vmatprep.mubr.msk.f32.mxu0 %vm400_vm0, %v2371_v49 }
 0x6f8   : > { %v2373_v54 = vpop.permute.xlu0 %2372  ;;  %v2377_v9 = vpop.permute.xlu1 %2376 }
 0x6f9   : > { %3550 = vmatmul.mubr.msk.f32.gmra.mrb[30].mxu0 %vm400_vm0, %v2373_v54 }
 0x6fa   : > { %3552 = vmatprep.mubr.msk.f32.mxu0 %vm400_vm0, %v2342_v56 }
 0x6fc   : > { %v2379_v10 = vpop.permute.xlu0 %2378 }
 0x6fd   : > { %3553 = vmatmul.mubr.msk.f32.gmra.mrb[32].mxu0 %vm400_vm0, %v2343_v15 }
 0x6fe   : > { %3555 = vmatprep.mubr.msk.f32.mxu0 %vm400_vm0, %v2348_v52 }
 0x701   : > { %3556 = vmatmul.mubr.msk.f32.gmra.mrb[34].mxu0 %vm400_vm0, %v2349_v35 }
 0x702   : > { %3558 = vmatprep.mubr.msk.f32.mxu0 %vm400_vm0, %v2377_v9 }
 0x705   : > { %3559 = vmatmul.mubr.msk.f32.gmra.mrb[36].mxu0 %vm400_vm0, %v2379_v10 }
 0x761   : > { %v5247_v17 = vpop.f32.mrb[20].mxu0 }
 0x762   : > { %v5249_v28 = vpop.f32.mrb[21].mxu0 }
 0x765   : > { %v5251_v61 = vpop.f32.mrb[22].mxu0 }
 0x766   : > { %v5253_v43 = vpop.f32.mrb[23].mxu0 }
 0x7c0   : > { %v5255_v2 = vpop.f32.mrb[24].mxu0 }
 0x7c1   : > { %v5257_v46 = vpop.f32.mrb[25].mxu0 }
 0x7c4   : > { %v3545_v37 = vpop.f32.mrb[26].mxu0 }
 0x7c5   : > { %v2538_v62 = vpop.f32.mrb[27].mxu0 }
 0x7c8   : > { %v3548_v39 = vpop.f32.mrb[28].mxu0 }
 0x7c9   : > { %2611 = vrot.lane.b32.xlu0 %v3548_v39, %s3946_s9  ;;  %v2548_v13 = vpop.f32.mrb[29].mxu0 }
 0x7ca   : > { %2609 = vrot.lane.b32.xlu1 %v2548_v13, %s3946_s9 }
 0x7cc   : > { %v3551_v34 = vpop.f32.mrb[30].mxu0 }
 0x7cd   : > { %2621 = vrot.lane.b32.xlu0 %v3551_v34, %s3946_s9  ;;  %v2558_v29 = vpop.f32.mrb[31].mxu0 }
 0x7ce   : > { %2619 = vrot.lane.b32.xlu1 %v2558_v29, %s3946_s9 }
 0x7d0   : > { %v3554_v50 = vpop.f32.mrb[32].mxu0 }
 0x7d1   : > { %v2568_v5 = vpop.f32.mrb[33].mxu0 }
 0x7d4   : > { %v3557_v22 = vpop.f32.mrb[34].mxu0 }
 0x7d5   : > { %v2578_v60 = vpop.f32.mrb[35].mxu0 }
 0x7d8   : > { %v3560_v48 = vpop.f32.mrb[36].mxu0 }
 0x7d9   : > { %2671 = vrot.lane.b32.xlu0 %v3560_v48, %s3944_s6  ;;  %v2588_v26 = vpop.f32.mrb[37].mxu0 }
 0x7da   : > { %2669 = vrot.lane.b32.xlu1 %v2588_v26, %s3944_s6 }
 0x7dd   : > { %2681 = vrot.lane.b32.xlu0 %v5255_v2, %s3945_s8 }
 0x7de   : > { %2679 = vrot.lane.b32.xlu1 %v5257_v46, %s3945_s8 }
 0x7e1   : > { %2641 = vrot.lane.b32.xlu0 %v5247_v17, %s3945_s8 }
 0x7e2   : > { %2639 = vrot.lane.b32.xlu1 %v5249_v28, %s3945_s8 }
 0x7e5   : > { %2661 = vrot.lane.b32.xlu0 %v5251_v61, %s3945_s8 }
 0x7e6   : > { %2659 = vrot.lane.b32.xlu1 %v5253_v43, %s3945_s8 }
 0x7e9   : > { %2631 = vrot.lane.b32.xlu0 %v3554_v50, %s3944_s6 }
 0x7ea   : > { %2629 = vrot.lane.b32.xlu1 %v2568_v5, %s3944_s6 }
 0x7ed   : > { %2651 = vrot.lane.b32.xlu0 %v3557_v22, %s3944_s6 }
 0x7ee   : > { %2649 = vrot.lane.b32.xlu1 %v2578_v60, %s3944_s6 }
 0x7f1   : > { %2601 = vrot.lane.b32.xlu0 %v3545_v37, %s3946_s9 }
 0x7f2   : > { %2599 = vrot.lane.b32.xlu1 %v2538_v62, %s3946_s9 }
 0x83b   : > { %v2612_v41 = vpop.permute.xlu0 %2611 }
 0x83c   : > { %v2610_v30 = vpop.permute.xlu1 %2609  ;;  %v5312_v18 = vadd.f32 %v5215_v40, %v2612_v41 }
 0x83d   : > { %v5315_v58 = vadd.f32 %v2610_v30, %v5217_v25 }
 0x83e   : > { %v2930_v16 = vmul.f32 %v5312_v18, %v5312_v18 }
 0x83f   : > { %v2622_v51 = vpop.permute.xlu0 %2621  ;;  %v2929_v20 = vmul.f32 %v5315_v58, %v5315_v58 }
 0x840   : > { %v2620_v27 = vpop.permute.xlu1 %2619  ;;  %v5322_v12 = vadd.f32 %v5215_v40, %v2622_v51 }
 0x841   : > { %v5325_v31 = vadd.f32 %v2620_v27, %v5217_v25 }
 0x84b   : > { %v2672_v19 = vpop.permute.xlu0 %2671 }
 0x84c   : > { %v2670_v8 = vpop.permute.xlu1 %2669  ;;  %v5332_v53 = vadd.f32 %v5255_v2, %v2672_v19 }
 0x84d   : > { %v5335_v7 = vadd.f32 %v2670_v8, %v5257_v46 }
 0x84f   : > { %v2682_v32 = vpop.permute.xlu0 %2681 }
 0x850   : > { %v2680_v47 = vpop.permute.xlu1 %2679  ;;  %v5299_v21 = vsub.f32 %v3560_v48, %v2682_v32 }
 0x851   : > { %v5301_v44 = vsub.f32 %v2588_v26, %v2680_v47 }
 0x853   : > { %v2642_v63 = vpop.permute.xlu0 %2641 }
 0x854   : > { %v5283_v55 = vsub.f32 %v3554_v50, %v2642_v63  ;;  %v2640_v11 = vpop.permute.xlu1 %2639 }
 0x855   : > { %v5285_v59 = vsub.f32 %v2568_v5, %v2640_v11 }
 0x856   : > { %2879 = vrot.lane.b32.xlu0 %v5283_v55, %s3946_s9 }
 0x857   : > { %v2662_v6 = vpop.permute.xlu0 %2661  ;;  %2877 = vrot.lane.b32.xlu1 %v5285_v59, %s3946_s9 }
 0x858   : > { %v5291_v14 = vsub.f32 %v3557_v22, %v2662_v6  ;;  %v2660_v23 = vpop.permute.xlu1 %2659  ;;  %v3104_v6 = vmul.f32 %v5322_v12, %v5322_v12 }
 0x859   : > { %v5293_v3 = vsub.f32 %v2578_v60, %v2660_v23  ;;  %v3103_v23 = vmul.f32 %v5325_v31, %v5325_v31 }
 0x85a   : > { %2713 = vrot.lane.b32.xlu0 %v5291_v14, %s3944_s6 }
 0x85b   : > { %2711 = vrot.lane.b32.xlu1 %v5293_v3, %s3944_s6  ;;  %v2632_v36 = vpop.permute.xlu0 %2631 }
 0x85c   : > { %v2630_v4 = vpop.permute.xlu1 %2629  ;;  %v5352_v1 = vadd.f32 %v5247_v17, %v2632_v36 }
 0x85d   : > { %v5355_v49 = vadd.f32 %v2630_v4, %v5249_v28 }
 0x85e   : > { %2771 = vrot.lane.b32.xlu0 %v5299_v21, %s3944_s6 }
 0x85f   : > { %2769 = vrot.lane.b32.xlu1 %v5301_v44, %s3944_s6  ;;  %v2652_v24 = vpop.permute.xlu0 %2651 }
 0x860   : > { %v2650_v56 = vpop.permute.xlu1 %2649  ;;  %v5362_v54 = vadd.f32 %v5251_v61, %v2652_v24  ;;  %v5754_v24 = vld [vmem:[#allocation17_spill] sm:$0xff] }
 0x861   : > { %v5365_v38 = vadd.f32 %v2650_v56, %v5253_v43  ;;  %v5755_v56 = vld [vmem:[#allocation14_spill] sm:$0xff] }
 0x862   : > { %3063 = vrot.lane.b32.xlu0 %v5299_v21, %s3946_s9 }
 0x863   : > { %3061 = vrot.lane.b32.xlu1 %v5301_v44, %s3946_s9  ;;  %v2602_v15 = vpop.permute.xlu0 %2601 }
 0x864   : > { %v2600_v52 = vpop.permute.xlu1 %2599  ;;  %v5380_v0 = vadd.f32 %v5215_v40, %v2602_v15  ;;  %v2814_v40 = vmul.f32 %v5332_v53, %v5352_v1 }
 0x865   : > { %v5383_v35 = vadd.f32 %v2600_v52, %v5217_v25  ;;  %v2813_v25 = vmul.f32 %v5335_v7, %v5355_v49 }
 0x866   : > { %2751 = vrot.lane.b32.xlu0 %v5312_v18, %s3945_s8 }
 0x867   : > { %2749 = vrot.lane.b32.xlu1 %v5315_v58, %s3945_s8 }
 0x86a   : > { %2829 = vrot.lane.b32.xlu0 %v5322_v12, %s3945_s8 }
 0x86b   : > { %2827 = vrot.lane.b32.xlu1 %v5325_v31, %s3945_s8 }
 0x86e   : > { %2967 = vrot.lane.b32.xlu0 %v5332_v53, %s3944_s6 }
 0x86f   : > { %2965 = vrot.lane.b32.xlu1 %v5335_v7, %s3944_s6 }
 0x872   : > { %2693 = vrot.lane.b32.xlu0 %v5283_v55, %s3944_s6 }
 0x873   : > { %2691 = vrot.lane.b32.xlu1 %v5285_v59, %s3944_s6 }
 0x876   : > { %2935 = vrot.lane.b32.xlu0 %v2930_v16, %s3945_s8 }
 0x877   : > { %2933 = vrot.lane.b32.xlu1 %v2929_v20, %s3945_s8 }
 0x87a   : > { %2741 = vrot.lane.b32.xlu0 %v5352_v1, %s3944_s6 }
 0x87b   : > { %2739 = vrot.lane.b32.xlu1 %v5355_v49, %s3944_s6 }
 0x87e   : > { %2849 = vrot.lane.b32.xlu0 %v5362_v54, %s3945_s8 }
 0x87f   : > { %2847 = vrot.lane.b32.xlu1 %v5365_v38, %s3945_s8 }
 0x882   : > { %2807 = vrot.lane.b32.xlu0 %v5362_v54, %s3944_s6 }
 0x883   : > { %2805 = vrot.lane.b32.xlu1 %v5365_v38, %s3944_s6 }
 0x886   : > { %3019 = vrot.lane.b32.xlu0 %v5291_v14, %s3946_s9 }
 0x887   : > { %3017 = vrot.lane.b32.xlu1 %v5293_v3, %s3946_s9 }
 0x88a   : > { %2871 = vrot.lane.b32.xlu0 %v5380_v0, %s3946_s9 }
 0x88b   : > { %2869 = vrot.lane.b32.xlu1 %v5383_v35, %s3946_s9 }
 0x88e   : > { %3045 = vrot.lane.b32.xlu0 %v5352_v1, %s3945_s8 }
 0x88f   : > { %3043 = vrot.lane.b32.xlu1 %v5355_v49, %s3945_s8 }
 0x892   : > { %3053 = vrot.lane.b32.xlu0 %v5312_v18, %s3946_s9 }
 0x893   : > { %3051 = vrot.lane.b32.xlu1 %v5315_v58, %s3946_s9 }
 0x896   : > { %2819 = vrot.lane.b32.xlu0 %v2814_v40, %s3944_s6 }
 0x897   : > { %2817 = vrot.lane.b32.xlu1 %v2813_v25, %s3944_s6 }
 0x8c8   : > { %v2880_v9 = vpop.permute.xlu0 %2879 }
 0x8c9   : > { %v2878_v10 = vpop.permute.xlu1 %2877  ;;  %v2884_v19 = vmul.f32 %v2880_v9, %v5312_v18  ;;  %v5760_v9 = vld [vmem:[#allocation20_spill] sm:$0xff] }
 0x8ca   : > { %v2883_v8 = vmul.f32 %v2878_v10, %v5315_v58  ;;  %v5761_v10 = vld [vmem:[#allocation19_spill] sm:$0xff] }
 0x8cc   : > { %v5403_v17 = vpop.permute.xlu0 %2713 }
 0x8cd   : > { %v5405_v28 = vpop.permute.xlu1 %2711  ;;  %v2896_v32 = vmul.f32 %v5403_v17, %v5332_v53 }
 0x8ce   : > { %v2895_v47 = vmul.f32 %v5405_v28, %v5335_v7 }
 0x8d0   : > { %v5407_v61 = vpop.permute.xlu0 %2771 }
 0x8d1   : > { %v2776_v43 = vmul.f32 %v5407_v61, %v5362_v54  ;;  %v5411_v2 = vpop.permute.xlu1 %2769 }
 0x8d2   : > { %v2775_v46 = vmul.f32 %v5411_v2, %v5365_v38 }
 0x8d3   : > { %2781 = vrot.lane.b32.xlu0 %v2776_v43, %s3944_s6 }
 0x8d4   : > { %v3064_v37 = vpop.permute.xlu0 %3063  ;;  %2779 = vrot.lane.b32.xlu1 %v2775_v46, %s3944_s6 }
 0x8d5   : > { %v3062_v62 = vpop.permute.xlu1 %3061  ;;  %v3068_v63 = vmul.f32 %v3064_v37, %v5322_v12 }
 0x8d6   : > { %v3067_v11 = vmul.f32 %v3062_v62, %v5325_v31  ;;  %v5487_v62 = vmul.f32 %v5403_v17, %v5362_v54 }
 0x8d8   : > { %v2752_v39 = vpop.permute.xlu0 %2751 }
 0x8d9   : > { %v2756_v13 = vmul.f32 %v2752_v39, %v5352_v1  ;;  %v2750_v34 = vpop.permute.xlu1 %2749 }
 0x8da   : > { %v2755_v29 = vmul.f32 %v2750_v34, %v5355_v49  ;;  %v5491_v34 = vmul.f32 %v5405_v28, %v5365_v38 }
 0x8db   : > { %2761 = vrot.lane.b32.xlu0 %v2756_v13, %s3944_s6 }
 0x8dc   : > { %v2830_v50 = vpop.permute.xlu0 %2829  ;;  %2759 = vrot.lane.b32.xlu1 %v2755_v29, %s3944_s6 }
 0x8dd   : > { %v2984_v5 = vmul.f32 %v2830_v50, %v5332_v53  ;;  %v2828_v22 = vpop.permute.xlu1 %2827  ;;  %v2834_v48 = vmul.f32 %v2830_v50, %v5362_v54  ;;  %v5495_v50 = vmul.f32 %v5407_v61, %v5332_v53 }
 0x8de   : > { %v2983_v60 = vmul.f32 %v2828_v22, %v5335_v7  ;;  %v2833_v26 = vmul.f32 %v2828_v22, %v5365_v38 }
 0x8df   : > { %2989 = vrot.lane.b32.xlu0 %v2984_v5, %s3945_s8  ;;  %v5501_v5 = vmul.f32 %v5411_v2, %v5335_v7 }
 0x8e0   : > { %2987 = vrot.lane.b32.xlu1 %v2983_v60, %s3945_s8  ;;  %v2968_v41 = vpop.permute.xlu0 %2967 }
 0x8e1   : > { %v2966_v30 = vpop.permute.xlu1 %2965  ;;  %v2972_v51 = vmul.f32 %v2968_v41, %v5312_v18 }
 0x8e2   : > { %v2971_v27 = vmul.f32 %v2966_v30, %v5315_v58 }
 0x8e3   : > { %2839 = vrot.lane.b32.xlu0 %v2834_v48, %s3944_s6 }
 0x8e4   : > { %2837 = vrot.lane.b32.xlu1 %v2833_v26, %s3944_s6  ;;  %v2694_v36 = vpop.permute.xlu0 %2693 }
 0x8e5   : > { %v2692_v4 = vpop.permute.xlu1 %2691  ;;  %v2698_v43 = vmul.f32 %v2694_v36, %v5352_v1 }
 0x8e6   : > { %v2697_v46 = vmul.f32 %v2692_v4, %v5355_v49 }
 0x8e7   : > { %2977 = vrot.lane.b32.xlu0 %v2972_v51, %s3946_s9 }
 0x8e8   : > { %2975 = vrot.lane.b32.xlu1 %v2971_v27, %s3946_s9  ;;  %v2936_v16 = vpop.permute.xlu0 %2935 }
 0x8e9   : > { %v2934_v20 = vpop.permute.xlu1 %2933  ;;  %v2940_v39 = vadd.f32 %v2936_v16, %v2698_v43 }
 0x8ea   : > { %v2939_v29 = vadd.f32 %v2934_v20, %v2697_v46 }
 0x8eb   : > { %2889 = vrot.lane.b32.xlu0 %v2884_v19, %s3946_s9  ;;  %v2944_v54 = vadd.f32 %v5495_v50, %v2940_v39 }
 0x8ec   : > { %2887 = vrot.lane.b32.xlu1 %v2883_v8, %s3946_s9  ;;  %v2742_v15 = vpop.permute.xlu0 %2741  ;;  %v2943_v38 = vadd.f32 %v5501_v5, %v2939_v29 }
 0x8ed   : > { %v2740_v52 = vpop.permute.xlu1 %2739 }
 0x8ef   : > { %2901 = vrot.lane.b32.xlu0 %v2896_v32, %s3945_s8  ;;  %v2746_v32 = vmul.f32 %v2742_v15, %v5380_v0 }
 0x8f0   : > { %2899 = vrot.lane.b32.xlu1 %v2895_v47, %s3945_s8  ;;  %v5473_v40 = vpop.permute.xlu0 %2849  ;;  %v2745_v47 = vmul.f32 %v2740_v52, %v5383_v35 }
 0x8f1   : > { %v5475_v25 = vpop.permute.xlu1 %2847 }
 0x8f2   : > { %v2961_v15 = vmul.f32 %v5475_v25, %v5285_v59 }
 0x8f3   : > { %3073 = vrot.lane.b32.xlu0 %v3068_v63, %s3946_s9 }
 0x8f4   : > { %3071 = vrot.lane.b32.xlu1 %v3067_v11, %s3946_s9  ;;  %v2808_v37 = vpop.permute.xlu0 %2807 }
 0x8f5   : > { %v2806_v13 = vpop.permute.xlu1 %2805 }
 0x8f7   : > { %3109 = vrot.lane.b32.xlu0 %v3104_v6, %s3945_s8 }
 0x8f8   : > { %3107 = vrot.lane.b32.xlu1 %v3103_v23, %s3945_s8  ;;  %v3020_v17 = vpop.permute.xlu0 %3019 }
 0x8f9   : > { %v3018_v28 = vpop.permute.xlu1 %3017  ;;  %v3024_v61 = vmul.f32 %v3020_v17, %v5322_v12 }
 0x8fa   : > { %v3023_v22 = vmul.f32 %v3018_v28, %v5325_v31 }
 0x8fb   : > { %407 = vrot.lane.b32.xlu0 %v4311_v42, %s3945_s8  ;;  %v5756_v42 = vld [vmem:[#allocation18_spill] sm:$0xff] }
 0x8fc   : > { %405 = vrot.lane.b32.xlu1 %v4283_v33, %s3945_s8  ;;  %v5757_v33 = vld [vmem:[#allocation15_spill] sm:$0xff]  ;;  %v5513_v2 = vpop.permute.xlu0 %2871 }
 0x8fd   : > { %v5515_v60 = vpop.permute.xlu1 %2869 }
 0x8ff   : > { %442 = vrot.lane.b32.xlu0 %v4348_v57, %s3945_s8  ;;  %v5758_v57 = vld [vmem:[#allocation16_spill] sm:$0xff] }
 0x900   : > { %440 = vrot.lane.b32.xlu1 %v4333_v45, %s3945_s8  ;;  %v5759_v45 = vld [vmem:[#allocation13_spill] sm:$0xff]  ;;  %v3046_v48 = vpop.permute.xlu0 %3045 }
 0x901   : > { %v3044_v26 = vpop.permute.xlu1 %3043 }
 0x903   : > { %418 = vrot.lane.b32.xlu0 %v5754_v24, %s3946_s9 }
 0x904   : > { %416 = vrot.lane.b32.xlu1 %v5755_v56, %s3946_s9  ;;  %v3054_v41 = vpop.permute.xlu0 %3053 }
 0x905   : > { %v3052_v30 = vpop.permute.xlu1 %3051 }
 0x907   : > { %452 = vrot.lane.b32.xlu0 %v5756_v42, %s3946_s9  ;;  %v2962_v42 = vmul.f32 %v5473_v40, %v5283_v55 }
 0x908   : > { %450 = vrot.lane.b32.xlu1 %v5757_v33, %s3946_s9  ;;  %v2820_v51 = vpop.permute.xlu0 %2819 }
 0x909   : > { %v2818_v27 = vpop.permute.xlu1 %2817 }
 0x90b   : > { %429 = vrot.lane.b32.xlu0 %v5758_v57, %s3944_s6 }
 0x90c   : > { %427 = vrot.lane.b32.xlu1 %v5759_v45, %s3944_s6 }
 0x90f   : > { %462 = vrot.lane.b32.xlu0 %v5760_v9, %s3944_s6  ;;  %v2812_v9 = vmul.f32 %v2808_v37, %v5380_v0 }
 0x910   : > { %460 = vrot.lane.b32.xlu1 %v5761_v10, %s3944_s6 }
 0x911   : > { %v2824_v29 = vadd.f32 %v2820_v51, %v2812_v9  ;;  %v2876_v51 = vmul.f32 %v5513_v2, %v5283_v55 }
 0x913   : > { %2703 = vrot.lane.b32.xlu0 %v2698_v43, %s3944_s6  ;;  %v2811_v43 = vmul.f32 %v2806_v13, %v5383_v35 }
 0x914   : > { %2701 = vrot.lane.b32.xlu1 %v2697_v46, %s3944_s6 }
 0x917   : > { %2723 = vrot.lane.b32.xlu0 %v5487_v62, %s3944_s6 }
 0x918   : > { %2721 = vrot.lane.b32.xlu1 %v5491_v34, %s3944_s6 }
 0x91b   : > { %2953 = vrot.lane.b32.xlu0 %v2944_v54, %s3944_s6 }
 0x91c   : > { %2951 = vrot.lane.b32.xlu1 %v2943_v38, %s3944_s6  ;;  %v2823_v38 = vadd.f32 %v2818_v27, %v2811_v43  ;;  %v2875_v27 = vmul.f32 %v5515_v60, %v5285_v59 }
 0x91f   : > { %3029 = vrot.lane.b32.xlu0 %v3024_v61, %s3946_s9 }
 0x920   : > { %3027 = vrot.lane.b32.xlu1 %v3023_v22, %s3946_s9 }
 0x945   : > { %v2782_v19 = vpop.permute.xlu0 %2781 }
 0x946   : > { %v2780_v8 = vpop.permute.xlu1 %2779 }
 0x94d   : > { %v2762_v63 = vpop.permute.xlu0 %2761 }
 0x94e   : > { %v2766_v11 = vadd.f32 %v2762_v63, %v2746_v32  ;;  %v2760_v6 = vpop.permute.xlu1 %2759  ;;  %v3057_v63 = vmul.f32 %v3052_v30, %v5301_v44 }
 0x94f   : > { %v2765_v23 = vadd.f32 %v2760_v6, %v2745_v47  ;;  %v3050_v6 = vmul.f32 %v3046_v48, %v5291_v14 }
 0x950   : > { %v2786_v36 = vadd.f32 %v2782_v19, %v2766_v11 }
 0x951   : > { %v2785_v4 = vadd.f32 %v2780_v8, %v2765_v23  ;;  %v2990_v16 = vpop.permute.xlu0 %2989  ;;  %v3058_v8 = vmul.f32 %v3054_v41, %v5299_v21 }
 0x952   : > { %2795 = vrot.lane.b32.xlu0 %v2786_v36, %s3945_s8  ;;  %v2988_v20 = vpop.permute.xlu1 %2987  ;;  %v3049_v36 = vmul.f32 %v3044_v26, %v5293_v3  ;;  %v3102_v26 = vadd.f32 %v5495_v50, %v5487_v62 }
 0x953   : > { %2793 = vrot.lane.b32.xlu1 %v2785_v4, %s3945_s8 }
 0x955   : > { %v2840_v24 = vpop.permute.xlu0 %2839 }
 0x956   : > { %v2838_v56 = vpop.permute.xlu1 %2837  ;;  %v2844_v17 = vadd.f32 %v2840_v24, %v2824_v29  ;;  %v2687_v29 = vmul.f32 %v5383_v35, %v5383_v35 }
 0x957   : > { %v2843_v28 = vadd.f32 %v2838_v56, %v2823_v38 }
 0x959   : > { %v2978_v33 = vpop.permute.xlu0 %2977 }
 0x95a   : > { %v2982_v52 = vadd.f32 %v2978_v33, %v2962_v42  ;;  %v2976_v57 = vpop.permute.xlu1 %2975 }
 0x95b   : > { %v2981_v45 = vadd.f32 %v2976_v57, %v2961_v15  ;;  %v3101_v15 = vadd.f32 %v5501_v5, %v5491_v34 }
 0x95c   : > { %v2994_v10 = vadd.f32 %v2990_v16, %v2982_v52  ;;  %v3060_v16 = vadd.f32 %v3058_v8, %v3050_v6 }
 0x95d   : > { %v2993_v46 = vadd.f32 %v2988_v20, %v2981_v45  ;;  %v2890_v39 = vpop.permute.xlu0 %2889  ;;  %v3059_v20 = vadd.f32 %v3057_v63, %v3049_v36 }
 0x95e   : > { %3003 = vrot.lane.b32.xlu0 %v2994_v10, %s3944_s6  ;;  %v2888_v54 = vpop.permute.xlu1 %2887  ;;  %v2894_v32 = vadd.f32 %v2890_v39, %v2876_v51 }
 0x95f   : > { %3001 = vrot.lane.b32.xlu1 %v2993_v46, %s3944_s6  ;;  %v2893_v11 = vadd.f32 %v2888_v54, %v2875_v27  ;;  %v2688_v46 = vmul.f32 %v5380_v0, %v5380_v0 }
 0x961   : > { %v2902_v61 = vpop.permute.xlu0 %2901 }
 0x962   : > { %2859 = vrot.lane.b32.xlu0 %v2844_v17, %s3946_s9  ;;  %v2900_v22 = vpop.permute.xlu1 %2899  ;;  %v2906_v23 = vadd.f32 %v2902_v61, %v2894_v32 }
 0x963   : > { %2857 = vrot.lane.b32.xlu1 %v2843_v28, %s3946_s9  ;;  %v2905_v41 = vadd.f32 %v2900_v22, %v2893_v11 }
 0x965   : > { %v3074_v37 = vpop.permute.xlu0 %3073 }
 0x966   : > { %2911 = vrot.lane.b32.xlu0 %v5283_v55, %s3945_s8  ;;  %v3072_v13 = vpop.permute.xlu1 %3071  ;;  %v3078_v48 = vadd.f32 %v3074_v37, %v3060_v16 }
 0x967   : > { %2909 = vrot.lane.b32.xlu1 %v5285_v59, %s3945_s8  ;;  %v3077_v24 = vadd.f32 %v3072_v13, %v3059_v20 }
 0x969   : > { %v3110_v19 = vpop.permute.xlu0 %3109 }
 0x96a   : > { %3083 = vrot.lane.b32.xlu0 %v5299_v21, %s3945_s8  ;;  %v3108_v47 = vpop.permute.xlu1 %3107  ;;  %v3114_v33 = vadd.f32 %v3110_v19, %v3102_v26 }
 0x96b   : > { %3081 = vrot.lane.b32.xlu1 %v5301_v44, %s3945_s8  ;;  %v3113_v52 = vadd.f32 %v3108_v47, %v3101_v15 }
 0x96d   : > { %v408_v4 = vpop.permute.xlu0 %407 }
 0x96e   : > { %413 = vst.msk [vmem:[%s4288_s12 + $0x18] sm:$0xff] %vm411_vm10, %v408_v4  ;;  %2921 = vrot.lane.b32.xlu0 %v2906_v23, %s3945_s8  ;;  %v406_v30 = vpop.permute.xlu1 %405 }
 0x96f   : > { %412 = vst.msk [vmem:[%s4288_s12] sm:$0xff] %vm411_vm10, %v406_v30  ;;  %2919 = vrot.lane.b32.xlu1 %v2905_v41, %s3945_s8 }
 0x971   : > { %v443_v56 = vpop.permute.xlu0 %442 }
 0x972   : > { %447 = vst.msk [vmem:[%s4288_s12 + $0x20] sm:$0xff] %vm411_vm10, %v443_v56  ;;  %3093 = vrot.lane.b32.xlu0 %v3078_v48, %s3945_s8  ;;  %v441_v42 = vpop.permute.xlu1 %440 }
 0x973   : > { %446 = vst.msk [vmem:[%s4288_s12 + $0x8] sm:$0xff] %vm411_vm10, %v441_v42  ;;  %3091 = vrot.lane.b32.xlu1 %v3077_v24, %s3945_s8 }
 0x975   : > { %v419_v62 = vpop.permute.xlu0 %418 }
 0x976   : > { %424 = vst.msk [vmem:[%s4288_s12 + $0x18] sm:$0xff] %vm422_vm11, %v419_v62  ;;  %3123 = vrot.lane.b32.xlu0 %v3114_v33, %s3944_s6  ;;  %v417_v50 = vpop.permute.xlu1 %416 }
 0x977   : > { %423 = vst.msk [vmem:[%s4288_s12] sm:$0xff] %vm422_vm11, %v417_v50  ;;  %3121 = vrot.lane.b32.xlu1 %v3113_v52, %s3944_s6 }
 0x979   : > { %v453_v34 = vpop.permute.xlu0 %452 }
 0x97a   : > { %457 = vst.msk [vmem:[%s4288_s12 + $0x20] sm:$0xff] %vm422_vm11, %v453_v34  ;;  %v451_v5 = vpop.permute.xlu1 %450 }
 0x97b   : > { %456 = vst.msk [vmem:[%s4288_s12 + $0x8] sm:$0xff] %vm422_vm11, %v451_v5 }
 0x97d   : > { %v430_v57 = vpop.permute.xlu0 %429 }
 0x97e   : > { %435 = vst.msk [vmem:[%s4288_s12 + $0x18] sm:$0xff] %vm433_vm12, %v430_v57  ;;  %v428_v45 = vpop.permute.xlu1 %427 }
 0x97f   : > { %434 = vst.msk [vmem:[%s4288_s12] sm:$0xff] %vm433_vm12, %v428_v45 }
 0x981   : > { %v463_v9 = vpop.permute.xlu0 %462 }
 0x982   : > { %467 = vst.msk [vmem:[%s4288_s12 + $0x20] sm:$0xff] %vm433_vm12, %v463_v9  ;;  %v461_v10 = vpop.permute.xlu1 %460  ;;  %v3011_v9 = vmul.f32 %v5515_v60, %v5293_v3 }
 0x983   : > { %466 = vst.msk [vmem:[%s4288_s12 + $0x8] sm:$0xff] %vm433_vm12, %v461_v10 }
 0x985   : > { %v2704_v43 = vpop.permute.xlu0 %2703  ;;  %v2730_v54 = vld [vmem:[%s4288_s12 + $0x18] sm:$0xff] }
 0x986   : > { %v2702_v39 = vpop.permute.xlu1 %2701  ;;  %v2708_v38 = vadd.f32 %v2704_v43, %v2688_v46  ;;  %v2729_v17 = vld [vmem:[%s4288_s12] sm:$0xff]  ;;  %v2732_v37 = vadd.f32 %v2730_v54, %v5380_v0  ;;  %v3014_v43 = vmul.f32 %v5299_v21, %v5283_v55 }
 0x987   : > { %v2707_v28 = vadd.f32 %v2702_v39, %v2687_v29  ;;  %v2731_v19 = vadd.f32 %v2729_v17, %v5383_v35 }
 0x989   : > { %v2724_v61 = vpop.permute.xlu0 %2723  ;;  %v2946_v22 = vld [vmem:[%s4288_s12 + $0x20] sm:$0xff] }
 0x98a   : > { %v2728_v13 = vadd.f32 %v2724_v61, %v2708_v38  ;;  %v2722_v51 = vpop.permute.xlu1 %2721  ;;  %v2945_v27 = vld [vmem:[%s4288_s12 + $0x8] sm:$0xff]  ;;  %v2948_v47 = vadd.f32 %v2946_v22, %v5312_v18 }
 0x98b   : > { %v2727_v8 = vadd.f32 %v2722_v51, %v2707_v28  ;;  %v2947_v6 = vadd.f32 %v2945_v27, %v5315_v58 }
 0x98c   : > { %v2734_v32 = vadd.f32 %v2732_v37, %v2728_v13 }
 0x98d   : > { %v2733_v63 = vadd.f32 %v2731_v19, %v2727_v8  ;;  %v2954_v11 = vpop.permute.xlu0 %2953  ;;  %v3116_v8 = vld [vmem:[%s4288_s12 + $0x28] sm:$0xff] }
 0x98e   : > { %2736 = vst.msk [vmem:[%s4288_s12 + $0x18] sm:$0xff] %vm400_vm0, %v2734_v32  ;;  %v2958_v0 = vadd.f32 %v2954_v11, %v2948_v47  ;;  %v2952_v23 = vpop.permute.xlu1 %2951  ;;  %v3115_v47 = vld [vmem:[%s4288_s12 + $0x10] sm:$0xff] }
 0x98f   : > { %2735 = vst.msk [vmem:[%s4288_s12] sm:$0xff] %vm400_vm0, %v2733_v63  ;;  %v2957_v36 = vadd.f32 %v2952_v23, %v2947_v6 }
 0x990   : > { %2960 = vst.msk [vmem:[%s4288_s12 + $0x20] sm:$0xff] %vm400_vm0, %v2958_v0  ;;  %v3118_v0 = vadd.f32 %v3116_v8, %v5322_v12 }
 0x991   : > { %2959 = vst.msk [vmem:[%s4288_s12 + $0x8] sm:$0xff] %vm400_vm0, %v2957_v36  ;;  %v3030_v18 = vpop.permute.xlu0 %3029 }
 0x992   : > { %v3028_v41 = vpop.permute.xlu1 %3027 }
 0x995   : > { %v2788_v35 = vld [vmem:[%s4288_s12 + $0x18] sm:$0xff] }
 0x996   : > { %v2787_v58 = vld [vmem:[%s4288_s12] sm:$0xff]  ;;  %v2790_v4 = vadd.f32 %v2788_v35, %v5352_v1 }
 0x997   : > { %v2789_v30 = vadd.f32 %v2787_v58, %v5355_v49  ;;  %v2996_v56 = vld [vmem:[%s4288_s12 + $0x20] sm:$0xff] }
 0x998   : > { %v2995_v26 = vld [vmem:[%s4288_s12 + $0x8] sm:$0xff]  ;;  %v2998_v42 = vadd.f32 %v2996_v56, %v5332_v53 }
 0x999   : > { %v2997_v1 = vadd.f32 %v2995_v26, %v5335_v7  ;;  %v3012_v7 = vmul.f32 %v5513_v2, %v5291_v14 }
 0x99b   : > { %v3016_v2 = vadd.f32 %v3014_v43, %v3012_v7 }
 0x99d   : > { %v3034_v29 = vadd.f32 %v3030_v18, %v3016_v2  ;;  %v3117_v18 = vadd.f32 %v3115_v47, %v5325_v31 }
 0x9c4   : > { %v2796_v16 = vpop.permute.xlu0 %2795 }
 0x9c5   : > { %v2800_v20 = vadd.f32 %v2796_v16, %v2790_v4  ;;  %v2794_v48 = vpop.permute.xlu1 %2793 }
 0x9c6   : > { %v2799_v24 = vadd.f32 %v2794_v48, %v2789_v30 }
 0x9c7   : > { %2802 = vst.msk [vmem:[%s4288_s12 + $0x18] sm:$0xff] %vm411_vm10, %v2800_v20 }
 0x9c8   : > { %2801 = vst.msk [vmem:[%s4288_s12] sm:$0xff] %vm411_vm10, %v2799_v24 }
 0x9ce   : > { %v2846_v33 = vld [vmem:[%s4288_s12 + $0x18] sm:$0xff] }
 0x9cf   : > { %v2845_v62 = vld [vmem:[%s4288_s12] sm:$0xff]  ;;  %v2854_v34 = vadd.f32 %v5473_v40, %v2846_v33  ;;  %v3013_v40 = vmul.f32 %v5301_v44, %v5285_v59 }
 0x9d0   : > { %v3004_v15 = vpop.permute.xlu0 %3003  ;;  %v2853_v53 = vadd.f32 %v5475_v25, %v2845_v62 }
 0x9d1   : > { %v3008_v52 = vadd.f32 %v3004_v15, %v2998_v42  ;;  %v3002_v49 = vpop.permute.xlu1 %3001  ;;  %v3015_v39 = vadd.f32 %v3013_v40, %v3011_v9 }
 0x9d2   : > { %v3007_v50 = vadd.f32 %v3002_v49, %v2997_v1 }
 0x9d3   : > { %3010 = vst.msk [vmem:[%s4288_s12 + $0x20] sm:$0xff] %vm411_vm10, %v3008_v52  ;;  %v3033_v21 = vadd.f32 %v3028_v41, %v3015_v39 }
 0x9d4   : > { %3009 = vst.msk [vmem:[%s4288_s12 + $0x8] sm:$0xff] %vm411_vm10, %v3007_v50  ;;  %v2860_v5 = vpop.permute.xlu0 %2859 }
 0x9d5   : > { %v2864_v57 = vadd.f32 %v2860_v5, %v2854_v34  ;;  %v2858_v45 = vpop.permute.xlu1 %2857 }
 0x9d6   : > { %v2863_v10 = vadd.f32 %v2858_v45, %v2853_v53 }
 0x9d7   : > { %2866 = vst.msk [vmem:[%s4288_s12 + $0x18] sm:$0xff] %vm422_vm11, %v2864_v57 }
 0x9d8   : > { %2865 = vst.msk [vmem:[%s4288_s12] sm:$0xff] %vm422_vm11, %v2863_v10  ;;  %v2912_v25 = vpop.permute.xlu0 %2911 }
 0x9d9   : > { %v2910_v46 = vpop.permute.xlu1 %2909 }
 0x9da   : > { %v3036_v60 = vld [vmem:[%s4288_s12 + $0x20] sm:$0xff] }
 0x9db   : > { %v3038_v54 = vadd.f32 %v3036_v60, %v5291_v14  ;;  %v3035_v55 = vld [vmem:[%s4288_s12 + $0x8] sm:$0xff] }
 0x9dc   : > { %v3037_v38 = vadd.f32 %v3035_v55, %v5293_v3  ;;  %v3084_v59 = vpop.permute.xlu0 %3083 }
 0x9dd   : > { %v3040_v44 = vadd.f32 %v3038_v54, %v3034_v29  ;;  %v3082_v17 = vpop.permute.xlu1 %3081 }
 0x9de   : > { %v3039_v28 = vadd.f32 %v3037_v38, %v3033_v21  ;;  %v2908_v61 = vld [vmem:[%s4288_s12 + $0x18] sm:$0xff] }
 0x9df   : > { %3042 = vst.msk [vmem:[%s4288_s12 + $0x20] sm:$0xff] %vm422_vm11, %v3040_v44  ;;  %v2916_v22 = vadd.f32 %v2912_v25, %v2908_v61  ;;  %v2907_v14 = vld [vmem:[%s4288_s12] sm:$0xff] }
 0x9e0   : > { %3041 = vst.msk [vmem:[%s4288_s12 + $0x8] sm:$0xff] %vm422_vm11, %v3039_v28  ;;  %v2915_v37 = vadd.f32 %v2910_v46, %v2907_v14  ;;  %v2922_v3 = vpop.permute.xlu0 %2921 }
 0x9e1   : > { %v2926_v13 = vadd.f32 %v2922_v3, %v2916_v22  ;;  %v2920_v51 = vpop.permute.xlu1 %2919 }
 0x9e2   : > { %v2925_v27 = vadd.f32 %v2920_v51, %v2915_v37 }
 0x9e3   : > { %2928 = vst.msk [vmem:[%s4288_s12 + $0x18] sm:$0xff] %vm433_vm12, %v2926_v13 }
 0x9e4   : > { %2927 = vst.msk [vmem:[%s4288_s12] sm:$0xff] %vm433_vm12, %v2925_v27  ;;  %v3094_v19 = vpop.permute.xlu0 %3093 }
 0x9e5   : > { %v3092_v32 = vpop.permute.xlu1 %3091 }
 0x9e6   : > { %v3080_v63 = vld [vmem:[%s4288_s12 + $0x20] sm:$0xff] }
 0x9e7   : > { %v3088_v11 = vadd.f32 %v3084_v59, %v3080_v63  ;;  %v3079_v6 = vld [vmem:[%s4288_s12 + $0x8] sm:$0xff] }
 0x9e8   : > { %v3087_v23 = vadd.f32 %v3082_v17, %v3079_v6  ;;  %v3124_v36 = vpop.permute.xlu0 %3123 }
 0x9e9   : > { %v3098_v35 = vadd.f32 %v3094_v19, %v3088_v11  ;;  %v3128_v41 = vadd.f32 %v3124_v36, %v3118_v0  ;;  %v3122_v58 = vpop.permute.xlu1 %3121 }
 0x9ea   : > { %v3097_v4 = vadd.f32 %v3092_v32, %v3087_v23  ;;  %v3127_v12 = vadd.f32 %v3122_v58, %v3117_v18 }
 0x9eb   : > { %3100 = vst.msk [vmem:[%s4288_s12 + $0x20] sm:$0xff] %vm433_vm12, %v3098_v35 }
 0x9ec   : > { %3130 = vst.msk [vmem:[%s4288_s12 + $0x28] sm:$0xff] %vm400_vm0, %v3128_v41  ;;  %3129 = vst.msk [vmem:[%s4288_s12 + $0x10] sm:$0xff] %vm400_vm0, %v3127_v12 }
 0x9ed   : > { %3099 = vst.msk [vmem:[%s4288_s12 + $0x8] sm:$0xff] %vm433_vm12, %v3097_v4 }
 0x9ee   : > { %3871 = shalt.err (!%p3868_p8)
}
 0x9ef   : > { %s3872_s21 = scalar_lea.hbm %s5658_s5, 768  ;;  %s3876_s8 = scalar_lea.hbm %s5716_s4, 1536 }
 0x9f0   : > { %p3873_p10 = scmp.ne.s32.totalorder %s5658_s5, %s3872_s21  ;;  %p3877_p11 = scmp.lt.u32.totalorder %s5658_s5, %s5716_s4 }
 0x9f1   : > { %p3878_p13 = scmp.lt.u32.totalorder %s3876_s8, %s3872_s21  ;;  %p3880_p7 = scmp.lt.u32.totalorder %s3872_s21, %s5658_s5 }
 0x9f2   : > { %p3874_p0 = pnand %p3873_p10, %p4066_p12 }
 0x9f3   : > { %p3879_p3 = por %p3878_p13, %p3877_p11 }
 0x9f4   : > { %p3875_p4 = pneg %p3874_p0 }
 0x9f5   : > { %p3881_p9 = por %p3880_p7, %p3879_p3 }
 0x9f7   : > { %p3882_p2 = pnand %p3881_p9, %p3875_p4 }
 0x9f9   : > { %3885 = shalt.err (!%p3882_p2)
}
 0x9fa   : > { %s3948_s14 = smov 384   ;;  %s3949_s13 = smov 24  }
 0x9fb   : > { %3652 = dma.vmem_to_hbm [thread:$0]  (%p4066_p12), %s5660_s7, 768, %s5658_s5, %s3132_s29, %s3948_s14, %s3948_s14, %s3949_s13  }
 0x9fc PF: > { %s3160_s20 = sand.u32 1, %s3920_s15   ;;  %p5762_p5 = scmp.ne.s32.totalorder %s5733_s22, 0 }
 0x9fd   : > { %p5763_p1 = scmp.ge.s32.totalorder %s3932_s18, 2  ;;  %s3161_s26 = scalar_lea.sflag [#allocation4], %s3160_s20 }
 0x9ff   : > { %p3666_p6 = pnand %p5763_p1, %p5762_p5 }
 0xa01   : > { %3915 = dma.done.wait (!%p3666_p6), %s3161_s26, 768  }
 0xa02   : > { %3917 = vsyncadd (!%p3666_p6), %s3161_s26, 4294966528  ;;  %p20_p8 = scmp.ge.s32.totalorder %s4031_s27, 4   ;;  %s5764_s15 = smov %s3924_s16 }
 0xa03   : > { %s5765_s16 = smov %s3928_s17  ;;  %s5766_s17 = smov %s4062_s24 }
 0xa04   : > { %s5767_s18 = smov %s4031_s27  ;;  %22 = sbr.rel (!%p20_p8) target bundleno = 10 (0xa), region = 110 }
 0xa0b   :  { %3166 = vsyncpa [#allocation3], 1 }
 0xa0c   :  { %3168 = vsyncpa [#allocation3 + $0x1], 1 }
 0xa0d   :  { %3169 = vsyncpa [#allocation6], 1 }
 0xa0e   :  { %3171 = vsyncpa [#allocation6 + $0x1], 1 }
 0xa0f   :  { %3172 = vsyncpa [#allocation4], 1 }
 0xa10   :  { %3174 = vsyncpa [#allocation4 + $0x1], 1 }

</bundles_post_ra>
